<compile_context>
chip_gen: v7x
topology: tpu7x:2x2x1
jax: 0.10.0
libtpu: 0.0.40
codegen_flags: <defaults>
</compile_context>

<pallas_src>
import functools

import jax
import jax.numpy as jnp
from jax.experimental import pallas as pl
from jax.experimental.pallas import tpu as pltpu

LANE = 128


def _round_up(n, m):
    return (n + m - 1) // m * m


def linear_net_kernel(x_ref, w1_ref, b1_ref, w2_ref, b2_ref, o_ref):
    # fc1: x (B, Fp) @ w1 (Fp, Hp)  — weights already in (in, out) layout, so
    # this is a plain MXU matmul with no in-kernel re-layout.
    x = x_ref[...].astype(w1_ref.dtype)
    h = jnp.dot(x, w1_ref[...], preferred_element_type=jnp.float32)
    h = jnp.maximum(h + b1_ref[...], 0.0)                  # bias + ReLU in f32
    # fc2: h (B, Hp) @ w2 (Hp, Cp)
    out = jnp.dot(h.astype(w2_ref.dtype), w2_ref[...],
                  preferred_element_type=jnp.float32)
    o_ref[...] = (out + b2_ref[...]).astype(o_ref.dtype)   # bias add in f32


def prepare_params(w1, b1, w2, b2, weights_dtype=jnp.bfloat16):
    """One-time parameter prep (keep OUT of the per-call forward path).

    Takes torch-layout weights (out_features, in_features), transposes them
    ONCE to (in_features, out_features), zero-pads feature dims to multiples
    of 128 (padded bias entries and the matching weight rows/cols are zero, so
    results are unchanged) and casts the large weight matrices to
    `weights_dtype` (default bf16, halving HBM traffic).  Biases stay f32.
    """
    hid, f_in = w1.shape                       # fc1: (hidden, in)
    c = w2.shape[0]                            # fc2: (classes, hidden)
    assert w2.shape[1] == hid, "fc2 input must match fc1 output"
    fp_in = _round_up(f_in, LANE)
    hp = _round_up(hid, LANE)
    cp = _round_up(c, LANE)

    # (in, out) layout => kernel uses plain jnp.dot, no A·Bᵀ re-layout.
    w1_p = jnp.zeros((fp_in, hp), weights_dtype).at[:f_in, :hid].set(
        w1.T.astype(weights_dtype))
    b1_p = jnp.zeros((1, hp), jnp.float32).at[0, :hid].set(
        b1.astype(jnp.float32))
    w2_p = jnp.zeros((hp, cp), weights_dtype).at[:hid, :c].set(
        w2.T.astype(weights_dtype))
    b2_p = jnp.zeros((1, cp), jnp.float32).at[0, :c].set(
        b2.astype(jnp.float32))
    return (w1_p, b1_p, w2_p, b2_p), c


@functools.partial(jax.jit, static_argnames=("num_classes",))
def linear_net(x, w1_p, b1_p, w2_p, b2_p, *, num_classes):
    """x: (B, F) float32; padded params from prepare_params; -> (B, num_classes)."""
    b, f = x.shape
    fp_in, hp = w1_p.shape
    cp = w2_p.shape[1]
    if fp_in != f:                  # pad the tiny activation, not the weights
        x = jnp.pad(x, ((0, 0), (0, fp_in - f)))

    wbytes = jnp.dtype(w1_p.dtype).itemsize
    cost = pl.CostEstimate(
        flops=2 * b * fp_in * hp + 2 * b * hp * cp,
        transcendentals=0,
        bytes_accessed=(w1_p.size + w2_p.size) * wbytes
        + (x.size + b * cp + b1_p.size + b2_p.size) * 4)

    vmem = pltpu.MemorySpace.VMEM
    out_p = pl.pallas_call(
        linear_net_kernel,
        out_shape=jax.ShapeDtypeStruct((b, cp), x.dtype),
        in_specs=[pl.BlockSpec(memory_space=vmem)] * 5,
        out_specs=pl.BlockSpec(memory_space=vmem),
        compiler_params=pltpu.CompilerParams(vmem_limit_bytes=16 << 20),
        cost_estimate=cost,
    )(x, w1_p, b1_p, w2_p, b2_p)
    return out_p[:, :num_classes]


def init_params(key, encoder_features, num_classes, dtype=jnp.float32):
    """Deterministic init mimicking torch.nn.Linear's U(-1/sqrt(fan_in), ...)."""
    k1, k2, k3, k4 = jax.random.split(key, 4)
    bound = 1.0 / (encoder_features ** 0.5)
    w1 = jax.random.uniform(k1, (encoder_features, encoder_features), dtype,
                            minval=-bound, maxval=bound)
    b1 = jax.random.uniform(k2, (encoder_features,), dtype,
                            minval=-bound, maxval=bound)
    w2 = jax.random.uniform(k3, (num_classes, encoder_features), dtype,
                            minval=-bound, maxval=bound)
    b2 = jax.random.uniform(k4, (num_classes,), dtype,
                            minval=-bound, maxval=bound)
    return w1, b1, w2, b2


if __name__ == "__main__":
    encoder_features = 1000
    num_classes = 800
    batch = 8

    key = jax.random.PRNGKey(0)
    kx, kp = jax.random.split(key)
    x = jax.random.normal(kx, (batch, encoder_features), jnp.float32)
    w1, b1, w2, b2 = init_params(kp, encoder_features, num_classes)

    # Pure-JAX reference (same semantics as the PyTorch forward).
    ref = jnp.maximum(x @ w1.T + b1, 0.0) @ w2.T + b2

    # Default bf16-weight path: half the weight HBM bytes, f32 accumulation.
    params_bf16, n_cls = prepare_params(w1, b1, w2, b2)
    out_bf16 = jax.block_until_ready(linear_net(x, *params_bf16, num_classes=n_cls))
    assert out_bf16.shape == (batch, num_classes)
    assert jnp.allclose(out_bf16, ref, atol=5e-2, rtol=5e-2)

    # Exact f32 weight path.
    params_f32, _ = prepare_params(w1, b1, w2, b2, weights_dtype=jnp.float32)
    out_f32 = jax.block_until_ready(linear_net(x, *params_f32, num_classes=n_cls))
    assert out_f32.shape == (batch, num_classes)
    assert jnp.allclose(out_f32, ref, atol=1e-4, rtol=1e-4)

    print("KERNEL_OK")
</pallas_src>

<mosaic_0001>
module attributes {stable_mosaic.version = 11 : i64} {
  func.func @linear_net_kernel(%arg0: memref<8x1024xf32, #tpu.memory_space<vmem>>, %arg1: memref<1024x1024xbf16, #tpu.memory_space<vmem>>, %arg2: memref<1x1024xf32, #tpu.memory_space<vmem>>, %arg3: memref<1024x896xbf16, #tpu.memory_space<vmem>>, %arg4: memref<1x896xf32, #tpu.memory_space<vmem>>, %arg5: memref<8x896xf32, #tpu.memory_space<vmem>>) attributes {dimension_semantics = [], scalar_prefetch = 0 : i64, scratch_operands = 0 : i64, tpu.core_type = #tpu.core_type<tc>} {
    %c0 = arith.constant 0 : index
    %c0_0 = arith.constant 0 : index
    %0 = vector.load %arg0[%c0, %c0_0] : memref<8x1024xf32, #tpu.memory_space<vmem>>, vector<8x1024xf32>
    %1 = arith.truncf %0 : vector<8x1024xf32> to vector<8x1024xbf16>
    %c0_1 = arith.constant 0 : index
    %c0_2 = arith.constant 0 : index
    %2 = vector.load %arg1[%c0_1, %c0_2] : memref<1024x1024xbf16, #tpu.memory_space<vmem>>, vector<1024x1024xbf16>
    %cst = arith.constant dense<0.000000e+00> : vector<8x1024xf32>
    %3 = tpu.matmul %1, %2, %cst {dimension_numbers = #tpu.dot_dimension_numbers<[1], [0], [0], [1], [0, 0, 1, 1], [], []>} : vector<8x1024xbf16>, vector<1024x1024xbf16>, vector<8x1024xf32> -> vector<8x1024xf32>
    %c0_3 = arith.constant 0 : index
    %c0_4 = arith.constant 0 : index
    %4 = vector.load %arg2[%c0_3, %c0_4] : memref<1x1024xf32, #tpu.memory_space<vmem>>, vector<1x1024xf32>
    %5 = vector.broadcast %4 : vector<1x1024xf32> to vector<8x1024xf32>
    %6 = arith.addf %3, %5 : vector<8x1024xf32>
    %cst_5 = arith.constant 0.000000e+00 : f32
    %7 = vector.broadcast %cst_5 : f32 to vector<8x1024xf32>
    %8 = arith.maximumf %6, %7 : vector<8x1024xf32>
    %9 = arith.truncf %8 : vector<8x1024xf32> to vector<8x1024xbf16>
    %c0_6 = arith.constant 0 : index
    %c0_7 = arith.constant 0 : index
    %10 = vector.load %arg3[%c0_6, %c0_7] : memref<1024x896xbf16, #tpu.memory_space<vmem>>, vector<1024x896xbf16>
    %cst_8 = arith.constant dense<0.000000e+00> : vector<8x896xf32>
    %11 = tpu.matmul %9, %10, %cst_8 {dimension_numbers = #tpu.dot_dimension_numbers<[1], [0], [0], [1], [0, 0, 1, 1], [], []>} : vector<8x1024xbf16>, vector<1024x896xbf16>, vector<8x896xf32> -> vector<8x896xf32>
    %c0_9 = arith.constant 0 : index
    %c0_10 = arith.constant 0 : index
    %12 = vector.load %arg4[%c0_9, %c0_10] : memref<1x896xf32, #tpu.memory_space<vmem>>, vector<1x896xf32>
    %13 = vector.broadcast %12 : vector<1x896xf32> to vector<8x896xf32>
    %14 = arith.addf %11, %13 : vector<8x896xf32>
    %c0_11 = arith.constant 0 : index
    %c0_12 = arith.constant 0 : index
    %15 = vector.load %arg5[%c0_11, %c0_12] : memref<8x896xf32, #tpu.memory_space<vmem>>, vector<8x896xf32>
    tpu.vector_store %arg5[%c0_11, %c0_12], %14 {strides = array<i32>} : memref<8x896xf32, #tpu.memory_space<vmem>>, vector<8x896xf32>,
    return
  }
}

</mosaic_0001>

<bundles_post_ra>
// kernel: linear_net.1
= control target key start
LH: loop header
LB: loop body
LE: loop exit
PB: predicated region body
PF: predicated region fallthrough
CT: control target
= control target key end

     0   :  { %10 = vsyncpa [#allocation3], 0  ;;  %s9616_s0 = inlined_call_operand.vmem [shape: f32[8,1024], index: 0, kind: input, shape index: {}]   ;;  %s9617_s1 = inlined_call_operand.hbm [shape: bf16[1024,1024], index: 1, kind: input, shape index: {}]   ;;  %s9618_s2 = inlined_call_operand.hbm [shape: f32[1,1024], index: 2, kind: input, shape index: {}]   ;;  %s9619_s3 = inlined_call_operand.hbm [shape: bf16[1024,896], index: 3, kind: input, shape index: {}]   ;;  %s9620_s4 = inlined_call_operand.hbm [shape: f32[1,896], index: 4, kind: input, shape index: {}]   ;;  %s9621_s5 = inlined_call_operand.hbm [shape: f32[8,896], index: 5, kind: output, shape index: {}]  }
   0x1   :  { %11 = vsyncpa [#allocation6], 0 }
   0x2   :  { %12 = vsyncpa [#allocation9], 0 }
   0x3   :  { %13 = vsyncpa [#allocation4], 0  ;;  %s9316_s18 = smov [#allocation5]   ;;  %s9317_s20 = smov [#allocation2]  }
   0x4   :  { %s34_s19 = sshll.u32 %s9316_s18, 4  ;;  %s21_s21 = sshll.u32 %s9317_s20, 4  ;;  %s35_s19 = int_to_ptr.vmem [resolvable:$true] %s34_s19  ;;  %s9355_s21 = int_to_ptr.vmem [resolvable:$true] %s21_s21 }
   0x5   :  { %s9198_s24 = scalar_lea.hbm %s9618_s2, 128 }
   0x6   :  { %p9199_p0 = scmp.ne.s32.totalorder %s9618_s2, %s9198_s24  ;;  %p9202_p1 = scmp.lt.u32.totalorder %s9198_s24, %s9618_s2 }
   0x8   :  { %p9204_p2 = pnand %p9202_p1, %p9199_p0 }
   0xa   :  { %9207 = shalt.err (!%p9204_p2)
}
   0xb   :  { %s9208_s29 = scalar_lea.vmem %s35_s19, 128  ;;  %p9213_p4 = scmp.lt.s32.totalorder %s35_s19, %s35_s19 }
   0xc   :  { %p9209_p3 = scmp.ne.s32.totalorder %s35_s19, %s9208_s29  ;;  %p9214_p5 = scmp.lt.s32.totalorder %s9208_s29, %s9208_s29 }
   0xe   :  { %p9215_p6 = por %p9214_p5, %p9213_p4 }
  0x10   :  { %p9216_p7 = pnand %p9215_p6, %p9209_p3 }
  0x12   :  { %9219 = shalt.err (!%p9216_p7)
}
  0x13   :  { %37 = dma.hbm_to_vmem [thread:$0]  %s9618_s2, 128, %s35_s19, [#allocation6]  }
  0x14   :  { %s9220_s9 = scalar_lea.hbm %s9617_s1, 65536 }
  0x15   :  { %p9221_p8 = scmp.ne.s32.totalorder %s9617_s1, %s9220_s9  ;;  %p9224_p9 = scmp.lt.u32.totalorder %s9220_s9, %s9617_s1 }
  0x17   :  { %p9226_p10 = pnand %p9224_p9, %p9221_p8 }
  0x19   :  { %9229 = shalt.err (!%p9226_p10)
}
  0x1a   :  { %s9230_s14 = scalar_lea.vmem %s9355_s21, 65536  ;;  %p9235_p12 = scmp.lt.s32.totalorder %s9355_s21, %s9355_s21 }
  0x1b   :  { %p9231_p11 = scmp.ne.s32.totalorder %s9355_s21, %s9230_s14  ;;  %p9236_p13 = scmp.lt.s32.totalorder %s9230_s14, %s9230_s14 }
  0x1d   :  { %p9237_p0 = por %p9236_p13, %p9235_p12 }
  0x1f   :  { %p9238_p1 = pnand %p9237_p0, %p9231_p11 }
  0x21   :  { %9241 = shalt.err (!%p9238_p1)
}
  0x22   :  { %s9318_s2 = smov 512   ;;  %s9319_s15 = smov 32  }
  0x23   :  { %27 = dma.hbm_to_vmem [thread:$0]  %s9617_s1, 65536, %s9355_s21, [#allocation3], %s9318_s2, %s9318_s2, %s9319_s15  }
  0x24   :  { %s9320_s18 = smov [#allocation7]   ;;  %s9242_s23 = scalar_lea.hbm %s9619_s3, 57344 }
  0x25   :  { %s43_s19 = sshll.u32 %s9320_s18, 4  ;;  %p9243_p2 = scmp.ne.s32.totalorder %s9619_s3, %s9242_s23  ;;  %s44_s19 = int_to_ptr.vmem [resolvable:$true] %s43_s19 }
  0x26   :  { %p9246_p3 = scmp.lt.u32.totalorder %s9242_s23, %s9619_s3 }
  0x28   :  { %p9248_p4 = pnand %p9246_p3, %p9243_p2 }
  0x2a   :  { %9251 = shalt.err (!%p9248_p4)
}
  0x2b   :  { %s9252_s28 = scalar_lea.vmem %s44_s19, 57344  ;;  %p9257_p6 = scmp.lt.s32.totalorder %s44_s19, %s44_s19 }
  0x2c   :  { %p9253_p5 = scmp.ne.s32.totalorder %s44_s19, %s9252_s28  ;;  %p9258_p7 = scmp.lt.s32.totalorder %s9252_s28, %s9252_s28 }
  0x2e   :  { %p9259_p8 = por %p9258_p7, %p9257_p6 }
  0x30   :  { %p9260_p9 = pnand %p9259_p8, %p9253_p5 }
  0x32   :  { %9263 = shalt.err (!%p9260_p9)
}
  0x33   :  { %s9321_s1 = smov 448   ;;  %s9322_s21 = smov 28  }
  0x34   :  { %49 = dma.hbm_to_vmem [thread:$0]  %s9619_s3, 57344, %s44_s19, [#allocation6], %s9321_s1, %s9321_s1, %s9322_s21  }
  0x35   :  { %s9323_s6 = smov [#allocation8]   ;;  %s9264_s10 = scalar_lea.hbm %s9620_s4, 112 }
  0x36   :  { %s56_s7 = sshll.u32 %s9323_s6, 4  ;;  %p9265_p10 = scmp.ne.s32.totalorder %s9620_s4, %s9264_s10  ;;  %s57_s7 = int_to_ptr.vmem [resolvable:$true] %s56_s7 }
  0x37   :  { %p9268_p11 = scmp.lt.u32.totalorder %s9264_s10, %s9620_s4 }
  0x39   :  { %p9270_p12 = pnand %p9268_p11, %p9265_p10 }
  0x3b   :  { %9273 = shalt.err (!%p9270_p12)
}
  0x3c   :  { %s9274_s2 = scalar_lea.vmem %s57_s7, 112  ;;  %s9278_s3 = scalar_lea.vmem %s57_s7, 128 }
  0x3d   :  { %p9275_p13 = scmp.ne.s32.totalorder %s57_s7, %s9274_s2  ;;  %p9279_p0 = scmp.lt.s32.totalorder %s57_s7, %s57_s7 }
  0x3e   :  { %p9280_p1 = scmp.lt.s32.totalorder %s9278_s3, %s9274_s2 }
  0x40   :  { %p9281_p2 = por %p9280_p1, %p9279_p0 }
  0x42   :  { %p9282_p3 = pnand %p9281_p2, %p9275_p13 }
  0x44   :  { %9285 = shalt.err (!%p9282_p3)
}
  0x45   :  { %59 = dma.hbm_to_vmem [thread:$0]  %s9620_s4, 112, %s57_s7, [#allocation9]  }
  0x46   :  { %9308 = dma.done.wait [#allocation3], 65536  }
  0x47   :  { %9309 = vsyncadd [#allocation3], 4294901760 }
  0x48   :  { %9310 = dma.done.wait [#allocation6], 57472  }
  0x49   :  { %9311 = vsyncadd [#allocation6], 4294909824 }
  0x4a   :  { %9312 = dma.done.wait [#allocation9], 112  }
  0x4b   :  { %9313 = vsyncadd [#allocation9], 4294967184  ;;  %v89_v0 = vld [vmem:[#allocation2] sm:$0xff]  ;;  %v74_v53 = vld [vmem:[%s9616_s0 + $0x8] sm:$0xff] }
  0x4c   :  { %v93_v1 = vld [vmem:[#allocation2 + $0x20] sm:$0xff]  ;;  %v9413_v57 = vpack.c.bf16 %v74_v53, %v74_v53  ;;  %v76_v58 = vld [vmem:[%s9616_s0 + $0x18] sm:$0xff] }
  0x4d   :  { %v217_v2 = vld [vmem:[#allocation2 + $0x400] sm:$0xff]  ;;  %v7405_v3 = vcombine.high %v89_v0, %v93_v1  ;;  %v7404_v5 = vcombine.low %v89_v0, %v93_v1  ;;  %v9418_v61 = vpack.c.bf16 %v76_v58, %v76_v58 }
  0x4e   :  { %v221_v4 = vld [vmem:[#allocation2 + $0x420] sm:$0xff]  ;;  %3235 = vmatprep.mubr.bf16.mxu1 %v9413_v57 }
  0x4f   :  { %v97_v6 = vld [vmem:[#allocation2 + $0x40] sm:$0xff]  ;;  %v7533_v8 = vcombine.high %v217_v2, %v221_v4  ;;  %v7532_v9 = vcombine.low %v217_v2, %v221_v4  ;;  %3203 = vmatprep.subr.bf16.mxu1 %v7405_v3  ;;  %3276 = vmatprep.mubr.bf16.mxu0 %v9418_v61 }
  0x50   :  { %v101_v7 = vld [vmem:[#allocation2 + $0x60] sm:$0xff]  ;;  %3204 = vmatpush1.bf16.msra.mxu1 %v7404_v5 }
  0x51   :  { %v7413_v10 = vcombine.high %v97_v6, %v101_v7  ;;  %v225_v11 = vld [vmem:[#allocation2 + $0x440] sm:$0xff]  ;;  %3244 = vmatprep.subr.bf16.mxu0 %v7533_v8  ;;  %v7412_v18 = vcombine.low %v97_v6, %v101_v7 }
  0x52   :  { %v229_v12 = vld [vmem:[#allocation2 + $0x460] sm:$0xff]  ;;  %3245 = vmatpush1.bf16.msra.mxu0 %v7532_v9 }
  0x53   :  { %v105_v13 = vld [vmem:[#allocation2 + $0x80] sm:$0xff]  ;;  %v7541_v14 = vcombine.high %v225_v11, %v229_v12  ;;  %3205 = vmatprep.subr.bf16.mxu1 %v7413_v10  ;;  %v7540_v19 = vcombine.low %v225_v11, %v229_v12 }
  0x54   :  { %v109_v15 = vld [vmem:[#allocation2 + $0xa0] sm:$0xff]  ;;  %3206 = vmatpush1.bf16.msra.mxu1 %v7412_v18 }
  0x55   :  { %v233_v16 = vld [vmem:[#allocation2 + $0x480] sm:$0xff]  ;;  %v7421_v20 = vcombine.high %v105_v13, %v109_v15  ;;  %3246 = vmatprep.subr.bf16.mxu0 %v7541_v14  ;;  %v7420_v26 = vcombine.low %v105_v13, %v109_v15 }
  0x56   :  { %v237_v17 = vld [vmem:[#allocation2 + $0x4a0] sm:$0xff]  ;;  %3247 = vmatpush1.bf16.msra.mxu0 %v7540_v19 }
  0x57   :  { %v7549_v21 = vcombine.high %v233_v16, %v237_v17  ;;  %v113_v22 = vld [vmem:[#allocation2 + $0xc0] sm:$0xff]  ;;  %3207 = vmatprep.subr.bf16.mxu1 %v7421_v20  ;;  %v7548_v27 = vcombine.low %v233_v16, %v237_v17 }
  0x58   :  { %v117_v23 = vld [vmem:[#allocation2 + $0xe0] sm:$0xff]  ;;  %3208 = vmatpush1.bf16.msra.mxu1 %v7420_v26 }
  0x59   :  { %v241_v24 = vld [vmem:[#allocation2 + $0x4c0] sm:$0xff]  ;;  %v7429_v28 = vcombine.high %v113_v22, %v117_v23  ;;  %3248 = vmatprep.subr.bf16.mxu0 %v7549_v21  ;;  %v7428_v34 = vcombine.low %v113_v22, %v117_v23 }
  0x5a   :  { %v245_v25 = vld [vmem:[#allocation2 + $0x4e0] sm:$0xff]  ;;  %3249 = vmatpush1.bf16.msra.mxu0 %v7548_v27 }
  0x5b   :  { %v7557_v29 = vcombine.high %v241_v24, %v245_v25  ;;  %v121_v30 = vld [vmem:[#allocation2 + $0x100] sm:$0xff]  ;;  %3209 = vmatprep.subr.bf16.mxu1 %v7429_v28  ;;  %v7556_v35 = vcombine.low %v241_v24, %v245_v25 }
  0x5c   :  { %v125_v31 = vld [vmem:[#allocation2 + $0x120] sm:$0xff]  ;;  %3210 = vmatpush1.bf16.msra.mxu1 %v7428_v34 }
  0x5d   :  { %v249_v32 = vld [vmem:[#allocation2 + $0x500] sm:$0xff]  ;;  %v7437_v36 = vcombine.high %v121_v30, %v125_v31  ;;  %3250 = vmatprep.subr.bf16.mxu0 %v7557_v29  ;;  %v7436_v42 = vcombine.low %v121_v30, %v125_v31 }
  0x5e   :  { %v253_v33 = vld [vmem:[#allocation2 + $0x520] sm:$0xff]  ;;  %3251 = vmatpush1.bf16.msra.mxu0 %v7556_v35 }
  0x5f   :  { %v7565_v37 = vcombine.high %v249_v32, %v253_v33  ;;  %v129_v38 = vld [vmem:[#allocation2 + $0x140] sm:$0xff]  ;;  %3211 = vmatprep.subr.bf16.mxu1 %v7437_v36  ;;  %v7564_v43 = vcombine.low %v249_v32, %v253_v33 }
  0x60   :  { %v133_v39 = vld [vmem:[#allocation2 + $0x160] sm:$0xff]  ;;  %3212 = vmatpush1.bf16.msra.mxu1 %v7436_v42 }
  0x61   :  { %v257_v40 = vld [vmem:[#allocation2 + $0x540] sm:$0xff]  ;;  %v7445_v44 = vcombine.high %v129_v38, %v133_v39  ;;  %3252 = vmatprep.subr.bf16.mxu0 %v7565_v37  ;;  %v7444_v50 = vcombine.low %v129_v38, %v133_v39 }
  0x62   :  { %v261_v41 = vld [vmem:[#allocation2 + $0x560] sm:$0xff]  ;;  %3253 = vmatpush1.bf16.msra.mxu0 %v7564_v43 }
  0x63   :  { %v7573_v45 = vcombine.high %v257_v40, %v261_v41  ;;  %v137_v46 = vld [vmem:[#allocation2 + $0x180] sm:$0xff]  ;;  %3213 = vmatprep.subr.bf16.mxu1 %v7445_v44  ;;  %v7572_v51 = vcombine.low %v257_v40, %v261_v41 }
  0x64   :  { %v141_v47 = vld [vmem:[#allocation2 + $0x1a0] sm:$0xff]  ;;  %3214 = vmatpush1.bf16.msra.mxu1 %v7444_v50 }
  0x65   :  { %v265_v48 = vld [vmem:[#allocation2 + $0x580] sm:$0xff]  ;;  %v7453_v52 = vcombine.high %v137_v46, %v141_v47  ;;  %3254 = vmatprep.subr.bf16.mxu0 %v7573_v45  ;;  %v7452_v62 = vcombine.low %v137_v46, %v141_v47 }
  0x66   :  { %v269_v49 = vld [vmem:[#allocation2 + $0x5a0] sm:$0xff]  ;;  %3255 = vmatpush1.bf16.msra.mxu0 %v7572_v51 }
  0x67   :  { %v7581_v54 = vcombine.high %v265_v48, %v269_v49  ;;  %v145_v55 = vld [vmem:[#allocation2 + $0x1c0] sm:$0xff]  ;;  %3215 = vmatprep.subr.bf16.mxu1 %v7453_v52  ;;  %v7580_v63 = vcombine.low %v265_v48, %v269_v49 }
  0x68   :  { %v149_v56 = vld [vmem:[#allocation2 + $0x1e0] sm:$0xff]  ;;  %3216 = vmatpush1.bf16.msra.mxu1 %v7452_v62 }
  0x69   :  { %v273_v59 = vld [vmem:[#allocation2 + $0x5c0] sm:$0xff]  ;;  %v7461_v0 = vcombine.high %v145_v55, %v149_v56  ;;  %3256 = vmatprep.subr.bf16.mxu0 %v7581_v54  ;;  %v7460_v6 = vcombine.low %v145_v55, %v149_v56 }
  0x6a   :  { %v277_v60 = vld [vmem:[#allocation2 + $0x5e0] sm:$0xff]  ;;  %3257 = vmatpush1.bf16.msra.mxu0 %v7580_v63 }
  0x6b   :  { %v7589_v1 = vcombine.high %v273_v59, %v277_v60  ;;  %v153_v2 = vld [vmem:[#allocation2 + $0x200] sm:$0xff]  ;;  %3217 = vmatprep.subr.bf16.mxu1 %v7461_v0  ;;  %v7588_v7 = vcombine.low %v273_v59, %v277_v60 }
  0x6c   :  { %v157_v3 = vld [vmem:[#allocation2 + $0x220] sm:$0xff]  ;;  %3218 = vmatpush1.bf16.msra.mxu1 %v7460_v6 }
  0x6d   :  { %v281_v4 = vld [vmem:[#allocation2 + $0x600] sm:$0xff]  ;;  %v7469_v8 = vcombine.high %v153_v2, %v157_v3  ;;  %3258 = vmatprep.subr.bf16.mxu0 %v7589_v1  ;;  %v7468_v14 = vcombine.low %v153_v2, %v157_v3 }
  0x6e   :  { %v285_v5 = vld [vmem:[#allocation2 + $0x620] sm:$0xff]  ;;  %3259 = vmatpush1.bf16.msra.mxu0 %v7588_v7 }
  0x6f   :  { %v7597_v9 = vcombine.high %v281_v4, %v285_v5  ;;  %v161_v10 = vld [vmem:[#allocation2 + $0x240] sm:$0xff]  ;;  %3219 = vmatprep.subr.bf16.mxu1 %v7469_v8  ;;  %v7596_v15 = vcombine.low %v281_v4, %v285_v5  ;;  %v90_v4 = vld [vmem:[#allocation2 + $0x8] sm:$0xff] }
  0x70   :  { %v165_v11 = vld [vmem:[#allocation2 + $0x260] sm:$0xff]  ;;  %3220 = vmatpush1.bf16.msra.mxu1 %v7468_v14  ;;  %v94_v5 = vld [vmem:[#allocation2 + $0x28] sm:$0xff] }
  0x71   :  { %v289_v12 = vld [vmem:[#allocation2 + $0x640] sm:$0xff]  ;;  %v7477_v16 = vcombine.high %v161_v10, %v165_v11  ;;  %3260 = vmatprep.subr.bf16.mxu0 %v7597_v9  ;;  %v7476_v22 = vcombine.low %v161_v10, %v165_v11  ;;  %v7407_v11 = vcombine.high %v90_v4, %v94_v5  ;;  %v98_v14 = vld [vmem:[#allocation2 + $0x48] sm:$0xff] }
  0x72   :  { %v293_v13 = vld [vmem:[#allocation2 + $0x660] sm:$0xff]  ;;  %3261 = vmatpush1.bf16.msra.mxu0 %v7596_v15  ;;  %v102_v15 = vld [vmem:[#allocation2 + $0x68] sm:$0xff] }
  0x73   :  { %v7605_v17 = vcombine.high %v289_v12, %v293_v13  ;;  %v169_v18 = vld [vmem:[#allocation2 + $0x280] sm:$0xff]  ;;  %3221 = vmatprep.subr.bf16.mxu1 %v7477_v16  ;;  %v7604_v23 = vcombine.low %v289_v12, %v293_v13  ;;  %v75_v12 = vld [vmem:[%s9616_s0 + $0x10] sm:$0xff] }
  0x74   :  { %v173_v19 = vld [vmem:[#allocation2 + $0x2a0] sm:$0xff]  ;;  %3222 = vmatpush1.bf16.msra.mxu1 %v7476_v22 }
  0x75   :  { %v297_v20 = vld [vmem:[#allocation2 + $0x680] sm:$0xff]  ;;  %v7485_v24 = vcombine.high %v169_v18, %v173_v19  ;;  %3262 = vmatprep.subr.bf16.mxu0 %v7605_v17  ;;  %v7484_v30 = vcombine.low %v169_v18, %v173_v19  ;;  %v78_v19 = vld [vmem:[%s9616_s0 + $0x28] sm:$0xff] }
  0x76   :  { %v301_v21 = vld [vmem:[#allocation2 + $0x6a0] sm:$0xff]  ;;  %3263 = vmatpush1.bf16.msra.mxu0 %v7604_v23  ;;  %v7415_v23 = vcombine.high %v98_v14, %v102_v15 }
  0x77   :  { %v7613_v25 = vcombine.high %v297_v20, %v301_v21  ;;  %v177_v26 = vld [vmem:[#allocation2 + $0x2c0] sm:$0xff]  ;;  %3223 = vmatprep.subr.bf16.mxu1 %v7485_v24  ;;  %v7612_v31 = vcombine.low %v297_v20, %v301_v21  ;;  %v7406_v20 = vcombine.low %v90_v4, %v94_v5  ;;  %v9433_v21 = vpack.c.bf16 %v75_v12, %v75_v12  ;;  %v146_v5 = vld [vmem:[#allocation2 + $0x1c8] sm:$0xff] }
  0x78   :  { %v181_v27 = vld [vmem:[#allocation2 + $0x2e0] sm:$0xff]  ;;  %3224 = vmatpush1.bf16.msra.mxu1 %v7484_v30  ;;  %v7414_v30 = vcombine.low %v98_v14, %v102_v15  ;;  %v158_v15 = vld [vmem:[#allocation2 + $0x228] sm:$0xff] }
  0x79   :  { %v305_v28 = vld [vmem:[#allocation2 + $0x6c0] sm:$0xff]  ;;  %v7493_v32 = vcombine.high %v177_v26, %v181_v27  ;;  %3264 = vmatprep.subr.bf16.mxu0 %v7613_v25  ;;  %v7492_v38 = vcombine.low %v177_v26, %v181_v27  ;;  %v106_v25 = vld [vmem:[#allocation2 + $0x88] sm:$0xff]  ;;  %v9435_v27 = vpack.c.bf16 %v78_v19, %v78_v19 }
  0x7a   :  { %v309_v29 = vld [vmem:[#allocation2 + $0x6e0] sm:$0xff]  ;;  %3265 = vmatpush1.bf16.msra.mxu0 %v7612_v31  ;;  %v110_v26 = vld [vmem:[#allocation2 + $0xa8] sm:$0xff] }
  0x7b   :  { %v7621_v33 = vcombine.high %v305_v28, %v309_v29  ;;  %v185_v34 = vld [vmem:[#allocation2 + $0x300] sm:$0xff]  ;;  %3225 = vmatprep.subr.bf16.mxu1 %v7493_v32  ;;  %v7620_v39 = vcombine.low %v305_v28, %v309_v29  ;;  %v7423_v32 = vcombine.high %v106_v25, %v110_v26 }
  0x7c   :  { %v189_v35 = vld [vmem:[#allocation2 + $0x320] sm:$0xff]  ;;  %3226 = vmatpush1.bf16.msra.mxu1 %v7492_v38  ;;  %v7422_v38 = vcombine.low %v106_v25, %v110_v26  ;;  %v166_v25 = vld [vmem:[#allocation2 + $0x268] sm:$0xff] }
  0x7d   :  { %v313_v36 = vld [vmem:[#allocation2 + $0x700] sm:$0xff]  ;;  %v7501_v40 = vcombine.high %v185_v34, %v189_v35  ;;  %3266 = vmatprep.subr.bf16.mxu0 %v7621_v33  ;;  %v7500_v46 = vcombine.low %v185_v34, %v189_v35  ;;  %v114_v35 = vld [vmem:[#allocation2 + $0xc8] sm:$0xff] }
  0x7e   :  { %v317_v37 = vld [vmem:[#allocation2 + $0x720] sm:$0xff]  ;;  %3267 = vmatpush1.bf16.msra.mxu0 %v7620_v39 }
  0x7f   :  { %v7629_v41 = vcombine.high %v313_v36, %v317_v37  ;;  %v193_v42 = vld [vmem:[#allocation2 + $0x340] sm:$0xff]  ;;  %3227 = vmatprep.subr.bf16.mxu1 %v7501_v40  ;;  %v7628_v47 = vcombine.low %v313_v36, %v317_v37  ;;  %v118_v37 = vld [vmem:[#allocation2 + $0xe8] sm:$0xff] }
  0x80   :  { %v197_v43 = vld [vmem:[#allocation2 + $0x360] sm:$0xff]  ;;  %3228 = vmatpush1.bf16.msra.mxu1 %v7500_v46  ;;  %v7431_v40 = vcombine.high %v114_v35, %v118_v37  ;;  %v7430_v46 = vcombine.low %v114_v35, %v118_v37 }
  0x81   :  { %v321_v44 = vld [vmem:[#allocation2 + $0x740] sm:$0xff]  ;;  %v7509_v48 = vcombine.high %v193_v42, %v197_v43  ;;  %3268 = vmatprep.subr.bf16.mxu0 %v7629_v41  ;;  %v7508_v54 = vcombine.low %v193_v42, %v197_v43  ;;  %v122_v43 = vld [vmem:[#allocation2 + $0x108] sm:$0xff] }
  0x82   :  { %v325_v45 = vld [vmem:[#allocation2 + $0x760] sm:$0xff]  ;;  %3269 = vmatpush1.bf16.msra.mxu0 %v7628_v47 }
  0x83   :  { %v7637_v49 = vcombine.high %v321_v44, %v325_v45  ;;  %v201_v50 = vld [vmem:[#allocation2 + $0x380] sm:$0xff]  ;;  %3229 = vmatprep.subr.bf16.mxu1 %v7509_v48  ;;  %v7636_v55 = vcombine.low %v321_v44, %v325_v45  ;;  %v126_v45 = vld [vmem:[#allocation2 + $0x128] sm:$0xff] }
  0x84   :  { %v205_v51 = vld [vmem:[#allocation2 + $0x3a0] sm:$0xff]  ;;  %3230 = vmatpush1.bf16.msra.mxu1 %v7508_v54  ;;  %v7439_v48 = vcombine.high %v122_v43, %v126_v45  ;;  %v7438_v54 = vcombine.low %v122_v43, %v126_v45 }
  0x85   :  { %v329_v52 = vld [vmem:[#allocation2 + $0x780] sm:$0xff]  ;;  %v7517_v56 = vcombine.high %v201_v50, %v205_v51  ;;  %3270 = vmatprep.subr.bf16.mxu0 %v7637_v49  ;;  %v7516_v0 = vcombine.low %v201_v50, %v205_v51  ;;  %v130_v51 = vld [vmem:[#allocation2 + $0x148] sm:$0xff] }
  0x86   :  { %v333_v53 = vld [vmem:[#allocation2 + $0x7a0] sm:$0xff]  ;;  %3271 = vmatpush1.bf16.msra.mxu0 %v7636_v55 }
  0x87   :  { %v7645_v58 = vcombine.high %v329_v52, %v333_v53  ;;  %v209_v59 = vld [vmem:[#allocation2 + $0x3c0] sm:$0xff]  ;;  %3231 = vmatprep.subr.bf16.mxu1 %v7517_v56  ;;  %v7644_v1 = vcombine.low %v329_v52, %v333_v53  ;;  %v134_v53 = vld [vmem:[#allocation2 + $0x168] sm:$0xff] }
  0x88   :  { %v213_v60 = vld [vmem:[#allocation2 + $0x3e0] sm:$0xff]  ;;  %3232 = vmatpush1.bf16.msra.mxu1 %v7516_v0  ;;  %v7447_v56 = vcombine.high %v130_v51, %v134_v53  ;;  %v7446_v0 = vcombine.low %v130_v51, %v134_v53 }
  0x89   :  { %v337_v62 = vld [vmem:[#allocation2 + $0x7c0] sm:$0xff]  ;;  %v7525_v2 = vcombine.high %v209_v59, %v213_v60  ;;  %3272 = vmatprep.subr.bf16.mxu0 %v7645_v58  ;;  %v7524_v8 = vcombine.low %v209_v59, %v213_v60  ;;  %v138_v60 = vld [vmem:[#allocation2 + $0x188] sm:$0xff] }
  0x8a   :  { %v341_v63 = vld [vmem:[#allocation2 + $0x7e0] sm:$0xff]  ;;  %3273 = vmatpush1.bf16.msra.mxu0 %v7644_v1 }
  0x8b   :  { %v7653_v3 = vcombine.high %v337_v62, %v341_v63  ;;  %v345_v6 = vld [vmem:[#allocation2 + $0x800] sm:$0xff]  ;;  %3233 = vmatprep.subr.bf16.mxu1 %v7525_v2  ;;  %v7652_v10 = vcombine.low %v337_v62, %v341_v63  ;;  %v142_v63 = vld [vmem:[#allocation2 + $0x1a8] sm:$0xff] }
  0x8c   :  { %v349_v7 = vld [vmem:[#allocation2 + $0x820] sm:$0xff]  ;;  %3234 = vmatpush1.bf16.msra.mxu1 %v7524_v8  ;;  %v7455_v2 = vcombine.high %v138_v60, %v142_v63  ;;  %v7454_v8 = vcombine.low %v138_v60, %v142_v63 }
  0x8d   :  { %v73_v9 = vld [vmem:[%s9616_s0] sm:$0xff]  ;;  %3274 = vmatprep.subr.bf16.mxu0 %v7653_v3  ;;  %v7661_v13 = vcombine.high %v345_v6, %v349_v7  ;;  %v7660_v22 = vcombine.low %v345_v6, %v349_v7  ;;  %3367 = vmatprep.subr.bf16.mxu1 %v7407_v11  ;;  %v150_v7 = vld [vmem:[#allocation2 + $0x1e8] sm:$0xff] }
  0x8e   :  { %v9428_v16 = vpack.c.bf16 %v73_v9, %v73_v9  ;;  %v353_v17 = vld [vmem:[#allocation2 + $0x840] sm:$0xff]  ;;  %3275 = vmatpush1.bf16.msra.mxu0 %v7652_v10  ;;  %v7463_v10 = vcombine.high %v146_v5, %v150_v7 }
  0x8f   :  { %v357_v18 = vld [vmem:[#allocation2 + $0x860] sm:$0xff]  ;;  %3285 = vmatprep.subr.bf16.mxu0 %v7661_v13  ;;  %v154_v13 = vld [vmem:[#allocation2 + $0x208] sm:$0xff] }
  0x90   :  { %v7669_v24 = vcombine.high %v353_v17, %v357_v18  ;;  %3236 = vmatmul.mubr.bf16.vlgmr.msra.gmra.mrb[0].mxu1 %v9428_v16  ;;  %v361_v28 = vld [vmem:[#allocation2 + $0x880] sm:$0xff]  ;;  %v7668_v31 = vcombine.low %v353_v17, %v357_v18  ;;  %v7462_v17 = vcombine.low %v146_v5, %v150_v7  ;;  %v7471_v19 = vcombine.high %v154_v13, %v158_v15 }
  0x91   :  { %v365_v29 = vld [vmem:[#allocation2 + $0x8a0] sm:$0xff]  ;;  %3277 = vmatmul.mubr.bf16.vlgmr.msra.gmra.mrb[0].mxu0 %v9433_v21  ;;  %3368 = vmatpush1.bf16.msra.mxu1 %v7406_v20  ;;  %v7470_v26 = vcombine.low %v154_v13, %v158_v15 }
  0x92   :  { %3286 = vmatpush1.bf16.msra.mxu0 %v7660_v22  ;;  %3369 = vmatprep.subr.bf16.mxu1 %v7415_v23  ;;  %v369_v33 = vld [vmem:[#allocation2 + $0x8c0] sm:$0xff]  ;;  %v7677_v36 = vcombine.high %v361_v28, %v365_v29  ;;  %v7676_v39 = vcombine.low %v361_v28, %v365_v29  ;;  %v162_v23 = vld [vmem:[#allocation2 + $0x248] sm:$0xff] }
  0x93   :  { %v373_v34 = vld [vmem:[#allocation2 + $0x8e0] sm:$0xff]  ;;  %3287 = vmatprep.subr.bf16.mxu0 %v7669_v24  ;;  %3317 = vmatprep.mubr.bf16.mxu0 %v9435_v27  ;;  %v7479_v29 = vcombine.high %v162_v23, %v166_v25  ;;  %v7478_v35 = vcombine.low %v162_v23, %v166_v25 }
  0x94   :  { %3399 = vmatprep.mubr.bf16.mxu1 %v9413_v57  ;;  %v377_v41 = vld [vmem:[#allocation2 + $0x900] sm:$0xff]  ;;  %v7685_v44 = vcombine.high %v369_v33, %v373_v34  ;;  %v7684_v47 = vcombine.low %v369_v33, %v373_v34  ;;  %v174_v34 = vld [vmem:[#allocation2 + $0x2a8] sm:$0xff] }
  0x95   :  { %3370 = vmatpush1.bf16.msra.mxu1 %v7414_v30  ;;  %v381_v42 = vld [vmem:[#allocation2 + $0x920] sm:$0xff] }
  0x96   :  { %3288 = vmatpush1.bf16.msra.mxu0 %v7668_v31  ;;  %3371 = vmatprep.subr.bf16.mxu1 %v7423_v32  ;;  %v385_v49 = vld [vmem:[#allocation2 + $0x940] sm:$0xff]  ;;  %v7693_v52 = vcombine.high %v377_v41, %v381_v42  ;;  %v7692_v55 = vcombine.low %v377_v41, %v381_v42  ;;  %v170_v32 = vld [vmem:[#allocation2 + $0x288] sm:$0xff] }
  0x97   :  { %3289 = vmatprep.subr.bf16.mxu0 %v7677_v36  ;;  %v389_v50 = vld [vmem:[#allocation2 + $0x960] sm:$0xff]  ;;  %v7487_v37 = vcombine.high %v170_v32, %v174_v34  ;;  %v182_v42 = vld [vmem:[#allocation2 + $0x2e8] sm:$0xff]  ;;  %v7486_v43 = vcombine.low %v170_v32, %v174_v34 }
  0x98   :  { %v393_v58 = vld [vmem:[#allocation2 + $0x980] sm:$0xff]  ;;  %v7701_v62 = vcombine.high %v385_v49, %v389_v50  ;;  %v7700_v1 = vcombine.low %v385_v49, %v389_v50  ;;  %v190_v50 = vld [vmem:[#allocation2 + $0x328] sm:$0xff] }
  0x99   :  { %3372 = vmatpush1.bf16.msra.mxu1 %v7422_v38  ;;  %v397_v59 = vld [vmem:[#allocation2 + $0x9a0] sm:$0xff] }
  0x9a   :  { %3290 = vmatpush1.bf16.msra.mxu0 %v7676_v39  ;;  %3373 = vmatprep.subr.bf16.mxu1 %v7431_v40  ;;  %v401_v3 = vld [vmem:[#allocation2 + $0x9c0] sm:$0xff]  ;;  %v7709_v6 = vcombine.high %v393_v58, %v397_v59  ;;  %v7708_v9 = vcombine.low %v393_v58, %v397_v59  ;;  %v178_v40 = vld [vmem:[#allocation2 + $0x2c8] sm:$0xff] }
  0x9b   :  { %3291 = vmatprep.subr.bf16.mxu0 %v7685_v44  ;;  %v405_v4 = vld [vmem:[#allocation2 + $0x9e0] sm:$0xff]  ;;  %v7495_v45 = vcombine.high %v178_v40, %v182_v42  ;;  %v7494_v51 = vcombine.low %v178_v40, %v182_v42  ;;  %v198_v59 = vld [vmem:[#allocation2 + $0x368] sm:$0xff] }
  0x9c   :  { %v409_v11 = vld [vmem:[#allocation2 + $0xa00] sm:$0xff]  ;;  %v7717_v14 = vcombine.high %v401_v3, %v405_v4  ;;  %v7716_v18 = vcombine.low %v401_v3, %v405_v4  ;;  %v206_v4 = vld [vmem:[#allocation2 + $0x3a8] sm:$0xff] }
  0x9d   :  { %3374 = vmatpush1.bf16.msra.mxu1 %v7430_v46  ;;  %v413_v12 = vld [vmem:[#allocation2 + $0xa20] sm:$0xff]  ;;  %v234_v40 = vld [vmem:[#allocation2 + $0x488] sm:$0xff] }
  0x9e   :  { %3292 = vmatpush1.bf16.msra.mxu0 %v7684_v47  ;;  %3375 = vmatprep.subr.bf16.mxu1 %v7439_v48  ;;  %v417_v20 = vld [vmem:[#allocation2 + $0xa40] sm:$0xff]  ;;  %v7725_v24 = vcombine.high %v409_v11, %v413_v12  ;;  %v7724_v28 = vcombine.low %v409_v11, %v413_v12  ;;  %v186_v48 = vld [vmem:[#allocation2 + $0x308] sm:$0xff] }
  0x9f   :  { %3293 = vmatprep.subr.bf16.mxu0 %v7693_v52  ;;  %v421_v22 = vld [vmem:[#allocation2 + $0xa60] sm:$0xff]  ;;  %v7503_v53 = vcombine.high %v186_v48, %v190_v50  ;;  %v7502_v60 = vcombine.low %v186_v48, %v190_v50  ;;  %v214_v12 = vld [vmem:[#allocation2 + $0x3e8] sm:$0xff] }
  0xa0   :  { %v425_v30 = vld [vmem:[#allocation2 + $0xa80] sm:$0xff]  ;;  %v7733_v33 = vcombine.high %v417_v20, %v421_v22  ;;  %v7732_v36 = vcombine.low %v417_v20, %v421_v22  ;;  %v222_v22 = vld [vmem:[#allocation2 + $0x428] sm:$0xff] }
  0xa1   :  { %3376 = vmatpush1.bf16.msra.mxu1 %v7438_v54  ;;  %v429_v31 = vld [vmem:[#allocation2 + $0xaa0] sm:$0xff]  ;;  %v238_v42 = vld [vmem:[#allocation2 + $0x4a8] sm:$0xff] }
  0xa2   :  { %3294 = vmatpush1.bf16.msra.mxu0 %v7692_v55  ;;  %3377 = vmatprep.subr.bf16.mxu1 %v7447_v56  ;;  %v433_v38 = vld [vmem:[#allocation2 + $0xac0] sm:$0xff]  ;;  %v7741_v41 = vcombine.high %v425_v30, %v429_v31  ;;  %v7740_v44 = vcombine.low %v425_v30, %v429_v31  ;;  %v194_v56 = vld [vmem:[#allocation2 + $0x348] sm:$0xff] }
  0xa3   :  { %3295 = vmatprep.subr.bf16.mxu0 %v7701_v62  ;;  %v437_v39 = vld [vmem:[#allocation2 + $0xae0] sm:$0xff]  ;;  %v7511_v63 = vcombine.high %v194_v56, %v198_v59  ;;  %v7510_v5 = vcombine.low %v194_v56, %v198_v59  ;;  %v226_v30 = vld [vmem:[#allocation2 + $0x448] sm:$0xff] }
  0xa4   :  { %v441_v46 = vld [vmem:[#allocation2 + $0xb00] sm:$0xff]  ;;  %v7749_v49 = vcombine.high %v433_v38, %v437_v39  ;;  %v7748_v52 = vcombine.low %v433_v38, %v437_v39  ;;  %v230_v31 = vld [vmem:[#allocation2 + $0x468] sm:$0xff] }
  0xa5   :  { %3378 = vmatpush1.bf16.msra.mxu1 %v7446_v0  ;;  %v445_v47 = vld [vmem:[#allocation2 + $0xb20] sm:$0xff] }
  0xa6   :  { %3296 = vmatpush1.bf16.msra.mxu0 %v7700_v1  ;;  %3379 = vmatprep.subr.bf16.mxu1 %v7455_v2  ;;  %v449_v54 = vld [vmem:[#allocation2 + $0xb40] sm:$0xff]  ;;  %v7757_v58 = vcombine.high %v441_v46, %v445_v47  ;;  %v7756_v62 = vcombine.low %v441_v46, %v445_v47  ;;  %v202_v2 = vld [vmem:[#allocation2 + $0x388] sm:$0xff]  ;;  %v7551_v46 = vcombine.high %v234_v40, %v238_v42 }
  0xa7   :  { %3297 = vmatprep.subr.bf16.mxu0 %v7709_v6  ;;  %v453_v55 = vld [vmem:[#allocation2 + $0xb60] sm:$0xff]  ;;  %v7519_v7 = vcombine.high %v202_v2, %v206_v4  ;;  %v7518_v13 = vcombine.low %v202_v2, %v206_v4 }
  0xa8   :  { %v457_v0 = vld [vmem:[#allocation2 + $0xb80] sm:$0xff]  ;;  %v7765_v3 = vcombine.high %v449_v54, %v453_v55  ;;  %v7764_v6 = vcombine.low %v449_v54, %v453_v55 }
  0xa9   :  { %3380 = vmatpush1.bf16.msra.mxu1 %v7454_v8  ;;  %v461_v1 = vld [vmem:[#allocation2 + $0xba0] sm:$0xff] }
  0xaa   :  { %3298 = vmatpush1.bf16.msra.mxu0 %v7708_v9  ;;  %3381 = vmatprep.subr.bf16.mxu1 %v7463_v10  ;;  %v465_v8 = vld [vmem:[#allocation2 + $0xbc0] sm:$0xff]  ;;  %v210_v10 = vld [vmem:[#allocation2 + $0x3c8] sm:$0xff]  ;;  %v7773_v11 = vcombine.high %v457_v0, %v461_v1 }
  0xab   :  { %3299 = vmatprep.subr.bf16.mxu0 %v7717_v14  ;;  %v469_v9 = vld [vmem:[#allocation2 + $0xbe0] sm:$0xff]  ;;  %v7772_v14 = vcombine.low %v457_v0, %v461_v1  ;;  %v7527_v15 = vcombine.high %v210_v10, %v214_v12 }
  0xac   :  { %v7781_v20 = vcombine.high %v465_v8, %v469_v9  ;;  %v77_v23 = vld [vmem:[%s9616_s0 + $0x20] sm:$0xff]  ;;  %v7780_v25 = vcombine.low %v465_v8, %v469_v9 }
  0xad   :  { %3382 = vmatpush1.bf16.msra.mxu1 %v7462_v17  ;;  %v473_v17 = vld [vmem:[#allocation2 + $0xc00] sm:$0xff] }
  0xae   :  { %3300 = vmatpush1.bf16.msra.mxu0 %v7716_v18  ;;  %3383 = vmatprep.subr.bf16.mxu1 %v7471_v19  ;;  %v477_v18 = vld [vmem:[#allocation2 + $0xc20] sm:$0xff]  ;;  %v218_v19 = vld [vmem:[#allocation2 + $0x408] sm:$0xff] }
  0xaf   :  { %3301 = vmatprep.subr.bf16.mxu0 %v7725_v24  ;;  %v7526_v24 = vcombine.low %v210_v10, %v214_v12  ;;  %v7789_v32 = vcombine.high %v473_v17, %v477_v18  ;;  %v7534_v34 = vcombine.low %v218_v19, %v222_v22  ;;  %v489_v38 = vld [vmem:[#allocation2 + $0xc80] sm:$0xff] }
  0xb0   :  { %v493_v39 = vld [vmem:[#allocation2 + $0xca0] sm:$0xff] }
  0xb1   :  { %3384 = vmatpush1.bf16.msra.mxu1 %v7470_v26  ;;  %v7535_v26 = vcombine.high %v218_v19, %v222_v22  ;;  %v497_v47 = vld [vmem:[#allocation2 + $0xcc0] sm:$0xff]  ;;  %v7805_v50 = vcombine.high %v489_v38, %v493_v39  ;;  %v274_v22 = vld [vmem:[#allocation2 + $0x5c8] sm:$0xff] }
  0xb2   :  { %3302 = vmatpush1.bf16.msra.mxu0 %v7724_v28  ;;  %3385 = vmatprep.subr.bf16.mxu1 %v7479_v29  ;;  %v481_v28 = vld [vmem:[#allocation2 + $0xc40] sm:$0xff] }
  0xb3   :  { %3303 = vmatprep.subr.bf16.mxu0 %v7733_v33  ;;  %v485_v29 = vld [vmem:[#allocation2 + $0xc60] sm:$0xff]  ;;  %v80_v33 = vld [vmem:[%s9616_s0 + $0x38] sm:$0xff] }
  0xb4   :  { %v501_v48 = vld [vmem:[#allocation2 + $0xce0] sm:$0xff] }
  0xb5   :  { %3386 = vmatpush1.bf16.msra.mxu1 %v7478_v35  ;;  %v9447_v35 = vpack.c.bf16 %v77_v23, %v77_v23  ;;  %v505_v55 = vld [vmem:[#allocation2 + $0xd00] sm:$0xff]  ;;  %v7813_v59 = vcombine.high %v497_v47, %v501_v48  ;;  %v278_v23 = vld [vmem:[#allocation2 + $0x5e8] sm:$0xff] }
  0xb6   :  { %3304 = vmatpush1.bf16.msra.mxu0 %v7732_v36  ;;  %3387 = vmatprep.subr.bf16.mxu1 %v7487_v37  ;;  %v7788_v36 = vcombine.low %v473_v17, %v477_v18  ;;  %v7543_v37 = vcombine.high %v226_v30, %v230_v31  ;;  %v509_v56 = vld [vmem:[#allocation2 + $0xd20] sm:$0xff] }
  0xb7   :  { %3305 = vmatprep.subr.bf16.mxu0 %v7741_v41  ;;  %v7797_v41 = vcombine.high %v481_v28, %v485_v29  ;;  %v513_v1 = vld [vmem:[#allocation2 + $0xd40] sm:$0xff]  ;;  %v7821_v4 = vcombine.high %v505_v55, %v509_v56 }
  0xb8   :  { %v517_v2 = vld [vmem:[#allocation2 + $0xd60] sm:$0xff] }
  0xb9   :  { %3388 = vmatpush1.bf16.msra.mxu1 %v7486_v43  ;;  %v9449_v43 = vpack.c.bf16 %v80_v33, %v80_v33  ;;  %v521_v9 = vld [vmem:[#allocation2 + $0xd80] sm:$0xff]  ;;  %v7829_v12 = vcombine.high %v513_v1, %v517_v2  ;;  %v7590_v33 = vcombine.low %v274_v22, %v278_v23 }
  0xba   :  { %3306 = vmatpush1.bf16.msra.mxu0 %v7740_v44  ;;  %3389 = vmatprep.subr.bf16.mxu1 %v7495_v45  ;;  %v7542_v44 = vcombine.low %v226_v30, %v230_v31  ;;  %v7796_v45 = vcombine.low %v481_v28, %v485_v29  ;;  %v525_v10 = vld [vmem:[#allocation2 + $0xda0] sm:$0xff]  ;;  %v282_v30 = vld [vmem:[#allocation2 + $0x608] sm:$0xff] }
  0xbb   :  { %3307 = vmatprep.subr.bf16.mxu0 %v7749_v49  ;;  %v242_v49 = vld [vmem:[#allocation2 + $0x4c8] sm:$0xff]  ;;  %v529_v18 = vld [vmem:[#allocation2 + $0xdc0] sm:$0xff] }
  0xbc   :  { %v533_v19 = vld [vmem:[#allocation2 + $0xde0] sm:$0xff] }
  0xbd   :  { %3390 = vmatpush1.bf16.msra.mxu1 %v7494_v51  ;;  %v246_v51 = vld [vmem:[#allocation2 + $0x4e8] sm:$0xff]  ;;  %v537_v28 = vld [vmem:[#allocation2 + $0xe00] sm:$0xff]  ;;  %v7845_v31 = vcombine.high %v529_v18, %v533_v19 }
  0xbe   :  { %3308 = vmatpush1.bf16.msra.mxu0 %v7748_v52  ;;  %3391 = vmatprep.subr.bf16.mxu1 %v7503_v53  ;;  %v7550_v52 = vcombine.low %v234_v40, %v238_v42  ;;  %v7804_v53 = vcombine.low %v489_v38, %v493_v39  ;;  %v7559_v54 = vcombine.high %v242_v49, %v246_v51  ;;  %v541_v29 = vld [vmem:[#allocation2 + $0xe20] sm:$0xff]  ;;  %v290_v39 = vld [vmem:[#allocation2 + $0x648] sm:$0xff] }
  0xbf   :  { %3309 = vmatprep.subr.bf16.mxu0 %v7757_v58  ;;  %v250_v58 = vld [vmem:[#allocation2 + $0x508] sm:$0xff]  ;;  %v549_v38 = vld [vmem:[#allocation2 + $0xe60] sm:$0xff]  ;;  %v7853_v40 = vcombine.high %v537_v28, %v541_v29 }
  0xc1   :  { %3392 = vmatpush1.bf16.msra.mxu1 %v7502_v60  ;;  %v254_v60 = vld [vmem:[#allocation2 + $0x528] sm:$0xff] }
  0xc2   :  { %3310 = vmatpush1.bf16.msra.mxu0 %v7756_v62  ;;  %3393 = vmatprep.subr.bf16.mxu1 %v7511_v63  ;;  %v7558_v62 = vcombine.low %v242_v49, %v246_v51  ;;  %v7812_v63 = vcombine.low %v497_v47, %v501_v48  ;;  %v7567_v0 = vcombine.high %v250_v58, %v254_v60  ;;  %v557_v47 = vld [vmem:[#allocation2 + $0xea0] sm:$0xff]  ;;  %v298_v48 = vld [vmem:[#allocation2 + $0x688] sm:$0xff] }
  0xc3   :  { %3311 = vmatprep.subr.bf16.mxu0 %v7765_v3  ;;  %v258_v3 = vld [vmem:[#allocation2 + $0x548] sm:$0xff] }
  0xc5   :  { %3394 = vmatpush1.bf16.msra.mxu1 %v7510_v5  ;;  %v262_v5 = vld [vmem:[#allocation2 + $0x568] sm:$0xff] }
  0xc6   :  { %3312 = vmatpush1.bf16.msra.mxu0 %v7764_v6  ;;  %3395 = vmatprep.subr.bf16.mxu1 %v7519_v7  ;;  %v7566_v6 = vcombine.low %v250_v58, %v254_v60  ;;  %v7820_v7 = vcombine.low %v505_v55, %v509_v56  ;;  %v7575_v8 = vcombine.high %v258_v3, %v262_v5  ;;  %v565_v55 = vld [vmem:[#allocation2 + $0xee0] sm:$0xff]  ;;  %v306_v56 = vld [vmem:[#allocation2 + $0x6c8] sm:$0xff] }
  0xc7   :  { %3313 = vmatprep.subr.bf16.mxu0 %v7773_v11  ;;  %v266_v11 = vld [vmem:[#allocation2 + $0x588] sm:$0xff] }
  0xc9   :  { %3396 = vmatpush1.bf16.msra.mxu1 %v7518_v13  ;;  %v270_v13 = vld [vmem:[#allocation2 + $0x5a8] sm:$0xff] }
  0xca   :  { %3314 = vmatpush1.bf16.msra.mxu0 %v7772_v14  ;;  %3397 = vmatprep.subr.bf16.mxu1 %v7527_v15  ;;  %v7574_v14 = vcombine.low %v258_v3, %v262_v5  ;;  %v7828_v15 = vcombine.low %v513_v1, %v517_v2  ;;  %v7583_v17 = vcombine.high %v266_v11, %v270_v13  ;;  %v573_v1 = vld [vmem:[#allocation2 + $0xf20] sm:$0xff]  ;;  %v314_v2 = vld [vmem:[#allocation2 + $0x708] sm:$0xff] }
  0xcb   :  { %3315 = vmatprep.subr.bf16.mxu0 %v7781_v20  ;;  %v7837_v20 = vcombine.high %v521_v9, %v525_v10 }
  0xcd   :  { %3398 = vmatpush1.bf16.msra.mxu1 %v7526_v24  ;;  %v7582_v24 = vcombine.low %v266_v11, %v270_v13 }
  0xce   :  { %3316 = vmatpush1.bf16.msra.mxu0 %v7780_v25  ;;  %3408 = vmatprep.subr.bf16.mxu1 %v7535_v26  ;;  %v7836_v25 = vcombine.low %v521_v9, %v525_v10  ;;  %v7591_v26 = vcombine.high %v274_v22, %v278_v23  ;;  %v581_v9 = vld [vmem:[#allocation2 + $0xf60] sm:$0xff]  ;;  %v322_v10 = vld [vmem:[#allocation2 + $0x748] sm:$0xff] }
  0xcf   :  { %3326 = vmatprep.subr.bf16.mxu0 %v7789_v32  ;;  %v286_v32 = vld [vmem:[#allocation2 + $0x628] sm:$0xff] }
  0xd0   :  { %3400 = vmatmul.mubr.bf16.vlgmr.msra.gmra.mrb[4].mxu1 %v9428_v16  ;;  %v7598_v42 = vcombine.low %v282_v30, %v286_v32  ;;  %v334_v22 = vld [vmem:[#allocation2 + $0x7a8] sm:$0xff] }
  0xd1   :  { %3318 = vmatmul.mubr.bf16.vlgmr.msra.gmra.mrb[0].mxu0 %v9447_v35  ;;  %3409 = vmatpush1.bf16.msra.mxu1 %v7534_v34  ;;  %v7844_v34 = vcombine.low %v529_v18, %v533_v19  ;;  %v589_v18 = vld [vmem:[#allocation2 + $0xfa0] sm:$0xff]  ;;  %v330_v19 = vld [vmem:[#allocation2 + $0x788] sm:$0xff] }
  0xd2   :  { %3327 = vmatpush1.bf16.msra.mxu0 %v7788_v36  ;;  %3410 = vmatprep.subr.bf16.mxu1 %v7543_v37  ;;  %v7599_v36 = vcombine.high %v282_v30, %v286_v32  ;;  %v545_v37 = vld [vmem:[#allocation2 + $0xe40] sm:$0xff]  ;;  %v7646_v32 = vcombine.low %v330_v19, %v334_v22 }
  0xd3   :  { %3328 = vmatprep.subr.bf16.mxu0 %v7797_v41  ;;  %3358 = vmatprep.mubr.bf16.mxu0 %v9449_v43  ;;  %v294_v41 = vld [vmem:[#allocation2 + $0x668] sm:$0xff]  ;;  %v7861_v49 = vcombine.high %v545_v37, %v549_v38 }
  0xd4   :  { %3440 = vmatprep.mubr.bf16.mxu1 %v9418_v61  ;;  %v7606_v51 = vcombine.low %v290_v39, %v294_v41 }
  0xd5   :  { %3411 = vmatpush1.bf16.msra.mxu1 %v7542_v44  ;;  %v7852_v44 = vcombine.low %v537_v28, %v541_v29  ;;  %v597_v28 = vld [vmem:[#allocation2 + $0xfe0] sm:$0xff]  ;;  %v338_v29 = vld [vmem:[#allocation2 + $0x7c8] sm:$0xff] }
  0xd6   :  { %3329 = vmatpush1.bf16.msra.mxu0 %v7796_v45  ;;  %3412 = vmatprep.subr.bf16.mxu1 %v7551_v46  ;;  %v7607_v45 = vcombine.high %v290_v39, %v294_v41  ;;  %v553_v46 = vld [vmem:[#allocation2 + $0xe80] sm:$0xff]  ;;  %v79_v41 = vld [vmem:[%s9616_s0 + $0x30] sm:$0xff]  ;;  %s9324_s0 = smov [#allocation10]  }
  0xd7   :  { %3330 = vmatprep.subr.bf16.mxu0 %v7805_v50  ;;  %v302_v50 = vld [vmem:[#allocation2 + $0x6a8] sm:$0xff]  ;;  %v7869_v58 = vcombine.high %v553_v46, %v557_v47  ;;  %s7393_s6 = sshll.u32 %s9324_s0, 4  ;;  %s7394_s6 = int_to_ptr.vmem [resolvable:$true] %s7393_s6 }
  0xd8   :  { %v7614_v60 = vcombine.low %v298_v48, %v302_v50  ;;  %s9286_s7 = scalar_lea.vmem %s7394_s6, 896  ;;  %p9291_p5 = scmp.lt.s32.totalorder %s7394_s6, %s7394_s6 }
  0xd9   :  { %3413 = vmatpush1.bf16.msra.mxu1 %v7550_v52  ;;  %v7860_v52 = vcombine.low %v545_v37, %v549_v38  ;;  %v350_v37 = vld [vmem:[#allocation2 + $0x828] sm:$0xff]  ;;  %v91_v38 = vld [vmem:[#allocation2 + $0x10] sm:$0xff]  ;;  %p9287_p4 = scmp.ne.s32.totalorder %s7394_s6, %s9286_s7  ;;  %p9292_p6 = scmp.lt.s32.totalorder %s9286_s7, %s9286_s7 }
  0xda   :  { %3331 = vmatpush1.bf16.msra.mxu0 %v7804_v53  ;;  %3414 = vmatprep.subr.bf16.mxu1 %v7559_v54  ;;  %v7615_v53 = vcombine.high %v298_v48, %v302_v50  ;;  %v561_v54 = vld [vmem:[#allocation2 + $0xec0] sm:$0xff]  ;;  %v99_v48 = vld [vmem:[#allocation2 + $0x50] sm:$0xff] }
  0xdb   :  { %3332 = vmatprep.subr.bf16.mxu0 %v7813_v59  ;;  %v310_v59 = vld [vmem:[#allocation2 + $0x6e8] sm:$0xff]  ;;  %v7877_v3 = vcombine.high %v561_v54, %v565_v55  ;;  %v103_v50 = vld [vmem:[#allocation2 + $0x70] sm:$0xff]  ;;  %p9293_p7 = por %p9292_p6, %p9291_p5 }
  0xdc   :  { %v7622_v5 = vcombine.low %v306_v56, %v310_v59 }
  0xdd   :  { %3415 = vmatpush1.bf16.msra.mxu1 %v7558_v62  ;;  %v7868_v62 = vcombine.low %v553_v46, %v557_v47  ;;  %v354_v46 = vld [vmem:[#allocation2 + $0x848] sm:$0xff]  ;;  %p9294_p8 = pnand %p9293_p7, %p9287_p4 }
  0xde   :  { %3333 = vmatpush1.bf16.msra.mxu0 %v7812_v63  ;;  %3416 = vmatprep.subr.bf16.mxu1 %v7567_v0  ;;  %v7623_v63 = vcombine.high %v306_v56, %v310_v59  ;;  %v569_v0 = vld [vmem:[#allocation2 + $0xf00] sm:$0xff]  ;;  %v358_v47 = vld [vmem:[#allocation2 + $0x868] sm:$0xff]  ;;  %v7417_v59 = vcombine.high %v99_v48, %v103_v50 }
  0xdf   :  { %3334 = vmatprep.subr.bf16.mxu0 %v7821_v4  ;;  %v318_v4 = vld [vmem:[#allocation2 + $0x728] sm:$0xff]  ;;  %v7885_v11 = vcombine.high %v569_v0, %v573_v1 }
  0xe0   :  { %v7630_v13 = vcombine.low %v314_v2, %v318_v4  ;;  %v366_v56 = vld [vmem:[#allocation2 + $0x8a8] sm:$0xff] }
  0xe1   :  { %3417 = vmatpush1.bf16.msra.mxu1 %v7566_v6  ;;  %v7876_v6 = vcombine.low %v561_v54, %v565_v55  ;;  %v7671_v54 = vcombine.high %v354_v46, %v358_v47  ;;  %v362_v55 = vld [vmem:[#allocation2 + $0x888] sm:$0xff] }
  0xe2   :  { %3335 = vmatpush1.bf16.msra.mxu0 %v7820_v7  ;;  %3418 = vmatprep.subr.bf16.mxu1 %v7575_v8  ;;  %v7631_v7 = vcombine.high %v314_v2, %v318_v4  ;;  %v577_v8 = vld [vmem:[#allocation2 + $0xf40] sm:$0xff]  ;;  %v374_v2 = vld [vmem:[#allocation2 + $0x8e8] sm:$0xff] }
  0xe3   :  { %3336 = vmatprep.subr.bf16.mxu0 %v7829_v12  ;;  %v326_v12 = vld [vmem:[#allocation2 + $0x768] sm:$0xff] }
  0xe4   :  { %v7638_v23 = vcombine.low %v322_v10, %v326_v12 }
  0xe5   :  { %3419 = vmatpush1.bf16.msra.mxu1 %v7574_v14  ;;  %v7884_v14 = vcombine.low %v569_v0, %v573_v1  ;;  %v7679_v0 = vcombine.high %v362_v55, %v366_v56  ;;  %v370_v1 = vld [vmem:[#allocation2 + $0x8c8] sm:$0xff] }
  0xe6   :  { %3337 = vmatpush1.bf16.msra.mxu0 %v7828_v15  ;;  %3420 = vmatprep.subr.bf16.mxu1 %v7583_v17  ;;  %v7639_v15 = vcombine.high %v322_v10, %v326_v12  ;;  %v585_v17 = vld [vmem:[#allocation2 + $0xf80] sm:$0xff]  ;;  %v382_v10 = vld [vmem:[#allocation2 + $0x928] sm:$0xff] }
  0xe7   :  { %3338 = vmatprep.subr.bf16.mxu0 %v7837_v20  ;;  %v7893_v20 = vcombine.high %v577_v8, %v581_v9  ;;  %v7901_v30 = vcombine.high %v585_v17, %v589_v18 }
  0xe9   :  { %3421 = vmatpush1.bf16.msra.mxu1 %v7582_v24  ;;  %v7892_v24 = vcombine.low %v577_v8, %v581_v9  ;;  %v7687_v8 = vcombine.high %v370_v1, %v374_v2  ;;  %v378_v9 = vld [vmem:[#allocation2 + $0x908] sm:$0xff] }
  0xea   :  { %3339 = vmatpush1.bf16.msra.mxu0 %v7836_v25  ;;  %3422 = vmatprep.subr.bf16.mxu1 %v7591_v26  ;;  %v7647_v25 = vcombine.high %v330_v19, %v334_v22  ;;  %v593_v26 = vld [vmem:[#allocation2 + $0xfc0] sm:$0xff]  ;;  %v390_v19 = vld [vmem:[#allocation2 + $0x968] sm:$0xff] }
  0xeb   :  { %3340 = vmatprep.subr.bf16.mxu0 %v7845_v31  ;;  %v342_v31 = vld [vmem:[#allocation2 + $0x7e8] sm:$0xff]  ;;  %v7909_v39 = vcombine.high %v593_v26, %v597_v28 }
  0xed   :  { %3423 = vmatpush1.bf16.msra.mxu1 %v7590_v33  ;;  %v7900_v33 = vcombine.low %v585_v17, %v589_v18  ;;  %v7695_v17 = vcombine.high %v378_v9, %v382_v10  ;;  %v386_v18 = vld [vmem:[#allocation2 + $0x948] sm:$0xff] }
  0xee   :  { %3341 = vmatpush1.bf16.msra.mxu0 %v7844_v34  ;;  %3424 = vmatprep.subr.bf16.mxu1 %v7599_v36  ;;  %v7655_v34 = vcombine.high %v338_v29, %v342_v31  ;;  %v346_v36 = vld [vmem:[#allocation2 + $0x808] sm:$0xff] }
  0xef   :  { %3342 = vmatprep.subr.bf16.mxu0 %v7853_v40  ;;  %v95_v40 = vld [vmem:[#allocation2 + $0x30] sm:$0xff] }
  0xf1   :  { %3425 = vmatpush1.bf16.msra.mxu1 %v7598_v42  ;;  %v7654_v42 = vcombine.low %v338_v29, %v342_v31  ;;  %v398_v29 = vld [vmem:[#allocation2 + $0x9a8] sm:$0xff] }
  0xf2   :  { %3343 = vmatpush1.bf16.msra.mxu0 %v7852_v44  ;;  %3426 = vmatprep.subr.bf16.mxu1 %v7607_v45  ;;  %v7908_v44 = vcombine.low %v593_v26, %v597_v28  ;;  %v7663_v45 = vcombine.high %v346_v36, %v350_v37  ;;  %v7703_v26 = vcombine.high %v386_v18, %v390_v19  ;;  %v394_v28 = vld [vmem:[#allocation2 + $0x988] sm:$0xff] }
  0xf3   :  { %3344 = vmatprep.subr.bf16.mxu0 %v7861_v49  ;;  %v7409_v49 = vcombine.high %v91_v38, %v95_v40 }
  0xf5   :  { %3427 = vmatpush1.bf16.msra.mxu1 %v7606_v51  ;;  %v9458_v51 = vpack.c.bf16 %v79_v41, %v79_v41  ;;  %v151_v41 = vld [vmem:[#allocation2 + $0x1f0] sm:$0xff] }
  0xf6   :  { %3345 = vmatpush1.bf16.msra.mxu0 %v7860_v52  ;;  %3428 = vmatprep.subr.bf16.mxu1 %v7615_v53  ;;  %v7662_v52 = vcombine.low %v346_v36, %v350_v37  ;;  %v7408_v53 = vcombine.low %v91_v38, %v95_v40  ;;  %v7711_v36 = vcombine.high %v394_v28, %v398_v29  ;;  %v402_v37 = vld [vmem:[#allocation2 + $0x9c8] sm:$0xff] }
  0xf7   :  { %3346 = vmatprep.subr.bf16.mxu0 %v7869_v58  ;;  %v107_v58 = vld [vmem:[#allocation2 + $0x90] sm:$0xff]  ;;  %v406_v38 = vld [vmem:[#allocation2 + $0x9e8] sm:$0xff] }
  0xf9   :  { %3429 = vmatpush1.bf16.msra.mxu1 %v7614_v60  ;;  %v111_v60 = vld [vmem:[#allocation2 + $0xb0] sm:$0xff] }
  0xfa   :  { %3347 = vmatpush1.bf16.msra.mxu0 %v7868_v62  ;;  %3430 = vmatprep.subr.bf16.mxu1 %v7623_v63  ;;  %v7670_v62 = vcombine.low %v354_v46, %v358_v47  ;;  %v7416_v63 = vcombine.low %v99_v48, %v103_v50  ;;  %v7425_v4 = vcombine.high %v107_v58, %v111_v60  ;;  %v410_v46 = vld [vmem:[#allocation2 + $0xa08] sm:$0xff]  ;;  %v155_v48 = vld [vmem:[#allocation2 + $0x210] sm:$0xff] }
  0xfb   :  { %3348 = vmatprep.subr.bf16.mxu0 %v7877_v3  ;;  %v115_v3 = vld [vmem:[#allocation2 + $0xd0] sm:$0xff]  ;;  %v414_v47 = vld [vmem:[#allocation2 + $0xa28] sm:$0xff] }
  0xfc   :  { %v159_v50 = vld [vmem:[#allocation2 + $0x230] sm:$0xff] }
  0xfd   :  { %3431 = vmatpush1.bf16.msra.mxu1 %v7622_v5  ;;  %v119_v5 = vld [vmem:[#allocation2 + $0xf0] sm:$0xff] }
  0xfe   :  { %3349 = vmatpush1.bf16.msra.mxu0 %v7876_v6  ;;  %3432 = vmatprep.subr.bf16.mxu1 %v7631_v7  ;;  %v7678_v6 = vcombine.low %v362_v55, %v366_v56  ;;  %v7424_v7 = vcombine.low %v107_v58, %v111_v60  ;;  %v7433_v12 = vcombine.high %v115_v3, %v119_v5  ;;  %v418_v55 = vld [vmem:[#allocation2 + $0xa48] sm:$0xff]  ;;  %v163_v58 = vld [vmem:[#allocation2 + $0x250] sm:$0xff] }
  0xff   :  { %3350 = vmatprep.subr.bf16.mxu0 %v7885_v11  ;;  %v123_v11 = vld [vmem:[#allocation2 + $0x110] sm:$0xff]  ;;  %v422_v56 = vld [vmem:[#allocation2 + $0xa68] sm:$0xff] }
 0x100   :  { %v167_v60 = vld [vmem:[#allocation2 + $0x270] sm:$0xff] }
 0x101   :  { %3433 = vmatpush1.bf16.msra.mxu1 %v7630_v13  ;;  %v127_v13 = vld [vmem:[#allocation2 + $0x130] sm:$0xff] }
 0x102   :  { %3351 = vmatpush1.bf16.msra.mxu0 %v7884_v14  ;;  %3434 = vmatprep.subr.bf16.mxu1 %v7639_v15  ;;  %v7686_v14 = vcombine.low %v370_v1, %v374_v2  ;;  %v7432_v15 = vcombine.low %v115_v3, %v119_v5  ;;  %v7441_v22 = vcombine.high %v123_v11, %v127_v13  ;;  %v426_v1 = vld [vmem:[#allocation2 + $0xa88] sm:$0xff]  ;;  %v171_v3 = vld [vmem:[#allocation2 + $0x290] sm:$0xff] }
 0x103   :  { %3352 = vmatprep.subr.bf16.mxu0 %v7893_v20  ;;  %v131_v20 = vld [vmem:[#allocation2 + $0x150] sm:$0xff]  ;;  %v430_v2 = vld [vmem:[#allocation2 + $0xaa8] sm:$0xff] }
 0x104   :  { %v175_v5 = vld [vmem:[#allocation2 + $0x2b0] sm:$0xff] }
 0x105   :  { %3435 = vmatpush1.bf16.msra.mxu1 %v7638_v23  ;;  %v135_v23 = vld [vmem:[#allocation2 + $0x170] sm:$0xff] }
 0x106   :  { %3353 = vmatpush1.bf16.msra.mxu0 %v7892_v24  ;;  %3436 = vmatprep.subr.bf16.mxu1 %v7647_v25  ;;  %v7694_v24 = vcombine.low %v378_v9, %v382_v10  ;;  %v7440_v25 = vcombine.low %v123_v11, %v127_v13  ;;  %v7449_v31 = vcombine.high %v131_v20, %v135_v23  ;;  %v434_v9 = vld [vmem:[#allocation2 + $0xac8] sm:$0xff]  ;;  %v179_v11 = vld [vmem:[#allocation2 + $0x2d0] sm:$0xff] }
 0x107   :  { %3354 = vmatprep.subr.bf16.mxu0 %v7901_v30  ;;  %v139_v30 = vld [vmem:[#allocation2 + $0x190] sm:$0xff]  ;;  %v438_v10 = vld [vmem:[#allocation2 + $0xae8] sm:$0xff] }
 0x108   :  { %v183_v13 = vld [vmem:[#allocation2 + $0x2f0] sm:$0xff] }
 0x109   :  { %3437 = vmatpush1.bf16.msra.mxu1 %v7646_v32  ;;  %v143_v32 = vld [vmem:[#allocation2 + $0x1b0] sm:$0xff] }
 0x10a   :  { %3355 = vmatpush1.bf16.msra.mxu0 %v7900_v33  ;;  %3438 = vmatprep.subr.bf16.mxu1 %v7655_v34  ;;  %v7702_v33 = vcombine.low %v386_v18, %v390_v19  ;;  %v7448_v34 = vcombine.low %v131_v20, %v135_v23  ;;  %v7457_v40 = vcombine.high %v139_v30, %v143_v32  ;;  %v442_v18 = vld [vmem:[#allocation2 + $0xb08] sm:$0xff]  ;;  %v187_v20 = vld [vmem:[#allocation2 + $0x310] sm:$0xff] }
 0x10b   :  { %3356 = vmatprep.subr.bf16.mxu0 %v7909_v39  ;;  %v147_v39 = vld [vmem:[#allocation2 + $0x1d0] sm:$0xff]  ;;  %v446_v19 = vld [vmem:[#allocation2 + $0xb28] sm:$0xff] }
 0x10c   :  { %v191_v23 = vld [vmem:[#allocation2 + $0x330] sm:$0xff] }
 0x10d   :  { %3439 = vmatpush1.bf16.msra.mxu1 %v7654_v42  ;;  %v7710_v42 = vcombine.low %v394_v28, %v398_v29  ;;  %v450_v28 = vld [vmem:[#allocation2 + $0xb48] sm:$0xff] }
 0x10e   :  { %3357 = vmatpush1.bf16.msra.mxu0 %v7908_v44  ;;  %3449 = vmatprep.subr.bf16.mxu1 %v7663_v45  ;;  %v7456_v44 = vcombine.low %v139_v30, %v143_v32  ;;  %v7719_v45 = vcombine.high %v402_v37, %v406_v38  ;;  %v454_v29 = vld [vmem:[#allocation2 + $0xb68] sm:$0xff]  ;;  %v195_v30 = vld [vmem:[#allocation2 + $0x350] sm:$0xff] }
 0x10f   :  { %3531 = vmatprep.subr.bf16.mxu0 %v7409_v49  ;;  %v7465_v49 = vcombine.high %v147_v39, %v151_v41  ;;  %v199_v32 = vld [vmem:[#allocation2 + $0x370] sm:$0xff] }
 0x110   :  { %3441 = vmatmul.mubr.bf16.vlgmr.msra.gmra.mrb[4].mxu1 %v9433_v21 }
 0x111   :  { %3359 = vmatmul.mubr.bf16.vlgmr.msra.gmra.mrb[0].mxu0 %v9458_v51  ;;  %3450 = vmatpush1.bf16.msra.mxu1 %v7662_v52  ;;  %v7718_v52 = vcombine.low %v402_v37, %v406_v38  ;;  %v458_v37 = vld [vmem:[#allocation2 + $0xb88] sm:$0xff] }
 0x112   :  { %3532 = vmatpush1.bf16.msra.mxu0 %v7408_v53  ;;  %3451 = vmatprep.subr.bf16.mxu1 %v7671_v54  ;;  %v7464_v53 = vcombine.low %v147_v39, %v151_v41  ;;  %v7727_v54 = vcombine.high %v410_v46, %v414_v47  ;;  %v462_v38 = vld [vmem:[#allocation2 + $0xba8] sm:$0xff]  ;;  %v203_v39 = vld [vmem:[#allocation2 + $0x390] sm:$0xff] }
 0x113   :  { %3533 = vmatprep.subr.bf16.mxu0 %v7417_v59  ;;  %3481 = vmatprep.mubr.bf16.mxu1 %v9435_v27  ;;  %v7473_v59 = vcombine.high %v155_v48, %v159_v50  ;;  %v207_v41 = vld [vmem:[#allocation2 + $0x3b0] sm:$0xff] }
 0x114   :  { %3563 = vmatprep.mubr.bf16.mxu0 %v9413_v57 }
 0x115   :  { %3452 = vmatpush1.bf16.msra.mxu1 %v7670_v62  ;;  %v7726_v62 = vcombine.low %v410_v46, %v414_v47  ;;  %v466_v46 = vld [vmem:[#allocation2 + $0xbc8] sm:$0xff] }
 0x116   :  { %3534 = vmatpush1.bf16.msra.mxu0 %v7416_v63  ;;  %3453 = vmatprep.subr.bf16.mxu1 %v7679_v0  ;;  %v7472_v63 = vcombine.low %v155_v48, %v159_v50  ;;  %v7735_v0 = vcombine.high %v418_v55, %v422_v56  ;;  %v470_v47 = vld [vmem:[#allocation2 + $0xbe8] sm:$0xff]  ;;  %v211_v48 = vld [vmem:[#allocation2 + $0x3d0] sm:$0xff] }
 0x117   :  { %3535 = vmatprep.subr.bf16.mxu0 %v7425_v4  ;;  %v7481_v4 = vcombine.high %v163_v58, %v167_v60  ;;  %v215_v50 = vld [vmem:[#allocation2 + $0x3f0] sm:$0xff] }
 0x119   :  { %3454 = vmatpush1.bf16.msra.mxu1 %v7678_v6  ;;  %v7734_v6 = vcombine.low %v418_v55, %v422_v56  ;;  %v474_v55 = vld [vmem:[#allocation2 + $0xc08] sm:$0xff] }
 0x11a   :  { %3536 = vmatpush1.bf16.msra.mxu0 %v7424_v7  ;;  %3455 = vmatprep.subr.bf16.mxu1 %v7687_v8  ;;  %v7480_v7 = vcombine.low %v163_v58, %v167_v60  ;;  %v7743_v8 = vcombine.high %v426_v1, %v430_v2  ;;  %v478_v56 = vld [vmem:[#allocation2 + $0xc28] sm:$0xff]  ;;  %v219_v58 = vld [vmem:[#allocation2 + $0x410] sm:$0xff] }
 0x11b   :  { %3537 = vmatprep.subr.bf16.mxu0 %v7433_v12  ;;  %v7489_v12 = vcombine.high %v171_v3, %v175_v5  ;;  %v223_v60 = vld [vmem:[#allocation2 + $0x430] sm:$0xff] }
 0x11d   :  { %3456 = vmatpush1.bf16.msra.mxu1 %v7686_v14  ;;  %v7742_v14 = vcombine.low %v426_v1, %v430_v2  ;;  %v482_v1 = vld [vmem:[#allocation2 + $0xc48] sm:$0xff] }
 0x11e   :  { %3538 = vmatpush1.bf16.msra.mxu0 %v7432_v15  ;;  %3457 = vmatprep.subr.bf16.mxu1 %v7695_v17  ;;  %v7488_v15 = vcombine.low %v171_v3, %v175_v5  ;;  %v7751_v17 = vcombine.high %v434_v9, %v438_v10  ;;  %v486_v2 = vld [vmem:[#allocation2 + $0xc68] sm:$0xff]  ;;  %v227_v3 = vld [vmem:[#allocation2 + $0x450] sm:$0xff] }
 0x11f   :  { %3539 = vmatprep.subr.bf16.mxu0 %v7441_v22  ;;  %v7497_v22 = vcombine.high %v179_v11, %v183_v13  ;;  %v231_v5 = vld [vmem:[#allocation2 + $0x470] sm:$0xff] }
 0x121   :  { %3458 = vmatpush1.bf16.msra.mxu1 %v7694_v24  ;;  %v7750_v24 = vcombine.low %v434_v9, %v438_v10  ;;  %v490_v9 = vld [vmem:[#allocation2 + $0xc88] sm:$0xff] }
 0x122   :  { %3540 = vmatpush1.bf16.msra.mxu0 %v7440_v25  ;;  %3459 = vmatprep.subr.bf16.mxu1 %v7703_v26  ;;  %v7496_v25 = vcombine.low %v179_v11, %v183_v13  ;;  %v7759_v26 = vcombine.high %v442_v18, %v446_v19  ;;  %v494_v10 = vld [vmem:[#allocation2 + $0xca8] sm:$0xff]  ;;  %v235_v11 = vld [vmem:[#allocation2 + $0x490] sm:$0xff] }
 0x123   :  { %3541 = vmatprep.subr.bf16.mxu0 %v7449_v31  ;;  %v7505_v31 = vcombine.high %v187_v20, %v191_v23  ;;  %v239_v13 = vld [vmem:[#allocation2 + $0x4b0] sm:$0xff] }
 0x125   :  { %3460 = vmatpush1.bf16.msra.mxu1 %v7702_v33  ;;  %v7758_v33 = vcombine.low %v442_v18, %v446_v19  ;;  %v498_v18 = vld [vmem:[#allocation2 + $0xcc8] sm:$0xff] }
 0x126   :  { %3542 = vmatpush1.bf16.msra.mxu0 %v7448_v34  ;;  %3461 = vmatprep.subr.bf16.mxu1 %v7711_v36  ;;  %v7504_v34 = vcombine.low %v187_v20, %v191_v23  ;;  %v7767_v36 = vcombine.high %v450_v28, %v454_v29  ;;  %v502_v19 = vld [vmem:[#allocation2 + $0xce8] sm:$0xff]  ;;  %v243_v20 = vld [vmem:[#allocation2 + $0x4d0] sm:$0xff] }
 0x127   :  { %3543 = vmatprep.subr.bf16.mxu0 %v7457_v40  ;;  %v7513_v40 = vcombine.high %v195_v30, %v199_v32  ;;  %v247_v23 = vld [vmem:[#allocation2 + $0x4f0] sm:$0xff] }
 0x129   :  { %3462 = vmatpush1.bf16.msra.mxu1 %v7710_v42  ;;  %v7766_v42 = vcombine.low %v450_v28, %v454_v29  ;;  %v506_v28 = vld [vmem:[#allocation2 + $0xd08] sm:$0xff] }
 0x12a   :  { %3544 = vmatpush1.bf16.msra.mxu0 %v7456_v44  ;;  %3463 = vmatprep.subr.bf16.mxu1 %v7719_v45  ;;  %v7512_v44 = vcombine.low %v195_v30, %v199_v32  ;;  %v7775_v45 = vcombine.high %v458_v37, %v462_v38  ;;  %v510_v29 = vld [vmem:[#allocation2 + $0xd28] sm:$0xff]  ;;  %v251_v30 = vld [vmem:[#allocation2 + $0x510] sm:$0xff] }
 0x12b   :  { %3545 = vmatprep.subr.bf16.mxu0 %v7465_v49  ;;  %v7521_v49 = vcombine.high %v203_v39, %v207_v41  ;;  %v255_v32 = vld [vmem:[#allocation2 + $0x530] sm:$0xff] }
 0x12d   :  { %3464 = vmatpush1.bf16.msra.mxu1 %v7718_v52  ;;  %v7774_v52 = vcombine.low %v458_v37, %v462_v38  ;;  %v514_v37 = vld [vmem:[#allocation2 + $0xd48] sm:$0xff] }
 0x12e   :  { %3546 = vmatpush1.bf16.msra.mxu0 %v7464_v53  ;;  %3465 = vmatprep.subr.bf16.mxu1 %v7727_v54  ;;  %v7520_v53 = vcombine.low %v203_v39, %v207_v41  ;;  %v7783_v54 = vcombine.high %v466_v46, %v470_v47  ;;  %v518_v38 = vld [vmem:[#allocation2 + $0xd68] sm:$0xff]  ;;  %v259_v39 = vld [vmem:[#allocation2 + $0x550] sm:$0xff] }
 0x12f   :  { %3547 = vmatprep.subr.bf16.mxu0 %v7473_v59  ;;  %v7529_v59 = vcombine.high %v211_v48, %v215_v50  ;;  %v263_v41 = vld [vmem:[#allocation2 + $0x570] sm:$0xff] }
 0x131   :  { %3466 = vmatpush1.bf16.msra.mxu1 %v7726_v62  ;;  %v7782_v62 = vcombine.low %v466_v46, %v470_v47  ;;  %v522_v46 = vld [vmem:[#allocation2 + $0xd88] sm:$0xff] }
 0x132   :  { %3548 = vmatpush1.bf16.msra.mxu0 %v7472_v63  ;;  %3467 = vmatprep.subr.bf16.mxu1 %v7735_v0  ;;  %v7528_v63 = vcombine.low %v211_v48, %v215_v50  ;;  %v7791_v0 = vcombine.high %v474_v55, %v478_v56  ;;  %v526_v47 = vld [vmem:[#allocation2 + $0xda8] sm:$0xff]  ;;  %v267_v48 = vld [vmem:[#allocation2 + $0x590] sm:$0xff] }
 0x133   :  { %3549 = vmatprep.subr.bf16.mxu0 %v7481_v4  ;;  %v7537_v4 = vcombine.high %v219_v58, %v223_v60  ;;  %v271_v50 = vld [vmem:[#allocation2 + $0x5b0] sm:$0xff] }
 0x135   :  { %3468 = vmatpush1.bf16.msra.mxu1 %v7734_v6  ;;  %v7790_v6 = vcombine.low %v474_v55, %v478_v56  ;;  %v530_v55 = vld [vmem:[#allocation2 + $0xdc8] sm:$0xff] }
 0x136   :  { %3550 = vmatpush1.bf16.msra.mxu0 %v7480_v7  ;;  %3469 = vmatprep.subr.bf16.mxu1 %v7743_v8  ;;  %v7536_v7 = vcombine.low %v219_v58, %v223_v60  ;;  %v7799_v8 = vcombine.high %v482_v1, %v486_v2  ;;  %v534_v56 = vld [vmem:[#allocation2 + $0xde8] sm:$0xff]  ;;  %v275_v58 = vld [vmem:[#allocation2 + $0x5d0] sm:$0xff]  ;;  %v7585_v60 = vcombine.high %v267_v48, %v271_v50 }
 0x137   :  { %3551 = vmatprep.subr.bf16.mxu0 %v7489_v12  ;;  %v7545_v12 = vcombine.high %v227_v3, %v231_v5 }
 0x139   :  { %3470 = vmatpush1.bf16.msra.mxu1 %v7742_v14  ;;  %v7798_v14 = vcombine.low %v482_v1, %v486_v2  ;;  %v7838_v1 = vcombine.low %v522_v46, %v526_v47 }
 0x13a   :  { %3552 = vmatpush1.bf16.msra.mxu0 %v7488_v15  ;;  %3471 = vmatprep.subr.bf16.mxu1 %v7751_v17  ;;  %v7544_v15 = vcombine.low %v227_v3, %v231_v5  ;;  %v7807_v17 = vcombine.high %v490_v9, %v494_v10  ;;  %v7584_v3 = vcombine.low %v267_v48, %v271_v50  ;;  %v538_v5 = vld [vmem:[#allocation2 + $0xe08] sm:$0xff] }
 0x13b   :  { %3553 = vmatprep.subr.bf16.mxu0 %v7497_v22  ;;  %v7553_v22 = vcombine.high %v235_v11, %v239_v13  ;;  %v578_v50 = vld [vmem:[#allocation2 + $0xf48] sm:$0xff] }
 0x13d   :  { %3472 = vmatpush1.bf16.msra.mxu1 %v7750_v24  ;;  %v7806_v24 = vcombine.low %v490_v9, %v494_v10  ;;  %v287_v9 = vld [vmem:[#allocation2 + $0x630] sm:$0xff]  ;;  %v7846_v10 = vcombine.low %v530_v55, %v534_v56 }
 0x13e   :  { %3554 = vmatpush1.bf16.msra.mxu0 %v7496_v25  ;;  %3473 = vmatprep.subr.bf16.mxu1 %v7759_v26  ;;  %v7552_v25 = vcombine.low %v235_v11, %v239_v13  ;;  %v7815_v26 = vcombine.high %v498_v18, %v502_v19  ;;  %v546_v13 = vld [vmem:[#allocation2 + $0xe48] sm:$0xff] }
 0x13f   :  { %3555 = vmatprep.subr.bf16.mxu0 %v7505_v31  ;;  %v7561_v31 = vcombine.high %v243_v20, %v247_v23 }
 0x141   :  { %3474 = vmatpush1.bf16.msra.mxu1 %v7758_v33  ;;  %v7814_v33 = vcombine.low %v498_v18, %v502_v19  ;;  %v295_v18 = vld [vmem:[#allocation2 + $0x670] sm:$0xff] }
 0x142   :  { %3556 = vmatpush1.bf16.msra.mxu0 %v7504_v34  ;;  %3475 = vmatprep.subr.bf16.mxu1 %v7767_v36  ;;  %v7560_v34 = vcombine.low %v243_v20, %v247_v23  ;;  %v7823_v36 = vcombine.high %v506_v28, %v510_v29  ;;  %v554_v23 = vld [vmem:[#allocation2 + $0xe88] sm:$0xff] }
 0x143   :  { %3557 = vmatprep.subr.bf16.mxu0 %v7513_v40  ;;  %v7569_v40 = vcombine.high %v251_v30, %v255_v32 }
 0x145   :  { %3476 = vmatpush1.bf16.msra.mxu1 %v7766_v42  ;;  %v7822_v42 = vcombine.low %v506_v28, %v510_v29  ;;  %v303_v28 = vld [vmem:[#allocation2 + $0x6b0] sm:$0xff] }
 0x146   :  { %3558 = vmatpush1.bf16.msra.mxu0 %v7512_v44  ;;  %3477 = vmatprep.subr.bf16.mxu1 %v7775_v45  ;;  %v7568_v44 = vcombine.low %v251_v30, %v255_v32  ;;  %v7831_v45 = vcombine.high %v514_v37, %v518_v38  ;;  %v562_v32 = vld [vmem:[#allocation2 + $0xec8] sm:$0xff] }
 0x147   :  { %3559 = vmatprep.subr.bf16.mxu0 %v7521_v49  ;;  %v7577_v49 = vcombine.high %v259_v39, %v263_v41 }
 0x149   :  { %3478 = vmatpush1.bf16.msra.mxu1 %v7774_v52  ;;  %v7830_v52 = vcombine.low %v514_v37, %v518_v38  ;;  %v311_v37 = vld [vmem:[#allocation2 + $0x6f0] sm:$0xff] }
 0x14a   :  { %3560 = vmatpush1.bf16.msra.mxu0 %v7520_v53  ;;  %3479 = vmatprep.subr.bf16.mxu1 %v7783_v54  ;;  %v7576_v53 = vcombine.low %v259_v39, %v263_v41  ;;  %v7839_v54 = vcombine.high %v522_v46, %v526_v47  ;;  %v570_v41 = vld [vmem:[#allocation2 + $0xf08] sm:$0xff]  ;;  %v319_v46 = vld [vmem:[#allocation2 + $0x730] sm:$0xff] }
 0x14b   :  { %3561 = vmatprep.subr.bf16.mxu0 %v7529_v59 }
 0x14d   :  { %3480 = vmatpush1.bf16.msra.mxu1 %v7782_v62  ;;  %v279_v62 = vld [vmem:[#allocation2 + $0x5f0] sm:$0xff] }
 0x14e   :  { %3562 = vmatpush1.bf16.msra.mxu0 %v7528_v63  ;;  %3490 = vmatprep.subr.bf16.mxu1 %v7791_v0  ;;  %v7592_v11 = vcombine.low %v275_v58, %v279_v62 }
 0x14f   :  { %3572 = vmatprep.subr.bf16.mxu0 %v7537_v4  ;;  %v7847_v4 = vcombine.high %v530_v55, %v534_v56  ;;  %v327_v55 = vld [vmem:[#allocation2 + $0x770] sm:$0xff] }
 0x150   :  { %3482 = vmatmul.mubr.bf16.vlgmr.msra.gmra.mrb[4].mxu1 %v9447_v35 }
 0x151   :  { %3491 = vmatpush1.bf16.msra.mxu1 %v7790_v6  ;;  %3564 = vmatmul.mubr.bf16.vlgmr.msra.gmra.mrb[4].mxu0 %v9428_v16  ;;  %v542_v6 = vld [vmem:[#allocation2 + $0xe28] sm:$0xff] }
 0x152   :  { %3573 = vmatpush1.bf16.msra.mxu0 %v7536_v7  ;;  %3492 = vmatprep.subr.bf16.mxu1 %v7799_v8  ;;  %v283_v7 = vld [vmem:[#allocation2 + $0x610] sm:$0xff]  ;;  %v7593_v8 = vcombine.high %v275_v58, %v279_v62  ;;  %v7854_v19 = vcombine.low %v538_v5, %v542_v6  ;;  %v586_v62 = vld [vmem:[#allocation2 + $0xf88] sm:$0xff] }
 0x153   :  { %3574 = vmatprep.subr.bf16.mxu0 %v7545_v12  ;;  %3522 = vmatprep.mubr.bf16.mxu1 %v9449_v43  ;;  %v7855_v12 = vcombine.high %v538_v5, %v542_v6  ;;  %v7600_v20 = vcombine.low %v283_v7, %v287_v9 }
 0x154   :  { %3604 = vmatprep.mubr.bf16.mxu0 %v9418_v61 }
 0x155   :  { %3493 = vmatpush1.bf16.msra.mxu1 %v7798_v14  ;;  %v550_v14 = vld [vmem:[#allocation2 + $0xe68] sm:$0xff] }
 0x156   :  { %3575 = vmatpush1.bf16.msra.mxu0 %v7544_v15  ;;  %3494 = vmatprep.subr.bf16.mxu1 %v7807_v17  ;;  %v291_v15 = vld [vmem:[#allocation2 + $0x650] sm:$0xff]  ;;  %v7601_v17 = vcombine.high %v283_v7, %v287_v9  ;;  %v7862_v29 = vcombine.low %v546_v13, %v550_v14  ;;  %v594_v7 = vld [vmem:[#allocation2 + $0xfc8] sm:$0xff] }
 0x157   :  { %3576 = vmatprep.subr.bf16.mxu0 %v7553_v22  ;;  %v7863_v22 = vcombine.high %v546_v13, %v550_v14  ;;  %v7608_v30 = vcombine.low %v291_v15, %v295_v18  ;;  %v339_v9 = vld [vmem:[#allocation2 + $0x7d0] sm:$0xff] }
 0x159   :  { %3495 = vmatpush1.bf16.msra.mxu1 %v7806_v24  ;;  %v558_v24 = vld [vmem:[#allocation2 + $0xea8] sm:$0xff] }
 0x15a   :  { %3577 = vmatpush1.bf16.msra.mxu0 %v7552_v25  ;;  %3496 = vmatprep.subr.bf16.mxu1 %v7815_v26  ;;  %v299_v25 = vld [vmem:[#allocation2 + $0x690] sm:$0xff]  ;;  %v7609_v26 = vcombine.high %v291_v15, %v295_v18  ;;  %v7870_v38 = vcombine.low %v554_v23, %v558_v24  ;;  %v92_v18 = vld [vmem:[#allocation2 + $0x18] sm:$0xff] }
 0x15b   :  { %3578 = vmatprep.subr.bf16.mxu0 %v7561_v31  ;;  %v7871_v31 = vcombine.high %v554_v23, %v558_v24  ;;  %v7616_v39 = vcombine.low %v299_v25, %v303_v28  ;;  %v347_v15 = vld [vmem:[#allocation2 + $0x810] sm:$0xff] }
 0x15d   :  { %3497 = vmatpush1.bf16.msra.mxu1 %v7814_v33  ;;  %v566_v33 = vld [vmem:[#allocation2 + $0xee8] sm:$0xff] }
 0x15e   :  { %3579 = vmatpush1.bf16.msra.mxu0 %v7560_v34  ;;  %3498 = vmatprep.subr.bf16.mxu1 %v7823_v36  ;;  %v307_v34 = vld [vmem:[#allocation2 + $0x6d0] sm:$0xff]  ;;  %v7617_v36 = vcombine.high %v299_v25, %v303_v28  ;;  %v7878_v47 = vcombine.low %v562_v32, %v566_v33  ;;  %v100_v28 = vld [vmem:[#allocation2 + $0x58] sm:$0xff] }
 0x15f   :  { %3580 = vmatprep.subr.bf16.mxu0 %v7569_v40  ;;  %v7879_v40 = vcombine.high %v562_v32, %v566_v33  ;;  %v7624_v48 = vcombine.low %v307_v34, %v311_v37  ;;  %v355_v25 = vld [vmem:[#allocation2 + $0x850] sm:$0xff] }
 0x161   :  { %3499 = vmatpush1.bf16.msra.mxu1 %v7822_v42  ;;  %v574_v42 = vld [vmem:[#allocation2 + $0xf28] sm:$0xff] }
 0x162   :  { %3581 = vmatpush1.bf16.msra.mxu0 %v7568_v44  ;;  %3500 = vmatprep.subr.bf16.mxu1 %v7831_v45  ;;  %v315_v44 = vld [vmem:[#allocation2 + $0x710] sm:$0xff]  ;;  %v7625_v45 = vcombine.high %v307_v34, %v311_v37  ;;  %v7886_v56 = vcombine.low %v570_v41, %v574_v42 }
 0x163   :  { %v9468_v59 = vpop.f32.mrb[0].mxu1  ;;  %3582 = vmatprep.subr.bf16.mxu0 %v7577_v49  ;;  %v7887_v49 = vcombine.high %v570_v41, %v574_v42  ;;  %v7632_v58 = vcombine.low %v315_v44, %v319_v46  ;;  %v363_v34 = vld [vmem:[#allocation2 + $0x890] sm:$0xff] }
 0x164   :  { %v9470_v63 = vpop.f32.mrb[1].mxu1 }
 0x165   :  { %v3241_v0 = vpop.f32.mrb[2].mxu1  ;;  %3501 = vmatpush1.bf16.msra.mxu1 %v7830_v52  ;;  %v582_v52 = vld [vmem:[#allocation2 + $0xf68] sm:$0xff] }
 0x166   :  { %3583 = vmatpush1.bf16.msra.mxu0 %v7576_v53  ;;  %v3242_v2 = vpop.f32.mrb[3].mxu1  ;;  %3502 = vmatprep.subr.bf16.mxu1 %v7839_v54  ;;  %v323_v53 = vld [vmem:[#allocation2 + $0x750] sm:$0xff]  ;;  %v7633_v54 = vcombine.high %v315_v44, %v319_v46  ;;  %v590_v0 = vld [vmem:[#allocation2 + $0xfa8] sm:$0xff]  ;;  %v120_v46 = vld [vmem:[#allocation2 + $0xf8] sm:$0xff] }
 0x167   :  { %3584 = vmatprep.subr.bf16.mxu0 %v7585_v60  ;;  %v7895_v60 = vcombine.high %v578_v50, %v582_v52  ;;  %v7641_v2 = vcombine.high %v323_v53, %v327_v55  ;;  %v7640_v5 = vcombine.low %v323_v53, %v327_v55  ;;  %v7903_v6 = vcombine.high %v586_v62, %v590_v0  ;;  %v128_v55 = vld [vmem:[#allocation2 + $0x138] sm:$0xff] }
 0x169   :  { %3503 = vmatpush1.bf16.msra.mxu1 %v7838_v1  ;;  %v331_v1 = vld [vmem:[#allocation2 + $0x790] sm:$0xff] }
 0x16a   :  { %3585 = vmatpush1.bf16.msra.mxu0 %v7584_v3  ;;  %3504 = vmatprep.subr.bf16.mxu1 %v7847_v4  ;;  %v335_v3 = vld [vmem:[#allocation2 + $0x7b0] sm:$0xff]  ;;  %v7894_v4 = vcombine.low %v578_v50, %v582_v52 }
 0x16b   :  { %3586 = vmatprep.subr.bf16.mxu0 %v7593_v8  ;;  %v598_v8 = vld [vmem:[#allocation2 + $0xfe8] sm:$0xff]  ;;  %v7648_v13 = vcombine.low %v331_v1, %v335_v3 }
 0x16c   :  { %v7911_v14 = vcombine.high %v594_v7, %v598_v8 }
 0x16d   :  { %3505 = vmatpush1.bf16.msra.mxu1 %v7846_v10  ;;  %v7649_v10 = vcombine.high %v331_v1, %v335_v3  ;;  %v132_v1 = vld [vmem:[#allocation2 + $0x158] sm:$0xff]  ;;  %v387_v3 = vld [vmem:[#allocation2 + $0x950] sm:$0xff] }
 0x16e   :  { %3587 = vmatpush1.bf16.msra.mxu0 %v7592_v11  ;;  %3506 = vmatprep.subr.bf16.mxu1 %v7855_v12  ;;  %v343_v11 = vld [vmem:[#allocation2 + $0x7f0] sm:$0xff]  ;;  %v7902_v12 = vcombine.low %v586_v62, %v590_v0 }
 0x16f   :  { %3588 = vmatprep.subr.bf16.mxu0 %v7601_v17  ;;  %v351_v17 = vld [vmem:[#allocation2 + $0x830] sm:$0xff]  ;;  %v7656_v23 = vcombine.low %v339_v9, %v343_v11 }
 0x170   :  { %v7664_v32 = vcombine.low %v347_v15, %v351_v17 }
 0x171   :  { %3507 = vmatpush1.bf16.msra.mxu1 %v7854_v19  ;;  %v7657_v19 = vcombine.high %v339_v9, %v343_v11  ;;  %v140_v9 = vld [vmem:[#allocation2 + $0x198] sm:$0xff]  ;;  %v395_v11 = vld [vmem:[#allocation2 + $0x990] sm:$0xff] }
 0x172   :  { %3589 = vmatpush1.bf16.msra.mxu0 %v7600_v20  ;;  %3508 = vmatprep.subr.bf16.mxu1 %v7863_v22  ;;  %v96_v20 = vld [vmem:[#allocation2 + $0x38] sm:$0xff]  ;;  %v7910_v22 = vcombine.low %v594_v7, %v598_v8 }
 0x173   :  { %3590 = vmatprep.subr.bf16.mxu0 %v7609_v26  ;;  %v7411_v24 = vcombine.high %v92_v18, %v96_v20  ;;  %v359_v26 = vld [vmem:[#allocation2 + $0x870] sm:$0xff] }
 0x174   :  { %v7673_v37 = vcombine.high %v355_v25, %v359_v26  ;;  %v7672_v41 = vcombine.low %v355_v25, %v359_v26 }
 0x175   :  { %3509 = vmatpush1.bf16.msra.mxu1 %v7862_v29  ;;  %v7665_v29 = vcombine.high %v347_v15, %v351_v17 }
 0x176   :  { %3591 = vmatpush1.bf16.msra.mxu0 %v7608_v30  ;;  %3510 = vmatprep.subr.bf16.mxu1 %v7871_v31  ;;  %v104_v30 = vld [vmem:[#allocation2 + $0x78] sm:$0xff]  ;;  %v7410_v31 = vcombine.low %v92_v18, %v96_v20  ;;  %v403_v20 = vld [vmem:[#allocation2 + $0x9d0] sm:$0xff] }
 0x177   :  { %3592 = vmatprep.subr.bf16.mxu0 %v7617_v36  ;;  %v7419_v33 = vcombine.high %v100_v28, %v104_v30  ;;  %v108_v36 = vld [vmem:[#allocation2 + $0x98] sm:$0xff] }
 0x178   :  { %v148_v18 = vld [vmem:[#allocation2 + $0x1d8] sm:$0xff] }
 0x179   :  { %3511 = vmatpush1.bf16.msra.mxu1 %v7870_v38  ;;  %v112_v38 = vld [vmem:[#allocation2 + $0xb8] sm:$0xff] }
 0x17a   :  { %3593 = vmatpush1.bf16.msra.mxu0 %v7616_v39  ;;  %3512 = vmatprep.subr.bf16.mxu1 %v7879_v40  ;;  %v367_v39 = vld [vmem:[#allocation2 + $0x8b0] sm:$0xff]  ;;  %v7418_v40 = vcombine.low %v100_v28, %v104_v30  ;;  %v7427_v42 = vcombine.high %v108_v36, %v112_v38  ;;  %v156_v28 = vld [vmem:[#allocation2 + $0x218] sm:$0xff] }
 0x17b   :  { %3594 = vmatprep.subr.bf16.mxu0 %v7625_v45  ;;  %v7681_v44 = vcombine.high %v363_v34, %v367_v39  ;;  %v116_v45 = vld [vmem:[#allocation2 + $0xd8] sm:$0xff]  ;;  %v7680_v50 = vcombine.low %v363_v34, %v367_v39  ;;  %v411_v30 = vld [vmem:[#allocation2 + $0xa10] sm:$0xff] }
 0x17c   :  { %v7435_v52 = vcombine.high %v116_v45, %v120_v46  ;;  %v419_v39 = vld [vmem:[#allocation2 + $0xa50] sm:$0xff] }
 0x17d   :  { %3513 = vmatpush1.bf16.msra.mxu1 %v7878_v47  ;;  %v371_v47 = vld [vmem:[#allocation2 + $0x8d0] sm:$0xff] }
 0x17e   :  { %3595 = vmatpush1.bf16.msra.mxu0 %v7624_v48  ;;  %3514 = vmatprep.subr.bf16.mxu1 %v7887_v49  ;;  %v375_v48 = vld [vmem:[#allocation2 + $0x8f0] sm:$0xff]  ;;  %v7426_v49 = vcombine.low %v108_v36, %v112_v38  ;;  %v168_v38 = vld [vmem:[#allocation2 + $0x278] sm:$0xff] }
 0x17f   :  { %3596 = vmatprep.subr.bf16.mxu0 %v7633_v54  ;;  %v7689_v53 = vcombine.high %v371_v47, %v375_v48  ;;  %v124_v54 = vld [vmem:[#allocation2 + $0x118] sm:$0xff]  ;;  %v7688_v62 = vcombine.low %v371_v47, %v375_v48  ;;  %v427_v48 = vld [vmem:[#allocation2 + $0xa90] sm:$0xff] }
 0x180   :  { %v7443_v0 = vcombine.high %v124_v54, %v128_v55  ;;  %v176_v47 = vld [vmem:[#allocation2 + $0x2b8] sm:$0xff] }
 0x181   :  { %3515 = vmatpush1.bf16.msra.mxu1 %v7886_v56  ;;  %v379_v56 = vld [vmem:[#allocation2 + $0x910] sm:$0xff] }
 0x182   :  { %3597 = vmatpush1.bf16.msra.mxu0 %v7632_v58  ;;  %3516 = vmatprep.subr.bf16.mxu1 %v7895_v60  ;;  %v383_v58 = vld [vmem:[#allocation2 + $0x930] sm:$0xff]  ;;  %v7434_v60 = vcombine.low %v116_v45, %v120_v46  ;;  %v172_v46 = vld [vmem:[#allocation2 + $0x298] sm:$0xff] }
 0x183   :  { %3598 = vmatprep.subr.bf16.mxu0 %v7641_v2  ;;  %v136_v2 = vld [vmem:[#allocation2 + $0x178] sm:$0xff] }
 0x184   :  { %v7451_v7 = vcombine.high %v132_v1, %v136_v2 }
 0x185   :  { %3517 = vmatpush1.bf16.msra.mxu1 %v7894_v4  ;;  %v391_v4 = vld [vmem:[#allocation2 + $0x970] sm:$0xff] }
 0x186   :  { %3599 = vmatpush1.bf16.msra.mxu0 %v7640_v5  ;;  %3518 = vmatprep.subr.bf16.mxu1 %v7903_v6  ;;  %v7442_v5 = vcombine.low %v124_v54, %v128_v55  ;;  %v7696_v6 = vcombine.low %v379_v56, %v383_v58  ;;  %v7705_v8 = vcombine.high %v387_v3, %v391_v4  ;;  %v180_v55 = vld [vmem:[#allocation2 + $0x2d8] sm:$0xff] }
 0x187   :  { %3600 = vmatprep.subr.bf16.mxu0 %v7649_v10  ;;  %v144_v10 = vld [vmem:[#allocation2 + $0x1b8] sm:$0xff] }
 0x188   :  { %v7459_v15 = vcombine.high %v140_v9, %v144_v10 }
 0x189   :  { %3519 = vmatpush1.bf16.msra.mxu1 %v7902_v12  ;;  %v399_v12 = vld [vmem:[#allocation2 + $0x9b0] sm:$0xff] }
 0x18a   :  { %3601 = vmatpush1.bf16.msra.mxu0 %v7648_v13  ;;  %3520 = vmatprep.subr.bf16.mxu1 %v7911_v14  ;;  %v7450_v13 = vcombine.low %v132_v1, %v136_v2  ;;  %v7704_v14 = vcombine.low %v387_v3, %v391_v4  ;;  %v7713_v17 = vcombine.high %v395_v11, %v399_v12  ;;  %v188_v2 = vld [vmem:[#allocation2 + $0x318] sm:$0xff]  ;;  %v443_v4 = vld [vmem:[#allocation2 + $0xb10] sm:$0xff] }
 0x18b   :  { %3602 = vmatprep.subr.bf16.mxu0 %v7657_v19  ;;  %v152_v19 = vld [vmem:[#allocation2 + $0x1f8] sm:$0xff] }
 0x18c   :  { %v7467_v25 = vcombine.high %v148_v18, %v152_v19  ;;  %v192_v3 = vld [vmem:[#allocation2 + $0x338] sm:$0xff] }
 0x18d   :  { %3521 = vmatpush1.bf16.msra.mxu1 %v7910_v22  ;;  %v407_v22 = vld [vmem:[#allocation2 + $0x9f0] sm:$0xff] }
 0x18e   :  { %3603 = vmatpush1.bf16.msra.mxu0 %v7656_v23  ;;  %3695 = vmatprep.subr.bf16.mxu1 %v7411_v24  ;;  %v7458_v23 = vcombine.low %v140_v9, %v144_v10  ;;  %v7712_v24 = vcombine.low %v395_v11, %v399_v12  ;;  %v7721_v26 = vcombine.high %v403_v20, %v407_v22  ;;  %v196_v10 = vld [vmem:[#allocation2 + $0x358] sm:$0xff]  ;;  %v451_v12 = vld [vmem:[#allocation2 + $0xb50] sm:$0xff] }
 0x18f   :  { %3613 = vmatprep.subr.bf16.mxu0 %v7665_v29  ;;  %v160_v29 = vld [vmem:[#allocation2 + $0x238] sm:$0xff] }
 0x190   :  { %3523 = vmatmul.mubr.bf16.vlgmr.msra.gmra.mrb[4].mxu1 %v9458_v51  ;;  %v7475_v34 = vcombine.high %v156_v28, %v160_v29  ;;  %v200_v11 = vld [vmem:[#allocation2 + $0x378] sm:$0xff] }
 0x191   :  { %3605 = vmatmul.mubr.bf16.vlgmr.msra.gmra.mrb[4].mxu0 %v9433_v21  ;;  %3696 = vmatpush1.bf16.msra.mxu1 %v7410_v31  ;;  %v415_v31 = vld [vmem:[#allocation2 + $0xa30] sm:$0xff] }
 0x192   :  { %3614 = vmatpush1.bf16.msra.mxu0 %v7664_v32  ;;  %3697 = vmatprep.subr.bf16.mxu1 %v7419_v33  ;;  %v7466_v32 = vcombine.low %v148_v18, %v152_v19  ;;  %v7720_v33 = vcombine.low %v403_v20, %v407_v22  ;;  %v7729_v36 = vcombine.high %v411_v30, %v415_v31  ;;  %v204_v19 = vld [vmem:[#allocation2 + $0x398] sm:$0xff]  ;;  %v459_v22 = vld [vmem:[#allocation2 + $0xb90] sm:$0xff] }
 0x193   :  { %3615 = vmatprep.subr.bf16.mxu0 %v7673_v37  ;;  %3645 = vmatprep.mubr.bf16.mxu0 %v9435_v27  ;;  %v164_v37 = vld [vmem:[#allocation2 + $0x258] sm:$0xff] }
 0x194   :  { %3727 = vmatprep.mubr.bf16.mxu1 %v9413_v57  ;;  %v7697_v57 = vcombine.high %v379_v56, %v383_v58  ;;  %v184_v56 = vld [vmem:[#allocation2 + $0x2f8] sm:$0xff]  ;;  %v435_v58 = vld [vmem:[#allocation2 + $0xad0] sm:$0xff] }
 0x195   :  { %3698 = vmatpush1.bf16.msra.mxu1 %v7418_v40  ;;  %v423_v40 = vld [vmem:[#allocation2 + $0xa70] sm:$0xff]  ;;  %v208_v20 = vld [vmem:[#allocation2 + $0x3b8] sm:$0xff] }
 0x196   :  { %3616 = vmatpush1.bf16.msra.mxu0 %v7672_v41  ;;  %3699 = vmatprep.subr.bf16.mxu1 %v7427_v42  ;;  %v7474_v41 = vcombine.low %v156_v28, %v160_v29  ;;  %v7728_v42 = vcombine.low %v411_v30, %v415_v31  ;;  %v7737_v45 = vcombine.high %v419_v39, %v423_v40  ;;  %v212_v29 = vld [vmem:[#allocation2 + $0x3d8] sm:$0xff]  ;;  %v467_v31 = vld [vmem:[#allocation2 + $0xbd0] sm:$0xff] }
 0x197   :  { %3617 = vmatprep.subr.bf16.mxu0 %v7681_v44  ;;  %v7483_v44 = vcombine.high %v164_v37, %v168_v38  ;;  %v216_v30 = vld [vmem:[#allocation2 + $0x3f8] sm:$0xff] }
 0x199   :  { %3700 = vmatpush1.bf16.msra.mxu1 %v7426_v49  ;;  %v431_v49 = vld [vmem:[#allocation2 + $0xab0] sm:$0xff] }
 0x19a   :  { %3618 = vmatpush1.bf16.msra.mxu0 %v7680_v50  ;;  %3701 = vmatprep.subr.bf16.mxu1 %v7435_v52  ;;  %v7482_v50 = vcombine.low %v164_v37, %v168_v38  ;;  %v7736_v52 = vcombine.low %v419_v39, %v423_v40  ;;  %v7745_v54 = vcombine.high %v427_v48, %v431_v49  ;;  %v220_v38 = vld [vmem:[#allocation2 + $0x418] sm:$0xff]  ;;  %v475_v40 = vld [vmem:[#allocation2 + $0xc10] sm:$0xff] }
 0x19b   :  { %3619 = vmatprep.subr.bf16.mxu0 %v7689_v53  ;;  %v7491_v53 = vcombine.high %v172_v46, %v176_v47  ;;  %v224_v39 = vld [vmem:[#allocation2 + $0x438] sm:$0xff] }
 0x19d   :  { %3702 = vmatpush1.bf16.msra.mxu1 %v7434_v60  ;;  %v439_v60 = vld [vmem:[#allocation2 + $0xaf0] sm:$0xff] }
 0x19e   :  { %3620 = vmatpush1.bf16.msra.mxu0 %v7688_v62  ;;  %3703 = vmatprep.subr.bf16.mxu1 %v7443_v0  ;;  %v7490_v62 = vcombine.low %v172_v46, %v176_v47  ;;  %v7744_v0 = vcombine.low %v427_v48, %v431_v49  ;;  %v7753_v1 = vcombine.high %v435_v58, %v439_v60  ;;  %v228_v47 = vld [vmem:[#allocation2 + $0x458] sm:$0xff]  ;;  %v483_v49 = vld [vmem:[#allocation2 + $0xc50] sm:$0xff] }
 0x19f   :  { %3621 = vmatprep.subr.bf16.mxu0 %v7697_v57  ;;  %v7499_v57 = vcombine.high %v180_v55, %v184_v56  ;;  %v232_v48 = vld [vmem:[#allocation2 + $0x478] sm:$0xff] }
 0x1a1   :  { %3704 = vmatpush1.bf16.msra.mxu1 %v7442_v5  ;;  %v447_v5 = vld [vmem:[#allocation2 + $0xb30] sm:$0xff] }
 0x1a2   :  { %3622 = vmatpush1.bf16.msra.mxu0 %v7696_v6  ;;  %3705 = vmatprep.subr.bf16.mxu1 %v7451_v7  ;;  %v7498_v6 = vcombine.low %v180_v55, %v184_v56  ;;  %v7752_v7 = vcombine.low %v435_v58, %v439_v60  ;;  %v7761_v9 = vcombine.high %v443_v4, %v447_v5  ;;  %v236_v56 = vld [vmem:[#allocation2 + $0x498] sm:$0xff]  ;;  %v491_v60 = vld [vmem:[#allocation2 + $0xc90] sm:$0xff] }
 0x1a3   :  { %3623 = vmatprep.subr.bf16.mxu0 %v7705_v8  ;;  %v7507_v8 = vcombine.high %v188_v2, %v192_v3  ;;  %v240_v58 = vld [vmem:[#allocation2 + $0x4b8] sm:$0xff] }
 0x1a5   :  { %3706 = vmatpush1.bf16.msra.mxu1 %v7450_v13  ;;  %v455_v13 = vld [vmem:[#allocation2 + $0xb70] sm:$0xff] }
 0x1a6   :  { %3624 = vmatpush1.bf16.msra.mxu0 %v7704_v14  ;;  %3707 = vmatprep.subr.bf16.mxu1 %v7459_v15  ;;  %v7506_v14 = vcombine.low %v188_v2, %v192_v3  ;;  %v7760_v15 = vcombine.low %v443_v4, %v447_v5  ;;  %v7769_v18 = vcombine.high %v451_v12, %v455_v13  ;;  %v603_v2 = vlaneseq  ;;  %v244_v4 = vld [vmem:[#allocation2 + $0x4d8] sm:$0xff] }
 0x1a7   :  { %3625 = vmatprep.subr.bf16.mxu0 %v7713_v17  ;;  %v7515_v17 = vcombine.high %v196_v10, %v200_v11  ;;  %v248_v5 = vld [vmem:[#allocation2 + $0x4f8] sm:$0xff] }
 0x1a9   :  { %3708 = vmatpush1.bf16.msra.mxu1 %v7458_v23  ;;  %v463_v23 = vld [vmem:[#allocation2 + $0xbb0] sm:$0xff] }
 0x1aa   :  { %3626 = vmatpush1.bf16.msra.mxu0 %v7712_v24  ;;  %3709 = vmatprep.subr.bf16.mxu1 %v7467_v25  ;;  %v7514_v24 = vcombine.low %v196_v10, %v200_v11  ;;  %v7768_v25 = vcombine.low %v451_v12, %v455_v13  ;;  %v7777_v28 = vcombine.high %v459_v22, %v463_v23  ;;  %v9480_v10 = vshrl.u32 %v603_v2, 7  ;;  %v252_v12 = vld [vmem:[#allocation2 + $0x518] sm:$0xff]  ;;  %v543_v2 = vld [vmem:[#allocation2 + $0xe30] sm:$0xff] }
 0x1ab   :  { %3627 = vmatprep.subr.bf16.mxu0 %v7721_v26  ;;  %v7523_v26 = vcombine.high %v204_v19, %v208_v20  ;;  %v256_v13 = vld [vmem:[#allocation2 + $0x538] sm:$0xff] }
 0x1ad   :  { %3710 = vmatpush1.bf16.msra.mxu1 %v7466_v32  ;;  %v471_v32 = vld [vmem:[#allocation2 + $0xbf0] sm:$0xff] }
 0x1ae   :  { %3628 = vmatpush1.bf16.msra.mxu0 %v7720_v33  ;;  %3711 = vmatprep.subr.bf16.mxu1 %v7475_v34  ;;  %v7522_v33 = vcombine.low %v204_v19, %v208_v20  ;;  %v7776_v34 = vcombine.low %v459_v22, %v463_v23  ;;  %v7785_v37 = vcombine.high %v467_v31, %v471_v32  ;;  %v605_v19 = vsub.s32 0, %v9480_v10  ;;  %v260_v22 = vld [vmem:[#allocation2 + $0x558] sm:$0xff] }
 0x1af   :  { %3629 = vmatprep.subr.bf16.mxu0 %v7729_v36  ;;  %v7531_v36 = vcombine.high %v212_v29, %v216_v30  ;;  %v264_v23 = vld [vmem:[#allocation2 + $0x578] sm:$0xff] }
 0x1b1   :  { %3712 = vmatpush1.bf16.msra.mxu1 %v7474_v41  ;;  %v479_v41 = vld [vmem:[#allocation2 + $0xc30] sm:$0xff] }
 0x1b2   :  { %3630 = vmatpush1.bf16.msra.mxu0 %v7728_v42  ;;  %3713 = vmatprep.subr.bf16.mxu1 %v7483_v44  ;;  %v7530_v42 = vcombine.low %v212_v29, %v216_v30  ;;  %v7784_v44 = vcombine.low %v467_v31, %v471_v32  ;;  %v7793_v46 = vcombine.high %v475_v40, %v479_v41 }
 0x1b3   :  { %3631 = vmatprep.subr.bf16.mxu0 %v7737_v45  ;;  %v7539_v45 = vcombine.high %v220_v38, %v224_v39  ;;  %v7570_v29 = vcombine.low %v252_v12, %v256_v13  ;;  %v7579_v31 = vcombine.high %v260_v22, %v264_v23 }
 0x1b5   :  { %3714 = vmatpush1.bf16.msra.mxu1 %v7482_v50  ;;  %v487_v50 = vld [vmem:[#allocation2 + $0xc70] sm:$0xff] }
 0x1b6   :  { %3632 = vmatpush1.bf16.msra.mxu0 %v7736_v52  ;;  %3715 = vmatprep.subr.bf16.mxu1 %v7491_v53  ;;  %v7538_v52 = vcombine.low %v220_v38, %v224_v39  ;;  %v7792_v53 = vcombine.low %v475_v40, %v479_v41  ;;  %v7801_v55 = vcombine.high %v483_v49, %v487_v50  ;;  %v523_v38 = vld [vmem:[#allocation2 + $0xd90] sm:$0xff] }
 0x1b7   :  { %3633 = vmatprep.subr.bf16.mxu0 %v7745_v54  ;;  %v7547_v54 = vcombine.high %v228_v47, %v232_v48  ;;  %v527_v39 = vld [vmem:[#allocation2 + $0xdb0] sm:$0xff]  ;;  %v7578_v40 = vcombine.low %v260_v22, %v264_v23 }
 0x1b9   :  { %3716 = vmatpush1.bf16.msra.mxu1 %v7490_v62  ;;  %v495_v62 = vld [vmem:[#allocation2 + $0xcb0] sm:$0xff] }
 0x1ba   :  { %3634 = vmatpush1.bf16.msra.mxu0 %v7744_v0  ;;  %3717 = vmatprep.subr.bf16.mxu1 %v7499_v57  ;;  %v7546_v0 = vcombine.low %v228_v47, %v232_v48  ;;  %v7800_v57 = vcombine.low %v483_v49, %v487_v50  ;;  %v7809_v3 = vcombine.high %v491_v60, %v495_v62  ;;  %v280_v47 = vld [vmem:[#allocation2 + $0x5f8] sm:$0xff]  ;;  %v531_v50 = vld [vmem:[#allocation2 + $0xdd0] sm:$0xff] }
 0x1bb   :  { %3635 = vmatprep.subr.bf16.mxu0 %v7753_v1  ;;  %v7555_v1 = vcombine.high %v236_v56, %v240_v58 }
 0x1bd   :  { %3718 = vmatpush1.bf16.msra.mxu1 %v7498_v6  ;;  %v499_v6 = vld [vmem:[#allocation2 + $0xcd0] sm:$0xff] }
 0x1be   :  { %3636 = vmatpush1.bf16.msra.mxu0 %v7752_v7  ;;  %3719 = vmatprep.subr.bf16.mxu1 %v7507_v8  ;;  %v503_v7 = vld [vmem:[#allocation2 + $0xcf0] sm:$0xff]  ;;  %v7808_v8 = vcombine.low %v491_v60, %v495_v62  ;;  %v7840_v60 = vcombine.low %v523_v38, %v527_v39 }
 0x1bf   :  { %3637 = vmatprep.subr.bf16.mxu0 %v7761_v9  ;;  %v7563_v9 = vcombine.high %v244_v4, %v248_v5  ;;  %v7817_v11 = vcombine.high %v499_v6, %v503_v7 }
 0x1c1   :  { %3720 = vmatpush1.bf16.msra.mxu1 %v7506_v14  ;;  %v507_v14 = vld [vmem:[#allocation2 + $0xd10] sm:$0xff] }
 0x1c2   :  { %3638 = vmatpush1.bf16.msra.mxu0 %v7760_v15  ;;  %3721 = vmatprep.subr.bf16.mxu1 %v7515_v17  ;;  %v511_v15 = vld [vmem:[#allocation2 + $0xd30] sm:$0xff]  ;;  %v7562_v17 = vcombine.low %v244_v4, %v248_v5 }
 0x1c3   :  { %3639 = vmatprep.subr.bf16.mxu0 %v7769_v18  ;;  %v7816_v18 = vcombine.low %v499_v6, %v503_v7  ;;  %v7825_v20 = vcombine.high %v507_v14, %v511_v15  ;;  %v7824_v30 = vcombine.low %v507_v14, %v511_v15  ;;  %v292_v7 = vld [vmem:[#allocation2 + $0x658] sm:$0xff] }
 0x1c4   :  { %v300_v15 = vld [vmem:[#allocation2 + $0x698] sm:$0xff] }
 0x1c5   :  { %3722 = vmatpush1.bf16.msra.mxu1 %v7514_v24  ;;  %v9483_v24 = vld [vmem:[#allocation5] sm:$0xff] }
 0x1c6   :  { %3640 = vmatpush1.bf16.msra.mxu0 %v7768_v25  ;;  %3723 = vmatprep.subr.bf16.mxu1 %v7523_v26  ;;  %v609_v25 = vsub.s32 1, %v9480_v10  ;;  %v515_v26 = vld [vmem:[#allocation2 + $0xd50] sm:$0xff]  ;;  %v606_v32 = vrot.slane %v9483_v24, %v605_v19 }
 0x1c7   :  { %3641 = vmatprep.subr.bf16.mxu0 %v7777_v28  ;;  %v519_v28 = vld [vmem:[#allocation2 + $0xd70] sm:$0xff] }
 0x1c8   :  { %v7832_v41 = vcombine.low %v515_v26, %v519_v28 }
 0x1c9   :  { %3724 = vmatpush1.bf16.msra.mxu1 %v7522_v33  ;;  %v7833_v33 = vcombine.high %v515_v26, %v519_v28  ;;  %v308_v28 = vld [vmem:[#allocation2 + $0x6d8] sm:$0xff] }
 0x1ca   :  { %3642 = vmatpush1.bf16.msra.mxu0 %v7776_v34  ;;  %3725 = vmatprep.subr.bf16.mxu1 %v7531_v36  ;;  %v268_v34 = vld [vmem:[#allocation2 + $0x598] sm:$0xff] }
 0x1cb   :  { %3643 = vmatprep.subr.bf16.mxu0 %v7785_v37  ;;  %v272_v36 = vld [vmem:[#allocation2 + $0x5b8] sm:$0xff]  ;;  %v610_v37 = vrot.slane %v9483_v24, %v609_v25 }
 0x1cd   :  { %3726 = vmatpush1.bf16.msra.mxu1 %v7530_v42  ;;  %v7587_v42 = vcombine.high %v268_v34, %v272_v36  ;;  %v3240_v48 = vadd.f32 %v9470_v63, %v610_v37  ;;  %v288_v63 = vld [vmem:[#allocation2 + $0x638] sm:$0xff] }
 0x1ce   :  { %3644 = vmatpush1.bf16.msra.mxu0 %v7784_v44  ;;  %3736 = vmatprep.subr.bf16.mxu1 %v7539_v45  ;;  %v3238_v44 = vadd.f32 %v9468_v59, %v606_v32  ;;  %v7841_v45 = vcombine.high %v523_v38, %v527_v39  ;;  %v316_v37 = vld [vmem:[#allocation2 + $0x718] sm:$0xff]  ;;  %v571_v39 = vld [vmem:[#allocation2 + $0xf10] sm:$0xff] }
 0x1cf   :  { %3654 = vmatprep.subr.bf16.mxu0 %v7793_v46  ;;  %v276_v46 = vld [vmem:[#allocation2 + $0x5d8] sm:$0xff] }
 0x1d0   :  { %3728 = vmatmul.mubr.bf16.vlgmr.msra.gmra.mrb[8].mxu1 %v9428_v16  ;;  %v7554_v16 = vcombine.low %v236_v56, %v240_v58  ;;  %v7595_v59 = vcombine.high %v276_v46, %v280_v47  ;;  %v320_v38 = vld [vmem:[#allocation2 + $0x738] sm:$0xff] }
 0x1d1   :  { %3646 = vmatmul.mubr.bf16.vlgmr.msra.gmra.mrb[4].mxu0 %v9447_v35  ;;  %3737 = vmatpush1.bf16.msra.mxu1 %v7538_v52  ;;  %v535_v52 = vld [vmem:[#allocation2 + $0xdf0] sm:$0xff] }
 0x1d2   :  { %3655 = vmatpush1.bf16.msra.mxu0 %v7792_v53  ;;  %3738 = vmatprep.subr.bf16.mxu1 %v7547_v54  ;;  %v7848_v4 = vcombine.low %v531_v50, %v535_v52 }
 0x1d3   :  { %3656 = vmatprep.subr.bf16.mxu0 %v7801_v55  ;;  %3686 = vmatprep.mubr.bf16.mxu0 %v9449_v43  ;;  %v7586_v55 = vcombine.low %v268_v34, %v272_v36 }
 0x1d4   :  { %3768 = vmatprep.mubr.bf16.mxu1 %v9418_v61  ;;  %v7571_v61 = vcombine.high %v252_v12, %v256_v13 }
 0x1d5   :  { %3739 = vmatpush1.bf16.msra.mxu1 %v7546_v0  ;;  %v7849_v0 = vcombine.high %v531_v50, %v535_v52  ;;  %v7634_v50 = vcombine.low %v316_v37, %v320_v38 }
 0x1d6   :  { %3657 = vmatpush1.bf16.msra.mxu0 %v7800_v57  ;;  %3740 = vmatprep.subr.bf16.mxu1 %v7555_v1  ;;  %v284_v57 = vld [vmem:[#allocation2 + $0x618] sm:$0xff]  ;;  %v539_v1 = vld [vmem:[#allocation2 + $0xe10] sm:$0xff] }
 0x1d7   :  { %3658 = vmatprep.subr.bf16.mxu0 %v7809_v3  ;;  %v7594_v3 = vcombine.low %v276_v46, %v280_v47  ;;  %v7603_v5 = vcombine.high %v284_v57, %v288_v63  ;;  %v7857_v6 = vcombine.high %v539_v1, %v543_v2  ;;  %v7856_v12 = vcombine.low %v539_v1, %v543_v2  ;;  %v324_v46 = vld [vmem:[#allocation2 + $0x758] sm:$0xff] }
 0x1d8   :  { %v328_v47 = vld [vmem:[#allocation2 + $0x778] sm:$0xff] }
 0x1d9   :  { %3741 = vmatpush1.bf16.msra.mxu1 %v7554_v16  ;;  %v296_v16 = vld [vmem:[#allocation2 + $0x678] sm:$0xff] }
 0x1da   :  { %3659 = vmatpush1.bf16.msra.mxu0 %v7808_v8  ;;  %3742 = vmatprep.subr.bf16.mxu1 %v7563_v9  ;;  %v547_v8 = vld [vmem:[#allocation2 + $0xe50] sm:$0xff]  ;;  %v7611_v13 = vcombine.high %v292_v7, %v296_v16  ;;  %v340_v2 = vld [vmem:[#allocation2 + $0x7d8] sm:$0xff] }
 0x1db   :  { %3660 = vmatprep.subr.bf16.mxu0 %v7817_v11  ;;  %v551_v9 = vld [vmem:[#allocation2 + $0xe70] sm:$0xff]  ;;  %v7602_v11 = vcombine.low %v284_v57, %v288_v63 }
 0x1dc   :  { %v7865_v14 = vcombine.high %v547_v8, %v551_v9  ;;  %v7864_v22 = vcombine.low %v547_v8, %v551_v9  ;;  %v348_v9 = vld [vmem:[#allocation2 + $0x818] sm:$0xff] }
 0x1dd   :  { %3743 = vmatpush1.bf16.msra.mxu1 %v7562_v17  ;;  %v304_v17 = vld [vmem:[#allocation2 + $0x6b8] sm:$0xff] }
 0x1de   :  { %3661 = vmatpush1.bf16.msra.mxu0 %v7816_v18  ;;  %3744 = vmatprep.subr.bf16.mxu1 %v7571_v61  ;;  %v555_v18 = vld [vmem:[#allocation2 + $0xe90] sm:$0xff]  ;;  %v7619_v23 = vcombine.high %v300_v15, %v304_v17  ;;  %v7618_v32 = vcombine.low %v300_v15, %v304_v17  ;;  %v8559_v15 = vld [vmem:[#allocation7 + $0x4] ss:$28 sps:$4 sm:$0xff]  }
 0x1df   :  { %3662 = vmatprep.subr.bf16.mxu0 %v7825_v20  ;;  %v559_v61 = vld [vmem:[#allocation2 + $0xeb0] sm:$0xff]  ;;  %v7610_v20 = vcombine.low %v292_v7, %v296_v16 }
 0x1e0   :  { %v7873_v26 = vcombine.high %v555_v18, %v559_v61 }
 0x1e1   :  { %3745 = vmatpush1.bf16.msra.mxu1 %v7570_v29  ;;  %v312_v29 = vld [vmem:[#allocation2 + $0x6f8] sm:$0xff] }
 0x1e2   :  { %3663 = vmatpush1.bf16.msra.mxu0 %v7824_v30  ;;  %3746 = vmatprep.subr.bf16.mxu1 %v7579_v31  ;;  %v563_v30 = vld [vmem:[#allocation2 + $0xed0] sm:$0xff]  ;;  %v7627_v34 = vcombine.high %v308_v28, %v312_v29 }
 0x1e3   :  { %3664 = vmatprep.subr.bf16.mxu0 %v7833_v33  ;;  %v567_v31 = vld [vmem:[#allocation2 + $0xef0] sm:$0xff]  ;;  %v7872_v33 = vcombine.low %v555_v18, %v559_v61  ;;  %v356_v18 = vld [vmem:[#allocation2 + $0x858] sm:$0xff] }
 0x1e4   :  { %v3360_v49 = vpop.f32.mrb[0].mxu0  ;;  %v7881_v36 = vcombine.high %v563_v30, %v567_v31  ;;  %v360_v61 = vld [vmem:[#allocation2 + $0x878] sm:$0xff] }
 0x1e5   :  { %v9494_v53 = vadd.f32 %v3360_v49, %v3238_v44  ;;  %v3362_v54 = vpop.f32.mrb[1].mxu0  ;;  %3747 = vmatpush1.bf16.msra.mxu1 %v7578_v40  ;;  %v575_v40 = vld [vmem:[#allocation2 + $0xf30] sm:$0xff]  ;;  %v7635_v44 = vcombine.high %v316_v37, %v320_v38 }
 0x1e6   :  { %v9496_v56 = vadd.f32 %v3362_v54, %v3240_v48  ;;  %v3364_v58 = vpop.f32.mrb[2].mxu0  ;;  %3665 = vmatpush1.bf16.msra.mxu0 %v7832_v41  ;;  %3748 = vmatprep.subr.bf16.mxu1 %v7587_v42  ;;  %v7626_v41 = vcombine.low %v308_v28, %v312_v29  ;;  %v7880_v42 = vcombine.low %v563_v30, %v567_v31  ;;  %v579_v48 = vld [vmem:[#allocation2 + $0xf50] sm:$0xff]  ;;  %v364_v28 = vld [vmem:[#allocation2 + $0x898] sm:$0xff] }
 0x1e7   :  { %v3365_v62 = vpop.f32.mrb[3].mxu0  ;;  %3666 = vmatprep.subr.bf16.mxu0 %v7841_v45  ;;  %v7889_v45 = vcombine.high %v571_v39, %v575_v40  ;;  %v583_v49 = vld [vmem:[#allocation2 + $0xf70] sm:$0xff]  ;;  %v7888_v52 = vcombine.low %v571_v39, %v575_v40  ;;  %v7643_v54 = vcombine.high %v324_v46, %v328_v47  ;;  %v332_v58 = vld [vmem:[#allocation2 + $0x798] sm:$0xff] }
 0x1e8   :  { %v591_v62 = vld [vmem:[#allocation2 + $0xfb0] sm:$0xff]  ;;  %v7896_v57 = vcombine.low %v579_v48, %v583_v49  ;;  %v3860_v17 = vmax.f32 %v9496_v56, 0.0  ;;  %v368_v29 = vld [vmem:[#allocation2 + $0x8b8] sm:$0xff]  ;;  %v7674_v56 = vcombine.low %v356_v18, %v360_v61 }
 0x1e9   :  { %3749 = vmatpush1.bf16.msra.mxu1 %v7586_v55  ;;  %v7897_v55 = vcombine.high %v579_v48, %v583_v49  ;;  %v8560_v31 = vld [vmem:[#allocation7 + $0x38] ss:$28 sps:$4 sm:$0xff]   ;;  %v7682_v37 = vcombine.low %v364_v28, %v368_v29  ;;  %v8568_v39 = vld [vmem:[#allocation7 + $0xac] ss:$28 sps:$4 sm:$0xff]   ;;  %v8569_v49 = vld [vmem:[#allocation7 + $0xe0] ss:$28 sps:$4 sm:$0xff]  }
 0x1ea   :  { %3667 = vmatpush1.bf16.msra.mxu0 %v7840_v60  ;;  %3750 = vmatprep.subr.bf16.mxu1 %v7595_v59  ;;  %v336_v60 = vld [vmem:[#allocation2 + $0x7b8] sm:$0xff]  ;;  %v587_v59 = vld [vmem:[#allocation2 + $0xf90] sm:$0xff]  ;;  %v9499_v30 = vpack.c.bf16 %v3860_v17, %v3860_v17 }
 0x1eb   :  { %3668 = vmatprep.subr.bf16.mxu0 %v7849_v0  ;;  %v7642_v0 = vcombine.low %v324_v46, %v328_v47  ;;  %v7651_v63 = vcombine.high %v332_v58, %v336_v60  ;;  %v7905_v1 = vcombine.high %v587_v59, %v591_v62  ;;  %v7904_v7 = vcombine.low %v587_v59, %v591_v62  ;;  %v380_v40 = vld [vmem:[#allocation2 + $0x918] sm:$0xff]  ;;  %v8571_v46 = vld [vmem:[#allocation7 + $0xe4] ss:$28 sps:$4 sm:$0xff]  }
 0x1ec   :  { %v388_v47 = vld [vmem:[#allocation2 + $0x958] sm:$0xff] }
 0x1ed   :  { %3751 = vmatpush1.bf16.msra.mxu1 %v7594_v3  ;;  %v344_v3 = vld [vmem:[#allocation2 + $0x7f8] sm:$0xff] }
 0x1ee   :  { %3669 = vmatpush1.bf16.msra.mxu0 %v7848_v4  ;;  %3752 = vmatprep.subr.bf16.mxu1 %v7603_v5  ;;  %v595_v4 = vld [vmem:[#allocation2 + $0xfd0] sm:$0xff]  ;;  %v7659_v16 = vcombine.high %v340_v2, %v344_v3  ;;  %v8577_v62 = vld [vmem:[#allocation7 + $0x154] ss:$28 sps:$4 sm:$0xff]  }
 0x1ef   :  { %3670 = vmatprep.subr.bf16.mxu0 %v7857_v6  ;;  %v599_v5 = vld [vmem:[#allocation2 + $0xff0] sm:$0xff]  ;;  %v7650_v6 = vcombine.low %v332_v58, %v336_v60  ;;  %v8572_v60 = vld [vmem:[#allocation7 + $0x118] ss:$28 sps:$4 sm:$0xff]  }
 0x1f0   :  { %v7913_v8 = vcombine.high %v595_v4, %v599_v5  ;;  %v428_v17 = vld [vmem:[#allocation2 + $0xa98] sm:$0xff] }
 0x1f1   :  { %3753 = vmatpush1.bf16.msra.mxu1 %v7602_v11  ;;  %v352_v11 = vld [vmem:[#allocation2 + $0x838] sm:$0xff] }
 0x1f2   :  { %3671 = vmatpush1.bf16.msra.mxu0 %v7856_v12  ;;  %3754 = vmatprep.subr.bf16.mxu1 %v7611_v13  ;;  %v7658_v12 = vcombine.low %v340_v2, %v344_v3  ;;  %v7912_v13 = vcombine.low %v595_v4, %v599_v5  ;;  %v8580_v3 = vld [vmem:[#allocation7 + $0x18c] ss:$28 sps:$4 sm:$0xff]   ;;  %v412_v4 = vld [vmem:[#allocation2 + $0xa18] sm:$0xff] }
 0x1f3   :  { %3672 = vmatprep.subr.bf16.mxu0 %v7865_v14  ;;  %v7667_v14 = vcombine.high %v348_v9, %v352_v11  ;;  %v416_v5 = vld [vmem:[#allocation2 + $0xa38] sm:$0xff] }
 0x1f5   :  { %3755 = vmatpush1.bf16.msra.mxu1 %v7610_v20  ;;  %v7666_v20 = vcombine.low %v348_v9, %v352_v11  ;;  %v420_v9 = vld [vmem:[#allocation2 + $0xa58] sm:$0xff] }
 0x1f6   :  { %3673 = vmatpush1.bf16.msra.mxu0 %v7864_v22  ;;  %3756 = vmatprep.subr.bf16.mxu1 %v7619_v23  ;;  %v8557_v22 = vld [vmem:[#allocation7] ss:$28 sps:$4 sm:$0xff]   ;;  %v7675_v23 = vcombine.high %v356_v18, %v360_v61  ;;  %v424_v11 = vld [vmem:[#allocation2 + $0xa78] sm:$0xff] }
 0x1f7   :  { %3674 = vmatprep.subr.bf16.mxu0 %v7873_v26  ;;  %v8562_v26 = vld [vmem:[#allocation7 + $0x3c] ss:$28 sps:$4 sm:$0xff]   ;;  %v432_v18 = vld [vmem:[#allocation2 + $0xab8] sm:$0xff]  ;;  %v7738_v61 = vcombine.low %v420_v9, %v424_v11 }
 0x1f9   :  { %3757 = vmatpush1.bf16.msra.mxu1 %v7618_v32  ;;  %v7683_v32 = vcombine.high %v364_v28, %v368_v29  ;;  %v440_v28 = vld [vmem:[#allocation2 + $0xaf8] sm:$0xff]  ;;  %v7746_v29 = vcombine.low %v428_v17, %v432_v18 }
 0x1fa   :  { %3675 = vmatpush1.bf16.msra.mxu0 %v7872_v33  ;;  %3758 = vmatprep.subr.bf16.mxu1 %v7627_v34  ;;  %v8565_v33 = vld [vmem:[#allocation7 + $0x74] ss:$28 sps:$4 sm:$0xff]  }
 0x1fb   :  { %3676 = vmatprep.subr.bf16.mxu0 %v7881_v36  ;;  %v372_v34 = vld [vmem:[#allocation2 + $0x8d8] sm:$0xff] }
 0x1fc   :  { %v376_v36 = vld [vmem:[#allocation2 + $0x8f8] sm:$0xff] }
 0x1fd   :  { %3759 = vmatpush1.bf16.msra.mxu1 %v7626_v41  ;;  %v7691_v38 = vcombine.high %v372_v34, %v376_v36  ;;  %v384_v41 = vld [vmem:[#allocation2 + $0x938] sm:$0xff] }
 0x1fe   :  { %3677 = vmatpush1.bf16.msra.mxu0 %v7880_v42  ;;  %3760 = vmatprep.subr.bf16.mxu1 %v7635_v44  ;;  %v7690_v42 = vcombine.low %v372_v34, %v376_v36  ;;  %v8566_v44 = vld [vmem:[#allocation7 + $0xa8] ss:$28 sps:$4 sm:$0xff]   ;;  %v7698_v48 = vcombine.low %v380_v40, %v384_v41  ;;  %v448_v34 = vld [vmem:[#allocation2 + $0xb38] sm:$0xff] }
 0x1ff   :  { %3678 = vmatprep.subr.bf16.mxu0 %v7889_v45  ;;  %v7699_v45 = vcombine.high %v380_v40, %v384_v41  ;;  %v456_v40 = vld [vmem:[#allocation2 + $0xb78] sm:$0xff] }
 0x201   :  { %3761 = vmatpush1.bf16.msra.mxu1 %v7634_v50 }
 0x202   :  { %3679 = vmatpush1.bf16.msra.mxu0 %v7888_v52  ;;  %3762 = vmatprep.subr.bf16.mxu1 %v7643_v54  ;;  %v8574_v52 = vld [vmem:[#allocation7 + $0x11c] ss:$28 sps:$4 sm:$0xff]   ;;  %v396_v54 = vld [vmem:[#allocation2 + $0x998] sm:$0xff] }
 0x203   :  { %3680 = vmatprep.subr.bf16.mxu0 %v7897_v55  ;;  %v400_v55 = vld [vmem:[#allocation2 + $0x9b8] sm:$0xff] }
 0x204   :  { %v7715_v59 = vcombine.high %v396_v54, %v400_v55 }
 0x205   :  { %3763 = vmatpush1.bf16.msra.mxu1 %v7642_v0  ;;  %v404_v0 = vld [vmem:[#allocation2 + $0x9d8] sm:$0xff] }
 0x206   :  { %3681 = vmatpush1.bf16.msra.mxu0 %v7896_v57  ;;  %3764 = vmatprep.subr.bf16.mxu1 %v7651_v63  ;;  %v408_v57 = vld [vmem:[#allocation2 + $0x9f8] sm:$0xff]  ;;  %v7714_v63 = vcombine.low %v396_v54, %v400_v55 }
 0x207   :  { %3682 = vmatprep.subr.bf16.mxu0 %v7905_v1  ;;  %v8575_v1 = vld [vmem:[#allocation7 + $0x150] ss:$28 sps:$4 sm:$0xff]   ;;  %v7723_v2 = vcombine.high %v404_v0, %v408_v57 }
 0x208   :  { %v472_v54 = vld [vmem:[#allocation2 + $0xbf8] sm:$0xff] }
 0x209   :  { %3765 = vmatpush1.bf16.msra.mxu1 %v7650_v6  ;;  %v7722_v6 = vcombine.low %v404_v0, %v408_v57  ;;  %v480_v0 = vld [vmem:[#allocation2 + $0xc38] sm:$0xff] }
 0x20a   :  { %3683 = vmatpush1.bf16.msra.mxu0 %v7904_v7  ;;  %3766 = vmatprep.subr.bf16.mxu1 %v7659_v16  ;;  %v8578_v7 = vld [vmem:[#allocation7 + $0x188] ss:$28 sps:$4 sm:$0xff]   ;;  %v7731_v16 = vcombine.high %v412_v4, %v416_v5 }
 0x20b   :  { %3684 = vmatprep.subr.bf16.mxu0 %v7913_v8  ;;  %v8583_v8 = vld [vmem:[#allocation7 + $0x1c4] ss:$28 sps:$4 sm:$0xff]  }
 0x20d   :  { %3767 = vmatpush1.bf16.msra.mxu1 %v7658_v12  ;;  %v7730_v12 = vcombine.low %v412_v4, %v416_v5  ;;  %v484_v4 = vld [vmem:[#allocation2 + $0xc58] sm:$0xff] }
 0x20e   :  { %3685 = vmatpush1.bf16.msra.mxu0 %v7912_v13  ;;  %3777 = vmatprep.subr.bf16.mxu1 %v7667_v14  ;;  %v8581_v13 = vld [vmem:[#allocation7 + $0x1c0] ss:$28 sps:$4 sm:$0xff]   ;;  %v7739_v14 = vcombine.high %v420_v9, %v424_v11  ;;  %v488_v5 = vld [vmem:[#allocation2 + $0xc78] sm:$0xff] }
 0x20f   :  { %6728 = vmatprep.subr.bf16.mxu0 %v8559_v15  ;;  %v8586_v15 = vld [vmem:[#allocation7 + $0x1fc] ss:$28 sps:$4 sm:$0xff]   ;;  %v492_v11 = vld [vmem:[#allocation2 + $0xc98] sm:$0xff] }
 0x210   :  { %3769 = vmatmul.mubr.bf16.vlgmr.msra.gmra.mrb[8].mxu1 %v9433_v21  ;;  %v8563_v21 = vld [vmem:[#allocation7 + $0x70] ss:$28 sps:$4 sm:$0xff]   ;;  %v8610_v9 = vld [vmem:[#allocation7 + $0x3bc] ss:$28 sps:$4 sm:$0xff]  }
 0x211   :  { %3687 = vmatmul.mubr.bf16.vlgmr.msra.gmra.mrb[4].mxu0 %v9458_v51  ;;  %3778 = vmatpush1.bf16.msra.mxu1 %v7666_v20  ;;  %v8584_v20 = vld [vmem:[#allocation7 + $0x1f8] ss:$28 sps:$4 sm:$0xff]  }
 0x212   :  { %6729 = vmatpush1.bf16.msra.mxu0 %v8557_v22  ;;  %6760 = vmatprep.mubr.bf16.mxu0 %v9499_v30  ;;  %v7747_v22 = vcombine.high %v428_v17, %v432_v18  ;;  %v500_v17 = vld [vmem:[#allocation2 + $0xcd8] sm:$0xff] }
 0x213   :  { %3779 = vmatprep.subr.bf16.mxu1 %v7675_v23  ;;  %6730 = vmatprep.subr.bf16.mxu0 %v8562_v26  ;;  %v8589_v23 = vld [vmem:[#allocation7 + $0x234] ss:$28 sps:$4 sm:$0xff]  }
 0x214   :  { %3809 = vmatprep.mubr.bf16.mxu1 %v9435_v27  ;;  %v392_v27 = vld [vmem:[#allocation2 + $0x978] sm:$0xff] }
 0x215   :  { %3780 = vmatpush1.bf16.msra.mxu1 %v7674_v56  ;;  %v7707_v50 = vcombine.high %v388_v47, %v392_v27  ;;  %v7706_v58 = vcombine.low %v388_v47, %v392_v27  ;;  %v436_v26 = vld [vmem:[#allocation2 + $0xad8] sm:$0xff] }
 0x216   :  { %6731 = vmatpush1.bf16.msra.mxu0 %v8560_v31  ;;  %3781 = vmatprep.subr.bf16.mxu1 %v7683_v32  ;;  %v8587_v56 = vld [vmem:[#allocation7 + $0x230] ss:$28 sps:$4 sm:$0xff]   ;;  %v7755_v31 = vcombine.high %v436_v26, %v440_v28  ;;  %v7754_v36 = vcombine.low %v436_v26, %v440_v28 }
 0x217   :  { %6732 = vmatprep.subr.bf16.mxu0 %v8565_v33  ;;  %v8592_v32 = vld [vmem:[#allocation7 + $0x26c] ss:$28 sps:$4 sm:$0xff]   ;;  %v444_v33 = vld [vmem:[#allocation2 + $0xb18] sm:$0xff] }
 0x218   :  { %v7762_v41 = vcombine.low %v444_v33, %v448_v34  ;;  %v464_v47 = vld [vmem:[#allocation2 + $0xbb8] sm:$0xff] }
 0x219   :  { %3782 = vmatpush1.bf16.msra.mxu1 %v7682_v37  ;;  %v8590_v37 = vld [vmem:[#allocation7 + $0x268] ss:$28 sps:$4 sm:$0xff]   ;;  %v504_v18 = vld [vmem:[#allocation2 + $0xcf8] sm:$0xff] }
 0x21a   :  { %6733 = vmatpush1.bf16.msra.mxu0 %v8563_v21  ;;  %3783 = vmatprep.subr.bf16.mxu1 %v7691_v38  ;;  %v7763_v21 = vcombine.high %v444_v33, %v448_v34  ;;  %v8595_v38 = vld [vmem:[#allocation7 + $0x2a4] ss:$28 sps:$4 sm:$0xff]   ;;  %v512_v26 = vld [vmem:[#allocation2 + $0xd38] sm:$0xff]  ;;  %v7818_v28 = vcombine.low %v500_v17, %v504_v18  ;;  %v617_v34 = vsub.s32 3, %v9480_v10 }
 0x21b   :  { %6734 = vmatprep.subr.bf16.mxu0 %v8568_v39  ;;  %v452_v39 = vld [vmem:[#allocation2 + $0xb58] sm:$0xff] }
 0x21c   :  { %v7770_v27 = vcombine.low %v452_v39, %v456_v40 }
 0x21d   :  { %3784 = vmatpush1.bf16.msra.mxu1 %v7690_v42  ;;  %v8593_v42 = vld [vmem:[#allocation7 + $0x2a0] ss:$28 sps:$4 sm:$0xff]  }
 0x21e   :  { %6735 = vmatpush1.bf16.msra.mxu0 %v8566_v44  ;;  %3785 = vmatprep.subr.bf16.mxu1 %v7699_v45  ;;  %v7771_v44 = vcombine.high %v452_v39, %v456_v40  ;;  %v8598_v45 = vld [vmem:[#allocation7 + $0x2dc] ss:$28 sps:$4 sm:$0xff]   ;;  %v528_v39 = vld [vmem:[#allocation2 + $0xdb8] sm:$0xff]  ;;  %v618_v40 = vrot.slane %v9483_v24, %v617_v34 }
 0x21f   :  { %6736 = vmatprep.subr.bf16.mxu0 %v8571_v46  ;;  %v460_v46 = vld [vmem:[#allocation2 + $0xb98] sm:$0xff] }
 0x220   :  { %v7778_v55 = vcombine.low %v460_v46, %v464_v47 }
 0x221   :  { %3786 = vmatpush1.bf16.msra.mxu1 %v7698_v48  ;;  %v8596_v48 = vld [vmem:[#allocation7 + $0x2d8] ss:$28 sps:$4 sm:$0xff]  }
 0x222   :  { %6737 = vmatpush1.bf16.msra.mxu0 %v8569_v49  ;;  %3787 = vmatprep.subr.bf16.mxu1 %v7707_v50  ;;  %v7779_v49 = vcombine.high %v460_v46, %v464_v47  ;;  %v8601_v50 = vld [vmem:[#allocation7 + $0x314] ss:$28 sps:$4 sm:$0xff]  }
 0x223   :  { %6738 = vmatprep.subr.bf16.mxu0 %v8574_v52  ;;  %v468_v52 = vld [vmem:[#allocation2 + $0xbd8] sm:$0xff] }
 0x224   :  { %v7786_v57 = vcombine.low %v468_v52, %v472_v54  ;;  %v8625_v46 = vld [vmem:[#allocation7 + $0x4d4] ss:$28 sps:$4 sm:$0xff]  }
 0x225   :  { %3788 = vmatpush1.bf16.msra.mxu1 %v7706_v58  ;;  %v8599_v58 = vld [vmem:[#allocation7 + $0x310] ss:$28 sps:$4 sm:$0xff]  }
 0x226   :  { %6739 = vmatpush1.bf16.msra.mxu0 %v8572_v60  ;;  %3789 = vmatprep.subr.bf16.mxu1 %v7715_v59  ;;  %v7787_v60 = vcombine.high %v468_v52, %v472_v54  ;;  %v8604_v59 = vld [vmem:[#allocation7 + $0x34c] ss:$28 sps:$4 sm:$0xff]   ;;  %v532_v47 = vld [vmem:[#allocation2 + $0xdd8] sm:$0xff] }
 0x227   :  { %6740 = vmatprep.subr.bf16.mxu0 %v8577_v62  ;;  %v476_v62 = vld [vmem:[#allocation2 + $0xc18] sm:$0xff] }
 0x229   :  { %3790 = vmatpush1.bf16.msra.mxu1 %v7714_v63  ;;  %v8602_v63 = vld [vmem:[#allocation7 + $0x348] ss:$28 sps:$4 sm:$0xff]  }
 0x22a   :  { %6741 = vmatpush1.bf16.msra.mxu0 %v8575_v1  ;;  %3791 = vmatprep.subr.bf16.mxu1 %v7723_v2  ;;  %v7795_v1 = vcombine.high %v476_v62, %v480_v0  ;;  %v3859_v2 = vmax.f32 %v9494_v53, 0.0  ;;  %v7802_v53 = vcombine.low %v484_v4, %v488_v5 }
 0x22b   :  { %6742 = vmatprep.subr.bf16.mxu0 %v8580_v3  ;;  %v8607_v3 = vld [vmem:[#allocation7 + $0x384] ss:$28 sps:$4 sm:$0xff]  }
 0x22d   :  { %3792 = vmatpush1.bf16.msra.mxu1 %v7722_v6  ;;  %v7794_v6 = vcombine.low %v476_v62, %v480_v0  ;;  %v540_v62 = vld [vmem:[#allocation2 + $0xe18] sm:$0xff] }
 0x22e   :  { %6743 = vmatpush1.bf16.msra.mxu0 %v8578_v7  ;;  %3793 = vmatprep.subr.bf16.mxu1 %v7731_v16  ;;  %v8605_v7 = vld [vmem:[#allocation7 + $0x380] ss:$28 sps:$4 sm:$0xff]   ;;  %v7803_v16 = vcombine.high %v484_v4, %v488_v5  ;;  %v544_v0 = vld [vmem:[#allocation2 + $0xe38] sm:$0xff] }
 0x22f   :  { %6744 = vmatprep.subr.bf16.mxu0 %v8583_v8  ;;  %v9506_v8 = vpack.c.bf16 %v3859_v2, %v3859_v2  ;;  %v7859_v2 = vcombine.high %v540_v62, %v544_v0  ;;  %v548_v4 = vld [vmem:[#allocation2 + $0xe58] sm:$0xff] }
 0x230   :  { %v552_v5 = vld [vmem:[#allocation2 + $0xe78] sm:$0xff] }
 0x231   :  { %3794 = vmatpush1.bf16.msra.mxu1 %v7730_v12  ;;  %v496_v12 = vld [vmem:[#allocation2 + $0xcb8] sm:$0xff] }
 0x232   :  { %6745 = vmatpush1.bf16.msra.mxu0 %v8581_v13  ;;  %3795 = vmatprep.subr.bf16.mxu1 %v7739_v14  ;;  %v8608_v13 = vld [vmem:[#allocation7 + $0x3b8] ss:$28 sps:$4 sm:$0xff]   ;;  %v7811_v14 = vcombine.high %v492_v11, %v496_v12 }
 0x233   :  { %6746 = vmatprep.subr.bf16.mxu0 %v8586_v15  ;;  %v8613_v15 = vld [vmem:[#allocation7 + $0x3f4] ss:$28 sps:$4 sm:$0xff]  }
 0x235   :  { %3796 = vmatpush1.bf16.msra.mxu1 %v7738_v61  ;;  %v7810_v61 = vcombine.low %v492_v11, %v496_v12  ;;  %v556_v11 = vld [vmem:[#allocation2 + $0xe98] sm:$0xff] }
 0x236   :  { %6747 = vmatpush1.bf16.msra.mxu0 %v8584_v20  ;;  %3797 = vmatprep.subr.bf16.mxu1 %v7747_v22  ;;  %v8611_v20 = vld [vmem:[#allocation7 + $0x3f0] ss:$28 sps:$4 sm:$0xff]  }
 0x237   :  { %6748 = vmatprep.subr.bf16.mxu0 %v8589_v23  ;;  %v8616_v22 = vld [vmem:[#allocation7 + $0x42c] ss:$28 sps:$4 sm:$0xff]   ;;  %v508_v23 = vld [vmem:[#allocation2 + $0xd18] sm:$0xff] }
 0x238   :  { %v7826_v33 = vcombine.low %v508_v23, %v512_v26  ;;  %v560_v12 = vld [vmem:[#allocation2 + $0xeb8] sm:$0xff] }
 0x239   :  { %3798 = vmatpush1.bf16.msra.mxu1 %v7746_v29  ;;  %v8614_v29 = vld [vmem:[#allocation7 + $0x428] ss:$28 sps:$4 sm:$0xff]  }
 0x23a   :  { %6749 = vmatpush1.bf16.msra.mxu0 %v8587_v56  ;;  %3799 = vmatprep.subr.bf16.mxu1 %v7755_v31  ;;  %v7827_v56 = vcombine.high %v508_v23, %v512_v26  ;;  %v8619_v31 = vld [vmem:[#allocation7 + $0x464] ss:$28 sps:$4 sm:$0xff]   ;;  %v572_v23 = vld [vmem:[#allocation2 + $0xf18] sm:$0xff] }
 0x23b   :  { %6750 = vmatprep.subr.bf16.mxu0 %v8592_v32  ;;  %v516_v32 = vld [vmem:[#allocation2 + $0xd58] sm:$0xff] }
 0x23c   :  { %v576_v26 = vld [vmem:[#allocation2 + $0xf38] sm:$0xff] }
 0x23d   :  { %3800 = vmatpush1.bf16.msra.mxu1 %v7754_v36  ;;  %v8617_v36 = vld [vmem:[#allocation7 + $0x460] ss:$28 sps:$4 sm:$0xff]  }
 0x23e   :  { %6751 = vmatpush1.bf16.msra.mxu0 %v8590_v37  ;;  %3801 = vmatprep.subr.bf16.mxu1 %v7763_v21  ;;  %v8622_v21 = vld [vmem:[#allocation7 + $0x49c] ss:$28 sps:$4 sm:$0xff]  }
 0x23f   :  { %6752 = vmatprep.subr.bf16.mxu0 %v8595_v38  ;;  %v524_v38 = vld [vmem:[#allocation2 + $0xd98] sm:$0xff] }
 0x240   :  { %v7842_v52 = vcombine.low %v524_v38, %v528_v39 }
 0x241   :  { %3802 = vmatpush1.bf16.msra.mxu1 %v7762_v41 }
 0x242   :  { %6753 = vmatpush1.bf16.msra.mxu0 %v8593_v42  ;;  %3803 = vmatprep.subr.bf16.mxu1 %v7771_v44  ;;  %v8620_v42 = vld [vmem:[#allocation7 + $0x498] ss:$28 sps:$4 sm:$0xff]   ;;  %v7843_v44 = vcombine.high %v524_v38, %v528_v39 }
 0x243   :  { %6754 = vmatprep.subr.bf16.mxu0 %v8598_v45  ;;  %v8646_v38 = vld [vmem:[#allocation7 + $0x65c] ss:$28 sps:$4 sm:$0xff]   ;;  %v588_v39 = vld [vmem:[#allocation2 + $0xf98] sm:$0xff] }
 0x245   :  { %3804 = vmatpush1.bf16.msra.mxu1 %v7770_v27  ;;  %v536_v27 = vld [vmem:[#allocation2 + $0xdf8] sm:$0xff] }
 0x246   :  { %6755 = vmatpush1.bf16.msra.mxu0 %v8596_v48  ;;  %3805 = vmatprep.subr.bf16.mxu1 %v7779_v49 }
 0x247   :  { %6756 = vmatprep.subr.bf16.mxu0 %v8601_v50 }
 0x249   :  { %3806 = vmatpush1.bf16.msra.mxu1 %v7778_v55  ;;  %v8623_v55 = vld [vmem:[#allocation7 + $0x4d0] ss:$28 sps:$4 sm:$0xff]  }
 0x24a   :  { %6757 = vmatpush1.bf16.msra.mxu0 %v8599_v58  ;;  %3807 = vmatprep.subr.bf16.mxu1 %v7787_v60  ;;  %v7851_v58 = vcombine.high %v532_v47, %v536_v27 }
 0x24b   :  { %6758 = vmatprep.subr.bf16.mxu0 %v8604_v59  ;;  %v8628_v59 = vld [vmem:[#allocation7 + $0x50c] ss:$28 sps:$4 sm:$0xff]  }
 0x24d   :  { %3808 = vmatpush1.bf16.msra.mxu1 %v7786_v57 }
 0x24e   :  { %6759 = vmatpush1.bf16.msra.mxu0 %v8602_v63  ;;  %3818 = vmatprep.subr.bf16.mxu1 %v7795_v1  ;;  %v7850_v63 = vcombine.low %v532_v47, %v536_v27  ;;  %v8626_v1 = vld [vmem:[#allocation7 + $0x508] ss:$28 sps:$4 sm:$0xff]   ;;  %v8649_v47 = vld [vmem:[#allocation7 + $0x694] ss:$28 sps:$4 sm:$0xff]  }
 0x24f   :  { %6769 = vmatprep.subr.bf16.mxu0 %v8607_v3  ;;  %v8631_v3 = vld [vmem:[#allocation7 + $0x544] ss:$28 sps:$4 sm:$0xff]   ;;  %v596_v27 = vld [vmem:[#allocation2 + $0xfd8] sm:$0xff] }
 0x250   :  { %3810 = vmatmul.mubr.bf16.vlgmr.msra.gmra.mrb[8].mxu1 %v9447_v35  ;;  %v7819_v35 = vcombine.high %v500_v17, %v504_v18  ;;  %v564_v17 = vld [vmem:[#allocation2 + $0xed8] sm:$0xff] }
 0x251   :  { %6761 = vmatmul.mubr.bf16.vlgmr.msra.gmra.mrb[8].mxu0 %v9506_v8  ;;  %3819 = vmatpush1.bf16.msra.mxu1 %v7794_v6  ;;  %v7858_v6 = vcombine.low %v540_v62, %v544_v0  ;;  %v568_v18 = vld [vmem:[#allocation2 + $0xef8] sm:$0xff]  ;;  %v8676_v62 = vld [vmem:[#allocation7 + $0x704] ss:$28 sps:$4 sm:$0xff]  }
 0x252   :  { %6770 = vmatpush1.bf16.msra.mxu0 %v8605_v7  ;;  %3820 = vmatprep.subr.bf16.mxu1 %v7803_v16  ;;  %v8629_v7 = vld [vmem:[#allocation7 + $0x540] ss:$28 sps:$4 sm:$0xff]   ;;  %v7867_v16 = vcombine.high %v548_v4, %v552_v5  ;;  %v8653_v0 = vld [vmem:[#allocation7 + $0x8] ss:$28 sps:$4 sm:$0xff]  }
 0x253   :  { %6771 = vmatprep.subr.bf16.mxu0 %v8610_v9  ;;  %3850 = vmatprep.mubr.bf16.mxu1 %v9449_v43  ;;  %v520_v43 = vld [vmem:[#allocation2 + $0xd78] sm:$0xff]  ;;  %v8634_v9 = vld [vmem:[#allocation7 + $0x57c] ss:$28 sps:$4 sm:$0xff]  }
 0x254   :  { %v7835_v37 = vcombine.high %v516_v32, %v520_v43  ;;  %v7834_v41 = vcombine.low %v516_v32, %v520_v43  ;;  %v580_v32 = vld [vmem:[#allocation2 + $0xf58] sm:$0xff] }
 0x255   :  { %3821 = vmatpush1.bf16.msra.mxu1 %v7802_v53  ;;  %v7866_v53 = vcombine.low %v548_v4, %v552_v5  ;;  %v584_v43 = vld [vmem:[#allocation2 + $0xf78] sm:$0xff]  ;;  %v8661_v4 = vld [vmem:[#allocation7 + $0x7c] ss:$28 sps:$4 sm:$0xff]  }
 0x256   :  { %6772 = vmatpush1.bf16.msra.mxu0 %v8608_v13  ;;  %3822 = vmatprep.subr.bf16.mxu1 %v7811_v14  ;;  %v8632_v13 = vld [vmem:[#allocation7 + $0x578] ss:$28 sps:$4 sm:$0xff]   ;;  %v7875_v14 = vcombine.high %v556_v11, %v560_v12 }
 0x257   :  { %6773 = vmatprep.subr.bf16.mxu0 %v8613_v15  ;;  %v8637_v15 = vld [vmem:[#allocation7 + $0x5b4] ss:$28 sps:$4 sm:$0xff]  }
 0x258   :  { %v8680_v5 = vld [vmem:[#allocation7 + $0x738] ss:$28 sps:$4 sm:$0xff]  }
 0x259   :  { %3823 = vmatpush1.bf16.msra.mxu1 %v7810_v61  ;;  %v7874_v61 = vcombine.low %v556_v11, %v560_v12  ;;  %v8662_v11 = vld [vmem:[#allocation7 + $0xb0] ss:$28 sps:$4 sm:$0xff]  }
 0x25a   :  { %6774 = vmatpush1.bf16.msra.mxu0 %v8611_v20  ;;  %3824 = vmatprep.subr.bf16.mxu1 %v7819_v35  ;;  %v8635_v20 = vld [vmem:[#allocation7 + $0x5b0] ss:$28 sps:$4 sm:$0xff]   ;;  %v7883_v35 = vcombine.high %v564_v17, %v568_v18 }
 0x25b   :  { %6775 = vmatprep.subr.bf16.mxu0 %v8616_v22  ;;  %v8640_v22 = vld [vmem:[#allocation7 + $0x5ec] ss:$28 sps:$4 sm:$0xff]  }
 0x25c   :  { %v8667_v12 = vld [vmem:[#allocation7 + $0xec] ss:$28 sps:$4 sm:$0xff]  }
 0x25d   :  { %3825 = vmatpush1.bf16.msra.mxu1 %v7818_v28  ;;  %v7882_v28 = vcombine.low %v564_v17, %v568_v18  ;;  %v8698_v17 = vld [vmem:[#allocation7 + $0x7e0] ss:$28 sps:$4 sm:$0xff]  }
 0x25e   :  { %6776 = vmatpush1.bf16.msra.mxu0 %v8614_v29  ;;  %3826 = vmatprep.subr.bf16.mxu1 %v7827_v56  ;;  %v8638_v29 = vld [vmem:[#allocation7 + $0x5e8] ss:$28 sps:$4 sm:$0xff]   ;;  %v7891_v56 = vcombine.high %v572_v23, %v576_v26  ;;  %v8706_v18 = vld [vmem:[#allocation7 + $0x81c] ss:$28 sps:$4 sm:$0xff]  }
 0x25f   :  { %6777 = vmatprep.subr.bf16.mxu0 %v8619_v31  ;;  %v8643_v31 = vld [vmem:[#allocation7 + $0x624] ss:$28 sps:$4 sm:$0xff]  }
 0x261   :  { %3827 = vmatpush1.bf16.msra.mxu1 %v7826_v33  ;;  %v7890_v33 = vcombine.low %v572_v23, %v576_v26  ;;  %v8671_v23 = vld [vmem:[#allocation7 + $0x158] ss:$28 sps:$4 sm:$0xff]  }
 0x262   :  { %6778 = vmatpush1.bf16.msra.mxu0 %v8617_v36  ;;  %3828 = vmatprep.subr.bf16.mxu1 %v7835_v37  ;;  %v8641_v36 = vld [vmem:[#allocation7 + $0x620] ss:$28 sps:$4 sm:$0xff]   ;;  %v7899_v37 = vcombine.high %v580_v32, %v584_v43  ;;  %v8679_v26 = vld [vmem:[#allocation7 + $0x194] ss:$28 sps:$4 sm:$0xff]  }
 0x263   :  { %v9515_v45 = vpop.f32.mrb[4].mxu1  ;;  %6779 = vmatprep.subr.bf16.mxu0 %v8622_v21  ;;  %v613_v21 = vsub.s32 2, %v9480_v10 }
 0x264   :  { %v3526_v48 = vpop.f32.mrb[5].mxu1 }
 0x265   :  { %v8457_v49 = vadd.f32 %v3526_v48, %v618_v40  ;;  %v3528_v50 = vpop.f32.mrb[6].mxu1  ;;  %3829 = vmatpush1.bf16.msra.mxu1 %v7834_v41  ;;  %v592_v40 = vld [vmem:[#allocation2 + $0xfb8] sm:$0xff]  ;;  %v7898_v41 = vcombine.low %v580_v32, %v584_v43  ;;  %v8716_v32 = vld [vmem:[#allocation7 + $0x888] ss:$28 sps:$4 sm:$0xff]  }
 0x266   :  { %6780 = vmatpush1.bf16.msra.mxu0 %v8620_v42  ;;  %v3529_v54 = vpop.f32.mrb[7].mxu1  ;;  %3830 = vmatprep.subr.bf16.mxu1 %v7843_v44  ;;  %v8644_v42 = vld [vmem:[#allocation7 + $0x658] ss:$28 sps:$4 sm:$0xff]   ;;  %v7907_v44 = vcombine.high %v588_v39, %v592_v40  ;;  %v8647_v50 = vld [vmem:[#allocation7 + $0x690] ss:$28 sps:$4 sm:$0xff]  }
 0x267   :  { %v3862_v60 = vmax.f32 %v8457_v49, 0.0  ;;  %6781 = vmatprep.subr.bf16.mxu0 %v8625_v46  ;;  %v614_v46 = vrot.slane %v9483_v24, %v613_v21  ;;  %v600_v48 = vld [vmem:[#allocation2 + $0xff8] sm:$0xff]  ;;  %v7906_v49 = vcombine.low %v588_v39, %v592_v40  ;;  %v8655_v24 = vld [vmem:[#allocation7 + $0xc] ss:$28 sps:$4 sm:$0xff]   ;;  %v8724_v43 = vld [vmem:[#allocation7 + $0x8c4] ss:$28 sps:$4 sm:$0xff]  }
 0x268   :  { %v8689_v39 = vld [vmem:[#allocation7 + $0x200] ss:$28 sps:$4 sm:$0xff]  }
 0x269   :  { %v9517_v57 = vpack.c.bf16 %v3862_v60, %v3862_v60  ;;  %3831 = vmatpush1.bf16.msra.mxu1 %v7842_v52  ;;  %v7915_v52 = vcombine.high %v596_v27, %v600_v48  ;;  %v8456_v54 = vadd.f32 %v9515_v45, %v614_v46  ;;  %v8650_v60 = vld [vmem:[#allocation7 + $0x6c8] ss:$28 sps:$4 sm:$0xff]   ;;  %v8682_v45 = vld [vmem:[#allocation7 + $0x73c] ss:$28 sps:$4 sm:$0xff]   ;;  %v8703_v46 = vld [vmem:[#allocation7 + $0x274] ss:$28 sps:$4 sm:$0xff]  }
 0x26a   :  { %6782 = vmatpush1.bf16.msra.mxu0 %v8623_v55  ;;  %3832 = vmatprep.subr.bf16.mxu1 %v7851_v58  ;;  %v8652_v55 = vld [vmem:[#allocation7 + $0x6cc] ss:$28 sps:$4 sm:$0xff]   ;;  %v7914_v58 = vcombine.low %v596_v27, %v600_v48  ;;  %v8697_v40 = vld [vmem:[#allocation7 + $0x23c] ss:$28 sps:$4 sm:$0xff]  }
 0x26b   :  { %6801 = vmatprep.mubr.bf16.mxu0 %v9517_v57  ;;  %6783 = vmatprep.subr.bf16.mxu0 %v8628_v59  ;;  %v3861_v59 = vmax.f32 %v8456_v54, 0.0  ;;  %v8742_v27 = vld [vmem:[#allocation7 + $0x96c] ss:$28 sps:$4 sm:$0xff]  }
 0x26c   :  { %v8701_v48 = vld [vmem:[#allocation7 + $0x270] ss:$28 sps:$4 sm:$0xff]   ;;  %v8707_v54 = vld [vmem:[#allocation7 + $0x2a8] ss:$28 sps:$4 sm:$0xff]  }
 0x26d   :  { %3833 = vmatpush1.bf16.msra.mxu1 %v7850_v63  ;;  %v8658_v63 = vld [vmem:[#allocation7 + $0x44] ss:$28 sps:$4 sm:$0xff]  }
 0x26e   :  { %6784 = vmatpush1.bf16.msra.mxu0 %v8626_v1  ;;  %3834 = vmatprep.subr.bf16.mxu1 %v7859_v2  ;;  %v9525_v1 = vpack.c.bf16 %v3861_v59, %v3861_v59  ;;  %v8674_v2 = vld [vmem:[#allocation7 + $0x700] ss:$28 sps:$4 sm:$0xff]  }
 0x26f   :  { %6785 = vmatprep.subr.bf16.mxu0 %v8631_v3  ;;  %v8656_v3 = vld [vmem:[#allocation7 + $0x40] ss:$28 sps:$4 sm:$0xff]  }
 0x270   :  { %v8721_v59 = vld [vmem:[#allocation7 + $0x31c] ss:$28 sps:$4 sm:$0xff]  }
 0x271   :  { %3835 = vmatpush1.bf16.msra.mxu1 %v7858_v6  ;;  %v8688_v6 = vld [vmem:[#allocation7 + $0x774] ss:$28 sps:$4 sm:$0xff]  }
 0x272   :  { %6786 = vmatpush1.bf16.msra.mxu0 %v8629_v7  ;;  %3836 = vmatprep.subr.bf16.mxu1 %v7867_v16  ;;  %v8659_v7 = vld [vmem:[#allocation7 + $0x78] ss:$28 sps:$4 sm:$0xff]  }
 0x273   :  { %6787 = vmatprep.subr.bf16.mxu0 %v8634_v9  ;;  %v8664_v16 = vld [vmem:[#allocation7 + $0xb4] ss:$28 sps:$4 sm:$0xff]  }
 0x274   :  { %v8686_v9 = vld [vmem:[#allocation7 + $0x770] ss:$28 sps:$4 sm:$0xff]  }
 0x275   :  { %3837 = vmatpush1.bf16.msra.mxu1 %v7866_v53  ;;  %v8692_v53 = vld [vmem:[#allocation7 + $0x7a8] ss:$28 sps:$4 sm:$0xff]  }
 0x276   :  { %6788 = vmatpush1.bf16.msra.mxu0 %v8632_v13  ;;  %3838 = vmatprep.subr.bf16.mxu1 %v7875_v14  ;;  %v8700_v13 = vld [vmem:[#allocation7 + $0x7e4] ss:$28 sps:$4 sm:$0xff]  }
 0x277   :  { %6789 = vmatprep.subr.bf16.mxu0 %v8637_v15  ;;  %v8665_v14 = vld [vmem:[#allocation7 + $0xe8] ss:$28 sps:$4 sm:$0xff]  }
 0x278   :  { %v8670_v15 = vld [vmem:[#allocation7 + $0x124] ss:$28 sps:$4 sm:$0xff]  }
 0x279   :  { %3839 = vmatpush1.bf16.msra.mxu1 %v7874_v61  ;;  %v8668_v61 = vld [vmem:[#allocation7 + $0x120] ss:$28 sps:$4 sm:$0xff]  }
 0x27a   :  { %6790 = vmatpush1.bf16.msra.mxu0 %v8635_v20  ;;  %3840 = vmatprep.subr.bf16.mxu1 %v7883_v35  ;;  %v8673_v20 = vld [vmem:[#allocation7 + $0x15c] ss:$28 sps:$4 sm:$0xff]  }
 0x27b   :  { %6791 = vmatprep.subr.bf16.mxu0 %v8640_v22  ;;  %v8704_v35 = vld [vmem:[#allocation7 + $0x818] ss:$28 sps:$4 sm:$0xff]  }
 0x27c   :  { %v8712_v22 = vld [vmem:[#allocation7 + $0x854] ss:$28 sps:$4 sm:$0xff]  }
 0x27d   :  { %3841 = vmatpush1.bf16.msra.mxu1 %v7882_v28  ;;  %v8710_v28 = vld [vmem:[#allocation7 + $0x850] ss:$28 sps:$4 sm:$0xff]  }
 0x27e   :  { %6792 = vmatpush1.bf16.msra.mxu0 %v8638_v29  ;;  %3842 = vmatprep.subr.bf16.mxu1 %v7891_v56  ;;  %v8718_v29 = vld [vmem:[#allocation7 + $0x88c] ss:$28 sps:$4 sm:$0xff]  }
 0x27f   :  { %6793 = vmatprep.subr.bf16.mxu0 %v8643_v31  ;;  %v8677_v56 = vld [vmem:[#allocation7 + $0x190] ss:$28 sps:$4 sm:$0xff]  }
 0x280   :  { %v8685_v31 = vld [vmem:[#allocation7 + $0x1cc] ss:$28 sps:$4 sm:$0xff]  }
 0x281   :  { %3843 = vmatpush1.bf16.msra.mxu1 %v7890_v33  ;;  %v8683_v33 = vld [vmem:[#allocation7 + $0x1c8] ss:$28 sps:$4 sm:$0xff]  }
 0x282   :  { %6794 = vmatpush1.bf16.msra.mxu0 %v8641_v36  ;;  %3844 = vmatprep.subr.bf16.mxu1 %v7899_v37  ;;  %v8691_v36 = vld [vmem:[#allocation7 + $0x204] ss:$28 sps:$4 sm:$0xff]  }
 0x283   :  { %6795 = vmatprep.subr.bf16.mxu0 %v8646_v38  ;;  %v8722_v37 = vld [vmem:[#allocation7 + $0x8c0] ss:$28 sps:$4 sm:$0xff]  }
 0x284   :  { %v8730_v38 = vld [vmem:[#allocation7 + $0x8fc] ss:$28 sps:$4 sm:$0xff]  }
 0x285   :  { %3845 = vmatpush1.bf16.msra.mxu1 %v7898_v41  ;;  %v8728_v41 = vld [vmem:[#allocation7 + $0x8f8] ss:$28 sps:$4 sm:$0xff]  }
 0x286   :  { %6796 = vmatpush1.bf16.msra.mxu0 %v8644_v42  ;;  %3846 = vmatprep.subr.bf16.mxu1 %v7907_v44  ;;  %v8736_v42 = vld [vmem:[#allocation7 + $0x934] ss:$28 sps:$4 sm:$0xff]  }
 0x287   :  { %6797 = vmatprep.subr.bf16.mxu0 %v8649_v47  ;;  %v8695_v44 = vld [vmem:[#allocation7 + $0x238] ss:$28 sps:$4 sm:$0xff]   ;;  %v8734_v47 = vld [vmem:[#allocation7 + $0x930] ss:$28 sps:$4 sm:$0xff]  }
 0x289   :  { %3847 = vmatpush1.bf16.msra.mxu1 %v7906_v49  ;;  %v8709_v49 = vld [vmem:[#allocation7 + $0x2ac] ss:$28 sps:$4 sm:$0xff]  }
 0x28a   :  { %6798 = vmatpush1.bf16.msra.mxu0 %v8647_v50  ;;  %3848 = vmatprep.subr.bf16.mxu1 %v7915_v52  ;;  %v8740_v50 = vld [vmem:[#allocation7 + $0x968] ss:$28 sps:$4 sm:$0xff]  }
 0x28b   :  { %6799 = vmatprep.subr.bf16.mxu0 %v8652_v55  ;;  %v8748_v52 = vld [vmem:[#allocation7 + $0x9a4] ss:$28 sps:$4 sm:$0xff]  }
 0x28c   :  { %v8715_v55 = vld [vmem:[#allocation7 + $0x2e4] ss:$28 sps:$4 sm:$0xff]  }
 0x28d   :  { %3849 = vmatpush1.bf16.msra.mxu1 %v7914_v58  ;;  %v8746_v58 = vld [vmem:[#allocation7 + $0x9a0] ss:$28 sps:$4 sm:$0xff]  }
 0x28e   :  { %6800 = vmatpush1.bf16.msra.mxu0 %v8650_v60  ;;  %6892 = vmatprep.subr.bf16.mxu1 %v8655_v24  ;;  %v8754_v60 = vld [vmem:[#allocation7 + $0x9dc] ss:$28 sps:$4 sm:$0xff]  }
 0x28f   :  { %6810 = vmatprep.subr.bf16.mxu0 %v8676_v62  ;;  %v8713_v24 = vld [vmem:[#allocation7 + $0x2e0] ss:$28 sps:$4 sm:$0xff]   ;;  %v8752_v62 = vld [vmem:[#allocation7 + $0x9d8] ss:$28 sps:$4 sm:$0xff]  }
 0x290   :  { %3851 = vmatmul.mubr.bf16.vlgmr.msra.gmra.mrb[8].mxu1 %v9458_v51  ;;  %v8694_v51 = vld [vmem:[#allocation7 + $0x7ac] ss:$28 sps:$4 sm:$0xff]  }
 0x291   :  { %6802 = vmatmul.mubr.bf16.vlgmr.msra.gmra.mrb[8].mxu0 %v9525_v1  ;;  %6893 = vmatpush1.bf16.msra.mxu1 %v8653_v0  ;;  %v8760_v0 = vld [vmem:[#allocation7 + $0xa14] ss:$28 sps:$4 sm:$0xff]  }
 0x292   :  { %6924 = vmatprep.mubr.bf16.mxu1 %v9499_v30  ;;  %6894 = vmatprep.subr.bf16.mxu1 %v8658_v63  ;;  %v8719_v63 = vld [vmem:[#allocation7 + $0x318] ss:$28 sps:$4 sm:$0xff]  }
 0x293   :  { %6811 = vmatpush1.bf16.msra.mxu0 %v8674_v2  ;;  %v8727_v2 = vld [vmem:[#allocation7 + $0x354] ss:$28 sps:$4 sm:$0xff]  }
 0x294   :  { %6812 = vmatprep.subr.bf16.mxu0 %v8682_v45  ;;  %v8758_v45 = vld [vmem:[#allocation7 + $0xa10] ss:$28 sps:$4 sm:$0xff]  }
 0x295   :  { %6895 = vmatpush1.bf16.msra.mxu1 %v8656_v3  ;;  %v8766_v3 = vld [vmem:[#allocation7 + $0xa4c] ss:$28 sps:$4 sm:$0xff]  }
 0x296   :  { %6896 = vmatprep.subr.bf16.mxu1 %v8661_v4  ;;  %v8725_v4 = vld [vmem:[#allocation7 + $0x350] ss:$28 sps:$4 sm:$0xff]  }
 0x297   :  { %6813 = vmatpush1.bf16.msra.mxu0 %v8680_v5  ;;  %v8733_v5 = vld [vmem:[#allocation7 + $0x38c] ss:$28 sps:$4 sm:$0xff]  }
 0x298   :  { %6814 = vmatprep.subr.bf16.mxu0 %v8688_v6  ;;  %v8764_v6 = vld [vmem:[#allocation7 + $0xa48] ss:$28 sps:$4 sm:$0xff]  }
 0x299   :  { %6897 = vmatpush1.bf16.msra.mxu1 %v8659_v7  ;;  %v8820_v7 = vld [vmem:[#allocation7 + $0xa84] ss:$28 sps:$4 sm:$0xff]  }
 0x29a   :  { %6898 = vmatprep.subr.bf16.mxu1 %v8664_v16  ;;  %v8731_v16 = vld [vmem:[#allocation7 + $0x388] ss:$28 sps:$4 sm:$0xff]  }
 0x29b   :  { %6815 = vmatpush1.bf16.msra.mxu0 %v8686_v9  ;;  %v8739_v9 = vld [vmem:[#allocation7 + $0x3c4] ss:$28 sps:$4 sm:$0xff]  }
 0x29c   :  { %6816 = vmatprep.subr.bf16.mxu0 %v8694_v51  ;;  %v8737_v51 = vld [vmem:[#allocation7 + $0x3c0] ss:$28 sps:$4 sm:$0xff]  }
 0x29d   :  { %6899 = vmatpush1.bf16.msra.mxu1 %v8662_v11  ;;  %v8745_v11 = vld [vmem:[#allocation7 + $0x3fc] ss:$28 sps:$4 sm:$0xff]  }
 0x29e   :  { %6900 = vmatprep.subr.bf16.mxu1 %v8667_v12  ;;  %v8743_v12 = vld [vmem:[#allocation7 + $0x3f8] ss:$28 sps:$4 sm:$0xff]  }
 0x29f   :  { %6817 = vmatpush1.bf16.msra.mxu0 %v8692_v53  ;;  %v8751_v53 = vld [vmem:[#allocation7 + $0x434] ss:$28 sps:$4 sm:$0xff]  }
 0x2a0   :  { %6818 = vmatprep.subr.bf16.mxu0 %v8700_v13  ;;  %v8749_v13 = vld [vmem:[#allocation7 + $0x430] ss:$28 sps:$4 sm:$0xff]  }
 0x2a1   :  { %6901 = vmatpush1.bf16.msra.mxu1 %v8665_v14  ;;  %v8757_v14 = vld [vmem:[#allocation7 + $0x46c] ss:$28 sps:$4 sm:$0xff]  }
 0x2a2   :  { %6902 = vmatprep.subr.bf16.mxu1 %v8670_v15  ;;  %v8755_v15 = vld [vmem:[#allocation7 + $0x468] ss:$28 sps:$4 sm:$0xff]  }
 0x2a3   :  { %6819 = vmatpush1.bf16.msra.mxu0 %v8698_v17  ;;  %v621_v17 = vsub.s32 4, %v9480_v10 }
 0x2a4   :  { %6820 = vmatprep.subr.bf16.mxu0 %v8706_v18  ;;  %v625_v18 = vsub.s32 5, %v9480_v10 }
 0x2a5   :  { %6903 = vmatpush1.bf16.msra.mxu1 %v8668_v61  ;;  %v8763_v61 = vld [vmem:[#allocation7 + $0x4a4] ss:$28 sps:$4 sm:$0xff]  }
 0x2a6   :  { %6904 = vmatprep.subr.bf16.mxu1 %v8673_v20  ;;  %v9534_v20 = vld [vmem:[#allocation5] sm:$0xff] }
 0x2a7   :  { %6821 = vmatpush1.bf16.msra.mxu0 %v8704_v35  ;;  %v622_v35 = vrot.slane %v9534_v20, %v621_v17 }
 0x2a8   :  { %6822 = vmatprep.subr.bf16.mxu0 %v8712_v22  ;;  %v8761_v22 = vld [vmem:[#allocation7 + $0x4a0] ss:$28 sps:$4 sm:$0xff]  }
 0x2a9   :  { %6905 = vmatpush1.bf16.msra.mxu1 %v8671_v23  ;;  %v626_v23 = vrot.slane %v9534_v20, %v625_v18 }
 0x2aa   :  { %6906 = vmatprep.subr.bf16.mxu1 %v8679_v26  ;;  %v8769_v26 = vld [vmem:[#allocation7 + $0x4dc] ss:$28 sps:$4 sm:$0xff]  }
 0x2ab   :  { %6823 = vmatpush1.bf16.msra.mxu0 %v8710_v28 }
 0x2ac   :  { %6824 = vmatprep.subr.bf16.mxu0 %v8718_v29 }
 0x2ad   :  { %6907 = vmatpush1.bf16.msra.mxu1 %v8677_v56 }
 0x2ae   :  { %6908 = vmatprep.subr.bf16.mxu1 %v8685_v31  ;;  %v8767_v31 = vld [vmem:[#allocation7 + $0x4d8] ss:$28 sps:$4 sm:$0xff]  }
 0x2af   :  { %6825 = vmatpush1.bf16.msra.mxu0 %v8716_v32 }
 0x2b0   :  { %6826 = vmatprep.subr.bf16.mxu0 %v8724_v43 }
 0x2b1   :  { %6909 = vmatpush1.bf16.msra.mxu1 %v8683_v33  ;;  %v8772_v33 = vld [vmem:[#allocation7 + $0x514] ss:$28 sps:$4 sm:$0xff]  }
 0x2b2   :  { %6910 = vmatprep.subr.bf16.mxu1 %v8691_v36 }
 0x2b3   :  { %6827 = vmatpush1.bf16.msra.mxu0 %v8722_v37 }
 0x2b4   :  { %6828 = vmatprep.subr.bf16.mxu0 %v8730_v38 }
 0x2b5   :  { %6911 = vmatpush1.bf16.msra.mxu1 %v8689_v39  ;;  %v8770_v39 = vld [vmem:[#allocation7 + $0x510] ss:$28 sps:$4 sm:$0xff]  }
 0x2b6   :  { %6912 = vmatprep.subr.bf16.mxu1 %v8697_v40 }
 0x2b7   :  { %6829 = vmatpush1.bf16.msra.mxu0 %v8728_v41  ;;  %v8775_v41 = vld [vmem:[#allocation7 + $0x54c] ss:$28 sps:$4 sm:$0xff]  }
 0x2b8   :  { %6830 = vmatprep.subr.bf16.mxu0 %v8736_v42  ;;  %v8818_v42 = vld [vmem:[#allocation7 + $0xa80] ss:$28 sps:$4 sm:$0xff]  }
 0x2b9   :  { %6913 = vmatpush1.bf16.msra.mxu1 %v8695_v44 }
 0x2ba   :  { %6914 = vmatprep.subr.bf16.mxu1 %v8703_v46  ;;  %v8826_v46 = vld [vmem:[#allocation7 + $0xabc] ss:$28 sps:$4 sm:$0xff]  }
 0x2bb   :  { %6831 = vmatpush1.bf16.msra.mxu0 %v8734_v47  ;;  %v8773_v47 = vld [vmem:[#allocation7 + $0x548] ss:$28 sps:$4 sm:$0xff]  }
 0x2bc   :  { %6832 = vmatprep.subr.bf16.mxu0 %v8742_v27  ;;  %v8778_v27 = vld [vmem:[#allocation7 + $0x584] ss:$28 sps:$4 sm:$0xff]  }
 0x2bd   :  { %6915 = vmatpush1.bf16.msra.mxu1 %v8701_v48  ;;  %v8824_v48 = vld [vmem:[#allocation7 + $0xab8] ss:$28 sps:$4 sm:$0xff]  }
 0x2be   :  { %6916 = vmatprep.subr.bf16.mxu1 %v8709_v49  ;;  %v8832_v49 = vld [vmem:[#allocation7 + $0xaf4] ss:$28 sps:$4 sm:$0xff]  }
 0x2bf   :  { %6833 = vmatpush1.bf16.msra.mxu0 %v8740_v50  ;;  %v8776_v50 = vld [vmem:[#allocation7 + $0x580] ss:$28 sps:$4 sm:$0xff]  }
 0x2c0   :  { %6834 = vmatprep.subr.bf16.mxu0 %v8748_v52  ;;  %v8781_v52 = vld [vmem:[#allocation7 + $0x5bc] ss:$28 sps:$4 sm:$0xff]  }
 0x2c1   :  { %6917 = vmatpush1.bf16.msra.mxu1 %v8707_v54  ;;  %v8830_v54 = vld [vmem:[#allocation7 + $0xaf0] ss:$28 sps:$4 sm:$0xff]  }
 0x2c2   :  { %6918 = vmatprep.subr.bf16.mxu1 %v8715_v55  ;;  %v8838_v55 = vld [vmem:[#allocation7 + $0xb2c] ss:$28 sps:$4 sm:$0xff]  }
 0x2c3   :  { %6835 = vmatpush1.bf16.msra.mxu0 %v8746_v58  ;;  %v8779_v58 = vld [vmem:[#allocation7 + $0x5b8] ss:$28 sps:$4 sm:$0xff]  }
 0x2c4   :  { %6836 = vmatprep.subr.bf16.mxu0 %v8754_v60  ;;  %v8784_v60 = vld [vmem:[#allocation7 + $0x5f4] ss:$28 sps:$4 sm:$0xff]  }
 0x2c5   :  { %6919 = vmatpush1.bf16.msra.mxu1 %v8713_v24  ;;  %v8836_v24 = vld [vmem:[#allocation7 + $0xb28] ss:$28 sps:$4 sm:$0xff]  }
 0x2c6   :  { %6920 = vmatprep.subr.bf16.mxu1 %v8721_v59  ;;  %v8844_v59 = vld [vmem:[#allocation7 + $0xb64] ss:$28 sps:$4 sm:$0xff]  }
 0x2c7   :  { %6837 = vmatpush1.bf16.msra.mxu0 %v8752_v62  ;;  %v8782_v62 = vld [vmem:[#allocation7 + $0x5f0] ss:$28 sps:$4 sm:$0xff]  }
 0x2c8   :  { %6838 = vmatprep.subr.bf16.mxu0 %v8760_v0  ;;  %v8787_v0 = vld [vmem:[#allocation7 + $0x62c] ss:$28 sps:$4 sm:$0xff]  }
 0x2c9   :  { %6921 = vmatpush1.bf16.msra.mxu1 %v8719_v63  ;;  %v8842_v63 = vld [vmem:[#allocation7 + $0xb60] ss:$28 sps:$4 sm:$0xff]  }
 0x2ca   :  { %6922 = vmatprep.subr.bf16.mxu1 %v8727_v2  ;;  %v8850_v2 = vld [vmem:[#allocation7 + $0xb9c] ss:$28 sps:$4 sm:$0xff]  }
 0x2cb   :  { %6839 = vmatpush1.bf16.msra.mxu0 %v8758_v45  ;;  %v8785_v45 = vld [vmem:[#allocation7 + $0x628] ss:$28 sps:$4 sm:$0xff]  }
 0x2cc   :  { %6840 = vmatprep.subr.bf16.mxu0 %v8766_v3  ;;  %v8790_v3 = vld [vmem:[#allocation7 + $0x664] ss:$28 sps:$4 sm:$0xff]  }
 0x2cd   :  { %6923 = vmatpush1.bf16.msra.mxu1 %v8725_v4  ;;  %v8848_v4 = vld [vmem:[#allocation7 + $0xb98] ss:$28 sps:$4 sm:$0xff]  }
 0x2ce   :  { %6933 = vmatprep.subr.bf16.mxu1 %v8733_v5  ;;  %v8856_v5 = vld [vmem:[#allocation7 + $0xbd4] ss:$28 sps:$4 sm:$0xff]  }
 0x2cf   :  { %6841 = vmatpush1.bf16.msra.mxu0 %v8764_v6  ;;  %v8788_v6 = vld [vmem:[#allocation7 + $0x660] ss:$28 sps:$4 sm:$0xff]  }
 0x2d0   :  { %6925 = vmatmul.mubr.bf16.vlgmr.msra.gmra.mrb[12].mxu1 %v9506_v8  ;;  %6851 = vmatprep.subr.bf16.mxu0 %v8820_v7  ;;  %v8793_v7 = vld [vmem:[#allocation7 + $0x69c] ss:$28 sps:$4 sm:$0xff]  }
 0x2d1   :  { %6934 = vmatpush1.bf16.msra.mxu1 %v8731_v16  ;;  %6965 = vmatprep.mubr.bf16.mxu1 %v9517_v57  ;;  %v8854_v16 = vld [vmem:[#allocation7 + $0xbd0] ss:$28 sps:$4 sm:$0xff]  }
 0x2d2   :  { %6935 = vmatprep.subr.bf16.mxu1 %v8739_v9  ;;  %v8862_v9 = vld [vmem:[#allocation7 + $0xc0c] ss:$28 sps:$4 sm:$0xff]  }
 0x2d5   :  { %6936 = vmatpush1.bf16.msra.mxu1 %v8737_v51  ;;  %v8791_v51 = vld [vmem:[#allocation7 + $0x698] ss:$28 sps:$4 sm:$0xff]  }
 0x2d6   :  { %6937 = vmatprep.subr.bf16.mxu1 %v8745_v11  ;;  %v8796_v11 = vld [vmem:[#allocation7 + $0x6d4] ss:$28 sps:$4 sm:$0xff]  }
 0x2d9   :  { %6938 = vmatpush1.bf16.msra.mxu1 %v8743_v12  ;;  %v8860_v12 = vld [vmem:[#allocation7 + $0xc08] ss:$28 sps:$4 sm:$0xff]  }
 0x2da   :  { %6939 = vmatprep.subr.bf16.mxu1 %v8751_v53  ;;  %v8868_v53 = vld [vmem:[#allocation7 + $0xc44] ss:$28 sps:$4 sm:$0xff]  }
 0x2dd   :  { %6940 = vmatpush1.bf16.msra.mxu1 %v8749_v13  ;;  %v8794_v13 = vld [vmem:[#allocation7 + $0x6d0] ss:$28 sps:$4 sm:$0xff]  }
 0x2de   :  { %6941 = vmatprep.subr.bf16.mxu1 %v8757_v14  ;;  %v8799_v14 = vld [vmem:[#allocation7 + $0x70c] ss:$28 sps:$4 sm:$0xff]  }
 0x2e1   :  { %6942 = vmatpush1.bf16.msra.mxu1 %v8755_v15  ;;  %v8866_v15 = vld [vmem:[#allocation7 + $0xc40] ss:$28 sps:$4 sm:$0xff]  }
 0x2e2   :  { %6943 = vmatprep.subr.bf16.mxu1 %v8763_v61  ;;  %v8874_v61 = vld [vmem:[#allocation7 + $0xc7c] ss:$28 sps:$4 sm:$0xff]  }
 0x2e4   :  { %v3688_v28 = vpop.f32.mrb[4].mxu0 }
 0x2e5   :  { %v8458_v29 = vadd.f32 %v3688_v28, %v622_v35  ;;  %v3690_v56 = vpop.f32.mrb[5].mxu0  ;;  %6944 = vmatpush1.bf16.msra.mxu1 %v8761_v22  ;;  %v8797_v35 = vld [vmem:[#allocation7 + $0x708] ss:$28 sps:$4 sm:$0xff]   ;;  %v8800_v28 = vld [vmem:[#allocation7 + $0x740] ss:$28 sps:$4 sm:$0xff]  }
 0x2e6   :  { %v8459_v32 = vadd.f32 %v3690_v56, %v626_v23  ;;  %v3692_v43 = vpop.f32.mrb[6].mxu0  ;;  %6945 = vmatprep.subr.bf16.mxu1 %v8769_v26  ;;  %v8802_v22 = vld [vmem:[#allocation7 + $0x744] ss:$28 sps:$4 sm:$0xff]   ;;  %v8872_v23 = vld [vmem:[#allocation7 + $0xc78] ss:$28 sps:$4 sm:$0xff]  }
 0x2e7   :  { %v3863_v36 = vmax.f32 %v8458_v29, 0.0  ;;  %v3693_v37 = vpop.f32.mrb[7].mxu0  ;;  %v8880_v26 = vld [vmem:[#allocation7 + $0xcb4] ss:$28 sps:$4 sm:$0xff]   ;;  %v8805_v29 = vld [vmem:[#allocation7 + $0x77c] ss:$28 sps:$4 sm:$0xff]  }
 0x2e8   :  { %v3864_v38 = vmax.f32 %v8459_v32, 0.0  ;;  %v8878_v56 = vld [vmem:[#allocation7 + $0xcb0] ss:$28 sps:$4 sm:$0xff]   ;;  %v8803_v32 = vld [vmem:[#allocation7 + $0x778] ss:$28 sps:$4 sm:$0xff]  }
 0x2e9   :  { %6946 = vmatpush1.bf16.msra.mxu1 %v8767_v31  ;;  %v9544_v44 = vpack.c.bf16 %v3863_v36, %v3863_v36  ;;  %v8886_v31 = vld [vmem:[#allocation7 + $0xcec] ss:$28 sps:$4 sm:$0xff]   ;;  %v8808_v43 = vld [vmem:[#allocation7 + $0x7b4] ss:$28 sps:$4 sm:$0xff]   ;;  %v8892_v36 = vld [vmem:[#allocation7 + $0xd24] ss:$28 sps:$4 sm:$0xff]  }
 0x2ea   :  { %v9542_v40 = vpack.c.bf16 %v3864_v38, %v3864_v38  ;;  %6947 = vmatprep.subr.bf16.mxu1 %v8772_v33  ;;  %v8884_v33 = vld [vmem:[#allocation7 + $0xce8] ss:$28 sps:$4 sm:$0xff]   ;;  %v8806_v37 = vld [vmem:[#allocation7 + $0x7b0] ss:$28 sps:$4 sm:$0xff]  }
 0x2eb   :  { %v8811_v38 = vld [vmem:[#allocation7 + $0x7ec] ss:$28 sps:$4 sm:$0xff]  }
 0x2ec   :  { %6842 = vmatprep.mubr.bf16.mxu0 %v9542_v40 }
 0x2ed   :  { %6843 = vmatmul.mubr.bf16.vlgmr.msra.gmra.mrb[8].mxu0 %v9544_v44  ;;  %6948 = vmatpush1.bf16.msra.mxu1 %v8770_v39  ;;  %v8890_v39 = vld [vmem:[#allocation7 + $0xd20] ss:$28 sps:$4 sm:$0xff]  }
 0x2ee   :  { %6949 = vmatprep.subr.bf16.mxu1 %v8775_v41  ;;  %6852 = vmatpush1.bf16.msra.mxu0 %v8818_v42  ;;  %v8898_v41 = vld [vmem:[#allocation7 + $0xd5c] ss:$28 sps:$4 sm:$0xff]   ;;  %v8809_v42 = vld [vmem:[#allocation7 + $0x7e8] ss:$28 sps:$4 sm:$0xff]  }
 0x2ef   :  { %6853 = vmatprep.subr.bf16.mxu0 %v8826_v46  ;;  %v8814_v46 = vld [vmem:[#allocation7 + $0x824] ss:$28 sps:$4 sm:$0xff]  }
 0x2f1   :  { %6950 = vmatpush1.bf16.msra.mxu1 %v8773_v47  ;;  %v8896_v47 = vld [vmem:[#allocation7 + $0xd58] ss:$28 sps:$4 sm:$0xff]  }
 0x2f2   :  { %6951 = vmatprep.subr.bf16.mxu1 %v8778_v27  ;;  %6854 = vmatpush1.bf16.msra.mxu0 %v8824_v48  ;;  %v8904_v27 = vld [vmem:[#allocation7 + $0xd94] ss:$28 sps:$4 sm:$0xff]   ;;  %v8812_v48 = vld [vmem:[#allocation7 + $0x820] ss:$28 sps:$4 sm:$0xff]  }
 0x2f3   :  { %6855 = vmatprep.subr.bf16.mxu0 %v8832_v49  ;;  %v8817_v49 = vld [vmem:[#allocation7 + $0x85c] ss:$28 sps:$4 sm:$0xff]  }
 0x2f5   :  { %6952 = vmatpush1.bf16.msra.mxu1 %v8776_v50  ;;  %v8902_v50 = vld [vmem:[#allocation7 + $0xd90] ss:$28 sps:$4 sm:$0xff]  }
 0x2f6   :  { %6953 = vmatprep.subr.bf16.mxu1 %v8781_v52  ;;  %6856 = vmatpush1.bf16.msra.mxu0 %v8830_v54  ;;  %v8910_v52 = vld [vmem:[#allocation7 + $0xdcc] ss:$28 sps:$4 sm:$0xff]   ;;  %v8815_v54 = vld [vmem:[#allocation7 + $0x858] ss:$28 sps:$4 sm:$0xff]  }
 0x2f7   :  { %6857 = vmatprep.subr.bf16.mxu0 %v8838_v55  ;;  %v8823_v55 = vld [vmem:[#allocation7 + $0x894] ss:$28 sps:$4 sm:$0xff]  }
 0x2f9   :  { %6954 = vmatpush1.bf16.msra.mxu1 %v8779_v58  ;;  %v8908_v58 = vld [vmem:[#allocation7 + $0xdc8] ss:$28 sps:$4 sm:$0xff]  }
 0x2fa   :  { %6955 = vmatprep.subr.bf16.mxu1 %v8784_v60  ;;  %6858 = vmatpush1.bf16.msra.mxu0 %v8836_v24  ;;  %v8916_v60 = vld [vmem:[#allocation7 + $0x14] ss:$28 sps:$4 sm:$0xff]  }
 0x2fb   :  { %6859 = vmatprep.subr.bf16.mxu0 %v8844_v59  ;;  %v8821_v24 = vld [vmem:[#allocation7 + $0x890] ss:$28 sps:$4 sm:$0xff]  }
 0x2fc   :  { %v8829_v59 = vld [vmem:[#allocation7 + $0x8cc] ss:$28 sps:$4 sm:$0xff]  }
 0x2fd   :  { %6956 = vmatpush1.bf16.msra.mxu1 %v8782_v62  ;;  %v8827_v62 = vld [vmem:[#allocation7 + $0x8c8] ss:$28 sps:$4 sm:$0xff]  }
 0x2fe   :  { %6957 = vmatprep.subr.bf16.mxu1 %v8787_v0  ;;  %6860 = vmatpush1.bf16.msra.mxu0 %v8842_v63  ;;  %v8835_v0 = vld [vmem:[#allocation7 + $0x904] ss:$28 sps:$4 sm:$0xff]  }
 0x2ff   :  { %6861 = vmatprep.subr.bf16.mxu0 %v8850_v2  ;;  %v8833_v63 = vld [vmem:[#allocation7 + $0x900] ss:$28 sps:$4 sm:$0xff]  }
 0x300   :  { %v8841_v2 = vld [vmem:[#allocation7 + $0x93c] ss:$28 sps:$4 sm:$0xff]  }
 0x301   :  { %6958 = vmatpush1.bf16.msra.mxu1 %v8785_v45  ;;  %v8839_v45 = vld [vmem:[#allocation7 + $0x938] ss:$28 sps:$4 sm:$0xff]  }
 0x302   :  { %6959 = vmatprep.subr.bf16.mxu1 %v8790_v3  ;;  %6862 = vmatpush1.bf16.msra.mxu0 %v8848_v4  ;;  %v8847_v3 = vld [vmem:[#allocation7 + $0x974] ss:$28 sps:$4 sm:$0xff]  }
 0x303   :  { %6863 = vmatprep.subr.bf16.mxu0 %v8856_v5  ;;  %v8845_v4 = vld [vmem:[#allocation7 + $0x970] ss:$28 sps:$4 sm:$0xff]  }
 0x304   :  { %v8853_v5 = vld [vmem:[#allocation7 + $0x9ac] ss:$28 sps:$4 sm:$0xff]  }
 0x305   :  { %6960 = vmatpush1.bf16.msra.mxu1 %v8788_v6  ;;  %v8851_v6 = vld [vmem:[#allocation7 + $0x9a8] ss:$28 sps:$4 sm:$0xff]  }
 0x306   :  { %6961 = vmatprep.subr.bf16.mxu1 %v8793_v7  ;;  %6864 = vmatpush1.bf16.msra.mxu0 %v8854_v16  ;;  %v8859_v7 = vld [vmem:[#allocation7 + $0x9e4] ss:$28 sps:$4 sm:$0xff]  }
 0x307   :  { %6865 = vmatprep.subr.bf16.mxu0 %v8862_v9  ;;  %v8857_v16 = vld [vmem:[#allocation7 + $0x9e0] ss:$28 sps:$4 sm:$0xff]  }
 0x308   :  { %v8865_v9 = vld [vmem:[#allocation7 + $0xa1c] ss:$28 sps:$4 sm:$0xff]  }
 0x309   :  { %6962 = vmatpush1.bf16.msra.mxu1 %v8791_v51  ;;  %v8863_v51 = vld [vmem:[#allocation7 + $0xa18] ss:$28 sps:$4 sm:$0xff]  }
 0x30a   :  { %6963 = vmatprep.subr.bf16.mxu1 %v8796_v11  ;;  %6866 = vmatpush1.bf16.msra.mxu0 %v8860_v12  ;;  %v8871_v11 = vld [vmem:[#allocation7 + $0xa54] ss:$28 sps:$4 sm:$0xff]  }
 0x30b   :  { %6867 = vmatprep.subr.bf16.mxu0 %v8868_v53  ;;  %v8869_v12 = vld [vmem:[#allocation7 + $0xa50] ss:$28 sps:$4 sm:$0xff]  }
 0x30c   :  { %v8877_v53 = vld [vmem:[#allocation7 + $0xa8c] ss:$28 sps:$4 sm:$0xff]  }
 0x30d   :  { %6964 = vmatpush1.bf16.msra.mxu1 %v8794_v13  ;;  %v8875_v13 = vld [vmem:[#allocation7 + $0xa88] ss:$28 sps:$4 sm:$0xff]  }
 0x30e   :  { %6974 = vmatprep.subr.bf16.mxu1 %v8799_v14  ;;  %6868 = vmatpush1.bf16.msra.mxu0 %v8866_v15  ;;  %v8883_v14 = vld [vmem:[#allocation7 + $0xac4] ss:$28 sps:$4 sm:$0xff]  }
 0x30f   :  { %6869 = vmatprep.subr.bf16.mxu0 %v8874_v61  ;;  %v8881_v15 = vld [vmem:[#allocation7 + $0xac0] ss:$28 sps:$4 sm:$0xff]  }
 0x310   :  { %6966 = vmatmul.mubr.bf16.vlgmr.msra.gmra.mrb[12].mxu1 %v9525_v1  ;;  %v8889_v61 = vld [vmem:[#allocation7 + $0xafc] ss:$28 sps:$4 sm:$0xff]  }
 0x311   :  { %6975 = vmatpush1.bf16.msra.mxu1 %v8797_v35  ;;  %7006 = vmatprep.mubr.bf16.mxu1 %v9542_v40  ;;  %v8887_v35 = vld [vmem:[#allocation7 + $0xaf8] ss:$28 sps:$4 sm:$0xff]  }
 0x312   :  { %6976 = vmatprep.subr.bf16.mxu1 %v8802_v22  ;;  %6870 = vmatpush1.bf16.msra.mxu0 %v8872_v23  ;;  %v8895_v22 = vld [vmem:[#allocation7 + $0xb34] ss:$28 sps:$4 sm:$0xff]  }
 0x313   :  { %6871 = vmatprep.subr.bf16.mxu0 %v8880_v26  ;;  %v8893_v23 = vld [vmem:[#allocation7 + $0xb30] ss:$28 sps:$4 sm:$0xff]  }
 0x314   :  { %v8901_v26 = vld [vmem:[#allocation7 + $0xb6c] ss:$28 sps:$4 sm:$0xff]  }
 0x315   :  { %6977 = vmatpush1.bf16.msra.mxu1 %v8800_v28  ;;  %v629_v28 = vsub.s32 6, %v9480_v10 }
 0x316   :  { %6978 = vmatprep.subr.bf16.mxu1 %v8805_v29  ;;  %6872 = vmatpush1.bf16.msra.mxu0 %v8878_v56  ;;  %v8899_v29 = vld [vmem:[#allocation7 + $0xb68] ss:$28 sps:$4 sm:$0xff]   ;;  %v633_v56 = vsub.s32 7, %v9480_v10 }
 0x317   :  { %6873 = vmatprep.subr.bf16.mxu0 %v8886_v31  ;;  %v8907_v31 = vld [vmem:[#allocation7 + $0xba4] ss:$28 sps:$4 sm:$0xff]  }
 0x319   :  { %6979 = vmatpush1.bf16.msra.mxu1 %v8803_v32  ;;  %v630_v32 = vrot.slane %v9534_v20, %v629_v28 }
 0x31a   :  { %6980 = vmatprep.subr.bf16.mxu1 %v8808_v43  ;;  %6874 = vmatpush1.bf16.msra.mxu0 %v8884_v33  ;;  %v634_v43 = vrot.slane %v9534_v20, %v633_v56  ;;  %v8905_v33 = vld [vmem:[#allocation7 + $0xba0] ss:$28 sps:$4 sm:$0xff]   ;;  %v8917_v20 = vld [vmem:[#allocation7 + $0xc10] ss:$28 sps:$4 sm:$0xff]  }
 0x31b   :  { %6875 = vmatprep.subr.bf16.mxu0 %v8892_v36  ;;  %v8913_v36 = vld [vmem:[#allocation7 + $0xbdc] ss:$28 sps:$4 sm:$0xff]   ;;  %v8962_v56 = vld [vmem:[#allocation7 + $0x1d0] ss:$28 sps:$4 sm:$0xff]  }
 0x31d   :  { %6981 = vmatpush1.bf16.msra.mxu1 %v8806_v37 }
 0x31e   :  { %6982 = vmatprep.subr.bf16.mxu1 %v8811_v38  ;;  %6876 = vmatpush1.bf16.msra.mxu0 %v8890_v39 }
 0x31f   :  { %6877 = vmatprep.subr.bf16.mxu0 %v8898_v41 }
 0x321   :  { %6983 = vmatpush1.bf16.msra.mxu1 %v8809_v42 }
 0x322   :  { %6984 = vmatprep.subr.bf16.mxu1 %v8814_v46  ;;  %6878 = vmatpush1.bf16.msra.mxu0 %v8896_v47  ;;  %v8911_v46 = vld [vmem:[#allocation7 + $0xbd8] ss:$28 sps:$4 sm:$0xff]  }
 0x323   :  { %6879 = vmatprep.subr.bf16.mxu0 %v8904_v27 }
 0x325   :  { %6985 = vmatpush1.bf16.msra.mxu1 %v8812_v48  ;;  %v8919_v48 = vld [vmem:[#allocation7 + $0xc14] ss:$28 sps:$4 sm:$0xff]  }
 0x326   :  { %6986 = vmatprep.subr.bf16.mxu1 %v8817_v49  ;;  %6880 = vmatpush1.bf16.msra.mxu0 %v8902_v50 }
 0x327   :  { %6881 = vmatprep.subr.bf16.mxu0 %v8910_v52  ;;  %v8914_v52 = vld [vmem:[#allocation7 + $0x10] ss:$28 sps:$4 sm:$0xff]  }
 0x329   :  { %6987 = vmatpush1.bf16.msra.mxu1 %v8815_v54 }
 0x32a   :  { %6988 = vmatprep.subr.bf16.mxu1 %v8823_v55  ;;  %6882 = vmatpush1.bf16.msra.mxu0 %v8908_v58  ;;  %v8922_v55 = vld [vmem:[#allocation7 + $0x4c] ss:$28 sps:$4 sm:$0xff]  }
 0x32b   :  { %7056 = vmatprep.subr.bf16.mxu0 %v8916_v60  ;;  %v8925_v58 = vld [vmem:[#allocation7 + $0xc4c] ss:$28 sps:$4 sm:$0xff]  }
 0x32c   :  { %v8920_v60 = vld [vmem:[#allocation7 + $0x48] ss:$28 sps:$4 sm:$0xff]  }
 0x32d   :  { %6989 = vmatpush1.bf16.msra.mxu1 %v8821_v24  ;;  %v8923_v24 = vld [vmem:[#allocation7 + $0xc48] ss:$28 sps:$4 sm:$0xff]  }
 0x32e   :  { %6990 = vmatprep.subr.bf16.mxu1 %v8829_v59  ;;  %v8928_v59 = vld [vmem:[#allocation7 + $0x84] ss:$28 sps:$4 sm:$0xff]  }
 0x331   :  { %6991 = vmatpush1.bf16.msra.mxu1 %v8827_v62  ;;  %v8931_v62 = vld [vmem:[#allocation7 + $0xc84] ss:$28 sps:$4 sm:$0xff]  }
 0x332   :  { %6992 = vmatprep.subr.bf16.mxu1 %v8835_v0  ;;  %v8926_v0 = vld [vmem:[#allocation7 + $0x80] ss:$28 sps:$4 sm:$0xff]  }
 0x335   :  { %6993 = vmatpush1.bf16.msra.mxu1 %v8833_v63  ;;  %v8929_v63 = vld [vmem:[#allocation7 + $0xc80] ss:$28 sps:$4 sm:$0xff]  }
 0x336   :  { %6994 = vmatprep.subr.bf16.mxu1 %v8841_v2  ;;  %v8934_v2 = vld [vmem:[#allocation7 + $0xbc] ss:$28 sps:$4 sm:$0xff]  }
 0x339   :  { %6995 = vmatpush1.bf16.msra.mxu1 %v8839_v45  ;;  %v8937_v45 = vld [vmem:[#allocation7 + $0xcbc] ss:$28 sps:$4 sm:$0xff]  }
 0x33a   :  { %6996 = vmatprep.subr.bf16.mxu1 %v8847_v3  ;;  %v8932_v3 = vld [vmem:[#allocation7 + $0xb8] ss:$28 sps:$4 sm:$0xff]  }
 0x33d   :  { %6997 = vmatpush1.bf16.msra.mxu1 %v8845_v4  ;;  %v8935_v4 = vld [vmem:[#allocation7 + $0xcb8] ss:$28 sps:$4 sm:$0xff]  }
 0x33e   :  { %6998 = vmatprep.subr.bf16.mxu1 %v8853_v5  ;;  %v8940_v5 = vld [vmem:[#allocation7 + $0xf4] ss:$28 sps:$4 sm:$0xff]  }
 0x341   :  { %6999 = vmatpush1.bf16.msra.mxu1 %v8851_v6  ;;  %v8943_v6 = vld [vmem:[#allocation7 + $0xcf4] ss:$28 sps:$4 sm:$0xff]  }
 0x342   :  { %7000 = vmatprep.subr.bf16.mxu1 %v8859_v7  ;;  %v8938_v7 = vld [vmem:[#allocation7 + $0xf0] ss:$28 sps:$4 sm:$0xff]  }
 0x345   :  { %7001 = vmatpush1.bf16.msra.mxu1 %v8857_v16  ;;  %v8941_v16 = vld [vmem:[#allocation7 + $0xcf0] ss:$28 sps:$4 sm:$0xff]  }
 0x346   :  { %7002 = vmatprep.subr.bf16.mxu1 %v8865_v9  ;;  %v8946_v9 = vld [vmem:[#allocation7 + $0x12c] ss:$28 sps:$4 sm:$0xff]  }
 0x349   :  { %7003 = vmatpush1.bf16.msra.mxu1 %v8863_v51  ;;  %v8949_v51 = vld [vmem:[#allocation7 + $0xd2c] ss:$28 sps:$4 sm:$0xff]  }
 0x34a   :  { %7004 = vmatprep.subr.bf16.mxu1 %v8871_v11  ;;  %v8944_v11 = vld [vmem:[#allocation7 + $0x128] ss:$28 sps:$4 sm:$0xff]  }
 0x34d   :  { %7005 = vmatpush1.bf16.msra.mxu1 %v8869_v12  ;;  %v8947_v12 = vld [vmem:[#allocation7 + $0xd28] ss:$28 sps:$4 sm:$0xff]  }
 0x34e   :  { %7015 = vmatprep.subr.bf16.mxu1 %v8877_v53  ;;  %v8952_v53 = vld [vmem:[#allocation7 + $0x164] ss:$28 sps:$4 sm:$0xff]  }
 0x350   :  { %7007 = vmatmul.mubr.bf16.vlgmr.msra.gmra.mrb[12].mxu1 %v9544_v44 }
 0x351   :  { %7016 = vmatpush1.bf16.msra.mxu1 %v8875_v13  ;;  %v8955_v13 = vld [vmem:[#allocation7 + $0xd64] ss:$28 sps:$4 sm:$0xff]  }
 0x352   :  { %7017 = vmatprep.subr.bf16.mxu1 %v8883_v14  ;;  %v8950_v14 = vld [vmem:[#allocation7 + $0x160] ss:$28 sps:$4 sm:$0xff]  }
 0x355   :  { %7018 = vmatpush1.bf16.msra.mxu1 %v8881_v15  ;;  %v8953_v15 = vld [vmem:[#allocation7 + $0xd60] ss:$28 sps:$4 sm:$0xff]  }
 0x356   :  { %7019 = vmatprep.subr.bf16.mxu1 %v8889_v61  ;;  %v8958_v61 = vld [vmem:[#allocation7 + $0x19c] ss:$28 sps:$4 sm:$0xff]  }
 0x359   :  { %7020 = vmatpush1.bf16.msra.mxu1 %v8887_v35  ;;  %v8961_v35 = vld [vmem:[#allocation7 + $0xd9c] ss:$28 sps:$4 sm:$0xff]  }
 0x35a   :  { %7021 = vmatprep.subr.bf16.mxu1 %v8895_v22  ;;  %v8956_v22 = vld [vmem:[#allocation7 + $0x198] ss:$28 sps:$4 sm:$0xff]  }
 0x35d   :  { %7022 = vmatpush1.bf16.msra.mxu1 %v8893_v23  ;;  %v8959_v23 = vld [vmem:[#allocation7 + $0xd98] ss:$28 sps:$4 sm:$0xff]  }
 0x35e   :  { %7023 = vmatprep.subr.bf16.mxu1 %v8901_v26  ;;  %v8964_v26 = vld [vmem:[#allocation7 + $0x1d4] ss:$28 sps:$4 sm:$0xff]  }
 0x361   :  { %7024 = vmatpush1.bf16.msra.mxu1 %v8899_v29  ;;  %v8967_v29 = vld [vmem:[#allocation7 + $0xdd4] ss:$28 sps:$4 sm:$0xff]  }
 0x362   :  { %7025 = vmatprep.subr.bf16.mxu1 %v8907_v31  ;;  %v8965_v31 = vld [vmem:[#allocation7 + $0xdd0] ss:$28 sps:$4 sm:$0xff]  }
 0x363   :  { %v3852_v37 = vpop.f32.mrb[8].mxu1 }
 0x364   :  { %v8460_v38 = vadd.f32 %v3852_v37, %v630_v32  ;;  %v3854_v39 = vpop.f32.mrb[9].mxu1  ;;  %v8970_v32 = vld [vmem:[#allocation7 + $0x20c] ss:$28 sps:$4 sm:$0xff]   ;;  %v8975_v37 = vld [vmem:[#allocation7 + $0x244] ss:$28 sps:$4 sm:$0xff]  }
 0x365   :  { %v8461_v41 = vadd.f32 %v3854_v39, %v634_v43  ;;  %v3856_v42 = vpop.f32.mrb[10].mxu1  ;;  %7026 = vmatpush1.bf16.msra.mxu1 %v8905_v33  ;;  %v8971_v43 = vld [vmem:[#allocation7 + $0x1d8] ss:$28 sps:$4 sm:$0xff]   ;;  %v8968_v33 = vld [vmem:[#allocation7 + $0x208] ss:$28 sps:$4 sm:$0xff]  }
 0x366   :  { %v3865_v47 = vmax.f32 %v8460_v38, 0.0  ;;  %v3857_v27 = vpop.f32.mrb[11].mxu1  ;;  %7027 = vmatprep.subr.bf16.mxu1 %v8913_v36  ;;  %v8972_v36 = vld [vmem:[#allocation7 + $0x18] ss:$28 sps:$4 sm:$0xff]   ;;  %v8976_v38 = vld [vmem:[#allocation7 + $0x210] ss:$28 sps:$4 sm:$0xff]  }
 0x367   :  { %v3866_v49 = vmax.f32 %v8461_v41, 0.0  ;;  %v8973_v39 = vld [vmem:[#allocation7 + $0x240] ss:$28 sps:$4 sm:$0xff]   ;;  %v8977_v41 = vld [vmem:[#allocation7 + $0x50] ss:$28 sps:$4 sm:$0xff]  }
 0x368   :  { %v9559_v54 = vpack.c.bf16 %v3865_v47, %v3865_v47  ;;  %v8980_v42 = vld [vmem:[#allocation7 + $0x27c] ss:$28 sps:$4 sm:$0xff]   ;;  %v8982_v27 = vld [vmem:[#allocation7 + $0x88] ss:$28 sps:$4 sm:$0xff]  }
 0x369   :  { %v9557_v50 = vpack.c.bf16 %v3866_v49, %v3866_v49  ;;  %7028 = vmatpush1.bf16.msra.mxu1 %v8911_v46  ;;  %v8981_v46 = vld [vmem:[#allocation7 + $0x248] ss:$28 sps:$4 sm:$0xff]   ;;  %v8978_v47 = vld [vmem:[#allocation7 + $0x278] ss:$28 sps:$4 sm:$0xff]   ;;  %v8986_v49 = vld [vmem:[#allocation7 + $0x280] ss:$28 sps:$4 sm:$0xff]  }
 0x36a   :  { %7029 = vmatprep.subr.bf16.mxu1 %v8919_v48  ;;  %v8985_v48 = vld [vmem:[#allocation7 + $0x2b4] ss:$28 sps:$4 sm:$0xff]  }
 0x36b   :  { %6883 = vmatprep.mubr.bf16.mxu0 %v9557_v50  ;;  %7047 = vmatprep.mubr.bf16.mxu1 %v9557_v50 }
 0x36c   :  { %6884 = vmatmul.mubr.bf16.vlgmr.msra.gmra.mrb[8].mxu0 %v9559_v54 }
 0x36d   :  { %7057 = vmatpush1.bf16.msra.mxu0 %v8914_v52  ;;  %7030 = vmatpush1.bf16.msra.mxu1 %v8917_v20  ;;  %v8983_v52 = vld [vmem:[#allocation7 + $0x2b0] ss:$28 sps:$4 sm:$0xff]   ;;  %v8987_v20 = vld [vmem:[#allocation7 + $0xc0] ss:$28 sps:$4 sm:$0xff]  }
 0x36e   :  { %7088 = vmatprep.mubr.bf16.mxu0 %v9499_v30  ;;  %7058 = vmatprep.subr.bf16.mxu0 %v8922_v55  ;;  %v8990_v55 = vld [vmem:[#allocation7 + $0x2ec] ss:$28 sps:$4 sm:$0xff]  }
 0x36f   :  { %7031 = vmatprep.subr.bf16.mxu1 %v8925_v58  ;;  %v8988_v58 = vld [vmem:[#allocation7 + $0x2e8] ss:$28 sps:$4 sm:$0xff]  }
 0x371   :  { %7059 = vmatpush1.bf16.msra.mxu0 %v8920_v60  ;;  %7032 = vmatpush1.bf16.msra.mxu1 %v8923_v24  ;;  %v8992_v60 = vld [vmem:[#allocation7 + $0xf8] ss:$28 sps:$4 sm:$0xff]   ;;  %v8995_v24 = vld [vmem:[#allocation7 + $0x324] ss:$28 sps:$4 sm:$0xff]  }
 0x372   :  { %7060 = vmatprep.subr.bf16.mxu0 %v8928_v59  ;;  %7033 = vmatprep.subr.bf16.mxu1 %v8931_v62  ;;  %v8996_v59 = vld [vmem:[#allocation7 + $0x2f0] ss:$28 sps:$4 sm:$0xff]   ;;  %v8993_v62 = vld [vmem:[#allocation7 + $0x320] ss:$28 sps:$4 sm:$0xff]  }
 0x375   :  { %7061 = vmatpush1.bf16.msra.mxu0 %v8926_v0  ;;  %7034 = vmatpush1.bf16.msra.mxu1 %v8929_v63  ;;  %v8997_v0 = vld [vmem:[#allocation7 + $0x130] ss:$28 sps:$4 sm:$0xff]   ;;  %v9000_v63 = vld [vmem:[#allocation7 + $0x35c] ss:$28 sps:$4 sm:$0xff]  }
 0x376   :  { %7062 = vmatprep.subr.bf16.mxu0 %v8934_v2  ;;  %7035 = vmatprep.subr.bf16.mxu1 %v8937_v45  ;;  %v9001_v2 = vld [vmem:[#allocation7 + $0x328] ss:$28 sps:$4 sm:$0xff]   ;;  %v8998_v45 = vld [vmem:[#allocation7 + $0x358] ss:$28 sps:$4 sm:$0xff]  }
 0x379   :  { %7063 = vmatpush1.bf16.msra.mxu0 %v8932_v3  ;;  %7036 = vmatpush1.bf16.msra.mxu1 %v8935_v4  ;;  %v9002_v3 = vld [vmem:[#allocation7 + $0x168] ss:$28 sps:$4 sm:$0xff]   ;;  %v9005_v4 = vld [vmem:[#allocation7 + $0x394] ss:$28 sps:$4 sm:$0xff]  }
 0x37a   :  { %7064 = vmatprep.subr.bf16.mxu0 %v8940_v5  ;;  %7037 = vmatprep.subr.bf16.mxu1 %v8943_v6  ;;  %v9006_v5 = vld [vmem:[#allocation7 + $0x360] ss:$28 sps:$4 sm:$0xff]   ;;  %v9003_v6 = vld [vmem:[#allocation7 + $0x390] ss:$28 sps:$4 sm:$0xff]  }
 0x37d   :  { %7065 = vmatpush1.bf16.msra.mxu0 %v8938_v7  ;;  %7038 = vmatpush1.bf16.msra.mxu1 %v8941_v16  ;;  %v9007_v7 = vld [vmem:[#allocation7 + $0x1a0] ss:$28 sps:$4 sm:$0xff]   ;;  %v9010_v16 = vld [vmem:[#allocation7 + $0x3cc] ss:$28 sps:$4 sm:$0xff]  }
 0x37e   :  { %7066 = vmatprep.subr.bf16.mxu0 %v8946_v9  ;;  %7039 = vmatprep.subr.bf16.mxu1 %v8949_v51  ;;  %v9011_v9 = vld [vmem:[#allocation7 + $0x558] ss:$28 sps:$4 sm:$0xff]   ;;  %v9008_v51 = vld [vmem:[#allocation7 + $0x3c8] ss:$28 sps:$4 sm:$0xff]  }
 0x381   :  { %7067 = vmatpush1.bf16.msra.mxu0 %v8944_v11  ;;  %7040 = vmatpush1.bf16.msra.mxu1 %v8947_v12  ;;  %v9012_v11 = vld [vmem:[#allocation7 + $0x398] ss:$28 sps:$4 sm:$0xff]   ;;  %v9015_v12 = vld [vmem:[#allocation7 + $0x404] ss:$28 sps:$4 sm:$0xff]  }
 0x382   :  { %7068 = vmatprep.subr.bf16.mxu0 %v8952_v53  ;;  %7041 = vmatprep.subr.bf16.mxu1 %v8955_v13  ;;  %v9016_v53 = vld [vmem:[#allocation7 + $0x590] ss:$28 sps:$4 sm:$0xff]   ;;  %v9013_v13 = vld [vmem:[#allocation7 + $0x400] ss:$28 sps:$4 sm:$0xff]  }
 0x385   :  { %7069 = vmatpush1.bf16.msra.mxu0 %v8950_v14  ;;  %7042 = vmatpush1.bf16.msra.mxu1 %v8953_v15  ;;  %v9017_v14 = vld [vmem:[#allocation7 + $0x3d0] ss:$28 sps:$4 sm:$0xff]   ;;  %v9020_v15 = vld [vmem:[#allocation7 + $0x43c] ss:$28 sps:$4 sm:$0xff]  }
 0x386   :  { %7070 = vmatprep.subr.bf16.mxu0 %v8958_v61  ;;  %7043 = vmatprep.subr.bf16.mxu1 %v8961_v35  ;;  %v9021_v61 = vld [vmem:[#allocation7 + $0x5c8] ss:$28 sps:$4 sm:$0xff]   ;;  %v9018_v35 = vld [vmem:[#allocation7 + $0x438] ss:$28 sps:$4 sm:$0xff]  }
 0x389   :  { %7071 = vmatpush1.bf16.msra.mxu0 %v8956_v22  ;;  %7044 = vmatpush1.bf16.msra.mxu1 %v8959_v23  ;;  %v9022_v22 = vld [vmem:[#allocation7 + $0x408] ss:$28 sps:$4 sm:$0xff]   ;;  %v9025_v23 = vld [vmem:[#allocation7 + $0x474] ss:$28 sps:$4 sm:$0xff]  }
 0x38a   :  { %7072 = vmatprep.subr.bf16.mxu0 %v8964_v26  ;;  %7045 = vmatprep.subr.bf16.mxu1 %v8967_v29  ;;  %v9026_v26 = vld [vmem:[#allocation7 + $0x600] ss:$28 sps:$4 sm:$0xff]   ;;  %v9023_v29 = vld [vmem:[#allocation7 + $0x470] ss:$28 sps:$4 sm:$0xff]  }
 0x38d   :  { %7073 = vmatpush1.bf16.msra.mxu0 %v8962_v56  ;;  %7046 = vmatpush1.bf16.msra.mxu1 %v8965_v31  ;;  %v9030_v56 = vld [vmem:[#allocation7 + $0x4ac] ss:$28 sps:$4 sm:$0xff]  }
 0x38e   :  { %7074 = vmatprep.subr.bf16.mxu0 %v8970_v32  ;;  %8364 = vmatprep.subr.bf16.mxu1 %v8971_v43  ;;  %v9028_v31 = vld [vmem:[#allocation7 + $0x4a8] ss:$28 sps:$4 sm:$0xff]   ;;  %v9032_v32 = vld [vmem:[#allocation7 + $0x478] ss:$28 sps:$4 sm:$0xff]  }
 0x38f   :  { %v9035_v43 = vld [vmem:[#allocation7 + $0x4e4] ss:$28 sps:$4 sm:$0xff]  }
 0x390   :  { %7048 = vmatmul.mubr.bf16.vlgmr.msra.gmra.mrb[12].mxu1 %v9559_v54 }
 0x391   :  { %7075 = vmatpush1.bf16.msra.mxu0 %v8968_v33  ;;  %8365 = vmatpush3.bf16.msra.mxu1 %v8972_v36  ;;  %v9036_v33 = vld [vmem:[#allocation7 + $0x670] ss:$28 sps:$4 sm:$0xff]   ;;  %v9033_v36 = vld [vmem:[#allocation7 + $0x4e0] ss:$28 sps:$4 sm:$0xff]  }
 0x392   :  { %7252 = vmatprep.mubr.bf16.mxu1 %v9499_v30  ;;  %7076 = vmatprep.subr.bf16.mxu0 %v8975_v37  ;;  %v8991_v30 = vld [vmem:[#allocation7 + $0x2b8] ss:$28 sps:$4 sm:$0xff]   ;;  %v9037_v37 = vld [vmem:[#allocation7 + $0x4b0] ss:$28 sps:$4 sm:$0xff]  }
 0x393   :  { %8366 = vmatprep.subr.bf16.mxu1 %v8976_v38  ;;  %v9040_v38 = vld [vmem:[#allocation7 + $0x51c] ss:$28 sps:$4 sm:$0xff]  }
 0x395   :  { %7077 = vmatpush1.bf16.msra.mxu0 %v8973_v39  ;;  %8367 = vmatpush3.bf16.msra.mxu1 %v8977_v41  ;;  %v9041_v39 = vld [vmem:[#allocation7 + $0x6a8] ss:$28 sps:$4 sm:$0xff]   ;;  %v9038_v41 = vld [vmem:[#allocation7 + $0x518] ss:$28 sps:$4 sm:$0xff]  }
 0x396   :  { %7078 = vmatprep.subr.bf16.mxu0 %v8980_v42  ;;  %8368 = vmatprep.subr.bf16.mxu1 %v8981_v46  ;;  %v9042_v42 = vld [vmem:[#allocation7 + $0x4e8] ss:$28 sps:$4 sm:$0xff]   ;;  %v9045_v46 = vld [vmem:[#allocation7 + $0x554] ss:$28 sps:$4 sm:$0xff]  }
 0x399   :  { %7079 = vmatpush1.bf16.msra.mxu0 %v8978_v47  ;;  %8369 = vmatpush3.bf16.msra.mxu1 %v8982_v27  ;;  %v9046_v47 = vld [vmem:[#allocation7 + $0x6e0] ss:$28 sps:$4 sm:$0xff]   ;;  %v9043_v27 = vld [vmem:[#allocation7 + $0x550] ss:$28 sps:$4 sm:$0xff]  }
 0x39a   :  { %7080 = vmatprep.subr.bf16.mxu0 %v8985_v48  ;;  %8370 = vmatprep.subr.bf16.mxu1 %v8986_v49  ;;  %v9047_v48 = vld [vmem:[#allocation7 + $0x520] ss:$28 sps:$4 sm:$0xff]   ;;  %v9050_v49 = vld [vmem:[#allocation7 + $0x58c] ss:$28 sps:$4 sm:$0xff]  }
 0x39d   :  { %7081 = vmatpush1.bf16.msra.mxu0 %v8983_v52  ;;  %8371 = vmatpush3.bf16.msra.mxu1 %v8987_v20  ;;  %v9051_v52 = vld [vmem:[#allocation7 + $0x8d8] ss:$28 sps:$4 sm:$0xff]   ;;  %v9048_v20 = vld [vmem:[#allocation7 + $0x588] ss:$28 sps:$4 sm:$0xff]  }
 0x39e   :  { %7082 = vmatprep.subr.bf16.mxu0 %v8990_v55  ;;  %8372 = vmatprep.subr.bf16.mxu1 %v8991_v30  ;;  %v9052_v55 = vld [vmem:[#allocation7 + $0x718] ss:$28 sps:$4 sm:$0xff]   ;;  %v9055_v30 = vld [vmem:[#allocation7 + $0x5c4] ss:$28 sps:$4 sm:$0xff]  }
 0x3a1   :  { %7083 = vmatpush1.bf16.msra.mxu0 %v8988_v58  ;;  %8373 = vmatpush3.bf16.msra.mxu1 %v8992_v60  ;;  %v9056_v58 = vld [vmem:[#allocation7 + $0x910] ss:$28 sps:$4 sm:$0xff]   ;;  %v9053_v60 = vld [vmem:[#allocation7 + $0x5c0] ss:$28 sps:$4 sm:$0xff]  }
 0x3a2   :  { %7084 = vmatprep.subr.bf16.mxu0 %v8995_v24  ;;  %8374 = vmatprep.subr.bf16.mxu1 %v8996_v59  ;;  %v9057_v24 = vld [vmem:[#allocation7 + $0x750] ss:$28 sps:$4 sm:$0xff]   ;;  %v9060_v59 = vld [vmem:[#allocation7 + $0x5fc] ss:$28 sps:$4 sm:$0xff]  }
 0x3a5   :  { %7085 = vmatpush1.bf16.msra.mxu0 %v8993_v62  ;;  %8375 = vmatpush3.bf16.msra.mxu1 %v8997_v0  ;;  %v9061_v62 = vld [vmem:[#allocation7 + $0x948] ss:$28 sps:$4 sm:$0xff]   ;;  %v9058_v0 = vld [vmem:[#allocation7 + $0x5f8] ss:$28 sps:$4 sm:$0xff]  }
 0x3a6   :  { %7086 = vmatprep.subr.bf16.mxu0 %v9000_v63  ;;  %8376 = vmatprep.subr.bf16.mxu1 %v9001_v2  ;;  %v9062_v63 = vld [vmem:[#allocation7 + $0x788] ss:$28 sps:$4 sm:$0xff]   ;;  %v9065_v2 = vld [vmem:[#allocation7 + $0x634] ss:$28 sps:$4 sm:$0xff]  }
 0x3a9   :  { %7087 = vmatpush1.bf16.msra.mxu0 %v8998_v45  ;;  %8377 = vmatpush3.bf16.msra.mxu1 %v9002_v3  ;;  %v9066_v45 = vld [vmem:[#allocation7 + $0x980] ss:$28 sps:$4 sm:$0xff]   ;;  %v9063_v3 = vld [vmem:[#allocation7 + $0x630] ss:$28 sps:$4 sm:$0xff]  }
 0x3aa   :  { %7097 = vmatprep.subr.bf16.mxu0 %v9005_v4  ;;  %8378 = vmatprep.subr.bf16.mxu1 %v9006_v5  ;;  %v9067_v4 = vld [vmem:[#allocation7 + $0x7c0] ss:$28 sps:$4 sm:$0xff]   ;;  %v9070_v5 = vld [vmem:[#allocation7 + $0x66c] ss:$28 sps:$4 sm:$0xff]  }
 0x3ac   :  { %7089 = vmatmul.mubr.bf16.vlgmr.msra.gmra.mrb[12].mxu0 %v9506_v8 }
 0x3ad   :  { %7098 = vmatpush1.bf16.msra.mxu0 %v9003_v6  ;;  %7129 = vmatprep.mubr.bf16.mxu0 %v9517_v57  ;;  %v9071_v6 = vld [vmem:[#allocation7 + $0x9b8] ss:$28 sps:$4 sm:$0xff]  }
 0x3ae   :  { %8379 = vmatpush3.bf16.msra.mxu1 %v9007_v7  ;;  %7099 = vmatprep.subr.bf16.mxu0 %v9010_v16  ;;  %v9068_v7 = vld [vmem:[#allocation7 + $0x668] ss:$28 sps:$4 sm:$0xff]   ;;  %v9072_v16 = vld [vmem:[#allocation7 + $0x7f8] ss:$28 sps:$4 sm:$0xff]  }
 0x3af   :  { %8386 = vmatprep.subr.bf16.mxu1 %v9011_v9  ;;  %v9075_v9 = vld [vmem:[#allocation7 + $0x6a4] ss:$28 sps:$4 sm:$0xff]  }
 0x3b1   :  { %7100 = vmatpush1.bf16.msra.mxu0 %v9008_v51  ;;  %7253 = vmatmul.mubr.bf16.vlgmr.msra.gmra.mrb[16].mxu1 %v9506_v8  ;;  %v9027_v8 = vld [vmem:[#allocation7 + $0x440] ss:$28 sps:$4 sm:$0xff]   ;;  %v9076_v51 = vld [vmem:[#allocation7 + $0x9f0] ss:$28 sps:$4 sm:$0xff]  }
 0x3b2   :  { %8387 = vmatpush3.bf16.msra.mxu1 %v9012_v11  ;;  %7292 = vmatprep.mubr.bf16.mxu1 %v9517_v57  ;;  %v9031_v57 = vld [vmem:[#allocation7 + $0x638] ss:$28 sps:$4 sm:$0xff]   ;;  %v9073_v11 = vld [vmem:[#allocation7 + $0x6a0] ss:$28 sps:$4 sm:$0xff]  }
 0x3b3   :  { %7101 = vmatprep.subr.bf16.mxu0 %v9015_v12  ;;  %8388 = vmatprep.subr.bf16.mxu1 %v9016_v53  ;;  %v9077_v12 = vld [vmem:[#allocation7 + $0x830] ss:$28 sps:$4 sm:$0xff]   ;;  %v9080_v53 = vld [vmem:[#allocation7 + $0x6dc] ss:$28 sps:$4 sm:$0xff]  }
 0x3b5   :  { %7102 = vmatpush1.bf16.msra.mxu0 %v9013_v13  ;;  %v9081_v13 = vld [vmem:[#allocation7 + $0xa28] ss:$28 sps:$4 sm:$0xff]  }
 0x3b6   :  { %8389 = vmatpush3.bf16.msra.mxu1 %v9017_v14  ;;  %7103 = vmatprep.subr.bf16.mxu0 %v9020_v15  ;;  %v9078_v14 = vld [vmem:[#allocation7 + $0x6d8] ss:$28 sps:$4 sm:$0xff]   ;;  %v9082_v15 = vld [vmem:[#allocation7 + $0x868] ss:$28 sps:$4 sm:$0xff]  }
 0x3b7   :  { %8390 = vmatprep.subr.bf16.mxu1 %v9021_v61  ;;  %v9085_v61 = vld [vmem:[#allocation7 + $0x714] ss:$28 sps:$4 sm:$0xff]  }
 0x3b9   :  { %7104 = vmatpush1.bf16.msra.mxu0 %v9018_v35  ;;  %v9086_v35 = vld [vmem:[#allocation7 + $0xa60] ss:$28 sps:$4 sm:$0xff]  }
 0x3ba   :  { %8391 = vmatpush3.bf16.msra.mxu1 %v9022_v22  ;;  %7105 = vmatprep.subr.bf16.mxu0 %v9025_v23  ;;  %v9083_v22 = vld [vmem:[#allocation7 + $0x710] ss:$28 sps:$4 sm:$0xff]   ;;  %v9087_v23 = vld [vmem:[#allocation7 + $0x8a0] ss:$28 sps:$4 sm:$0xff]  }
 0x3bb   :  { %8392 = vmatprep.subr.bf16.mxu1 %v9026_v26  ;;  %v9090_v26 = vld [vmem:[#allocation7 + $0x74c] ss:$28 sps:$4 sm:$0xff]  }
 0x3bd   :  { %7106 = vmatpush1.bf16.msra.mxu0 %v9023_v29  ;;  %v9091_v29 = vld [vmem:[#allocation7 + $0xc58] ss:$28 sps:$4 sm:$0xff]  }
 0x3be   :  { %8393 = vmatpush3.bf16.msra.mxu1 %v9027_v8  ;;  %7107 = vmatprep.subr.bf16.mxu0 %v9030_v56  ;;  %v9088_v8 = vld [vmem:[#allocation7 + $0x748] ss:$28 sps:$4 sm:$0xff]   ;;  %v9092_v56 = vld [vmem:[#allocation7 + $0xa98] ss:$28 sps:$4 sm:$0xff]  }
 0x3bf   :  { %8394 = vmatprep.subr.bf16.mxu1 %v9031_v57  ;;  %v9095_v57 = vld [vmem:[#allocation7 + $0x784] ss:$28 sps:$4 sm:$0xff]  }
 0x3c1   :  { %7108 = vmatpush1.bf16.msra.mxu0 %v9028_v31  ;;  %v9096_v31 = vld [vmem:[#allocation7 + $0xc90] ss:$28 sps:$4 sm:$0xff]  }
 0x3c2   :  { %8395 = vmatpush3.bf16.msra.mxu1 %v9032_v32  ;;  %7109 = vmatprep.subr.bf16.mxu0 %v9035_v43  ;;  %v9093_v32 = vld [vmem:[#allocation7 + $0x780] ss:$28 sps:$4 sm:$0xff]   ;;  %v9097_v43 = vld [vmem:[#allocation7 + $0xad0] ss:$28 sps:$4 sm:$0xff]  }
 0x3c3   :  { %8396 = vmatprep.subr.bf16.mxu1 %v9036_v33  ;;  %v9100_v33 = vld [vmem:[#allocation7 + $0x7bc] ss:$28 sps:$4 sm:$0xff]  }
 0x3c5   :  { %7110 = vmatpush1.bf16.msra.mxu0 %v9033_v36  ;;  %v9102_v36 = vld [vmem:[#allocation7 + $0xb08] ss:$28 sps:$4 sm:$0xff]  }
 0x3c6   :  { %8397 = vmatpush3.bf16.msra.mxu1 %v9037_v37  ;;  %7111 = vmatprep.subr.bf16.mxu0 %v9040_v38  ;;  %v9105_v37 = vld [vmem:[#allocation7 + $0x7f4] ss:$28 sps:$4 sm:$0xff]   ;;  %v9106_v38 = vld [vmem:[#allocation7 + $0xd00] ss:$28 sps:$4 sm:$0xff]  }
 0x3c7   :  { %8398 = vmatprep.subr.bf16.mxu1 %v9041_v39  ;;  %v9103_v39 = vld [vmem:[#allocation7 + $0x7f0] ss:$28 sps:$4 sm:$0xff]  }
 0x3c9   :  { %7112 = vmatpush1.bf16.msra.mxu0 %v9038_v41  ;;  %v9107_v41 = vld [vmem:[#allocation7 + $0xb40] ss:$28 sps:$4 sm:$0xff]  }
 0x3ca   :  { %8399 = vmatpush3.bf16.msra.mxu1 %v9042_v42  ;;  %7113 = vmatprep.subr.bf16.mxu0 %v9045_v46  ;;  %v9110_v42 = vld [vmem:[#allocation7 + $0x82c] ss:$28 sps:$4 sm:$0xff]   ;;  %v9111_v46 = vld [vmem:[#allocation7 + $0xd38] ss:$28 sps:$4 sm:$0xff]  }
 0x3cb   :  { %8400 = vmatprep.subr.bf16.mxu1 %v9046_v47  ;;  %v9108_v47 = vld [vmem:[#allocation7 + $0x828] ss:$28 sps:$4 sm:$0xff]  }
 0x3cd   :  { %7114 = vmatpush1.bf16.msra.mxu0 %v9043_v27  ;;  %v9112_v27 = vld [vmem:[#allocation7 + $0xb78] ss:$28 sps:$4 sm:$0xff]  }
 0x3ce   :  { %8401 = vmatpush3.bf16.msra.mxu1 %v9047_v48  ;;  %7115 = vmatprep.subr.bf16.mxu0 %v9050_v49  ;;  %v9115_v48 = vld [vmem:[#allocation7 + $0x864] ss:$28 sps:$4 sm:$0xff]   ;;  %v9116_v49 = vld [vmem:[#allocation7 + $0xd70] ss:$28 sps:$4 sm:$0xff]  }
 0x3cf   :  { %8408 = vmatprep.subr.bf16.mxu1 %v9051_v52  ;;  %v9113_v52 = vld [vmem:[#allocation7 + $0x860] ss:$28 sps:$4 sm:$0xff]  }
 0x3d1   :  { %7116 = vmatpush1.bf16.msra.mxu0 %v9048_v20  ;;  %7293 = vmatmul.mubr.bf16.vlgmr.msra.gmra.mrb[20].mxu1 %v9525_v1  ;;  %v9117_v20 = vld [vmem:[#allocation7 + $0xbb0] ss:$28 sps:$4 sm:$0xff]  }
 0x3d2   :  { %8409 = vmatpush3.bf16.msra.mxu1 %v9052_v55  ;;  %7332 = vmatprep.mubr.bf16.mxu1 %v9542_v40  ;;  %v9120_v55 = vld [vmem:[#allocation7 + $0x89c] ss:$28 sps:$4 sm:$0xff]  }
 0x3d3   :  { %7117 = vmatprep.subr.bf16.mxu0 %v9055_v30  ;;  %8410 = vmatprep.subr.bf16.mxu1 %v9056_v58  ;;  %v9121_v30 = vld [vmem:[#allocation7 + $0xda8] ss:$28 sps:$4 sm:$0xff]   ;;  %v9118_v58 = vld [vmem:[#allocation7 + $0x898] ss:$28 sps:$4 sm:$0xff]  }
 0x3d5   :  { %7118 = vmatpush1.bf16.msra.mxu0 %v9053_v60  ;;  %v9122_v60 = vld [vmem:[#allocation7 + $0xbe8] ss:$28 sps:$4 sm:$0xff]  }
 0x3d6   :  { %8411 = vmatpush3.bf16.msra.mxu1 %v9057_v24  ;;  %7119 = vmatprep.subr.bf16.mxu0 %v9060_v59  ;;  %v9125_v24 = vld [vmem:[#allocation7 + $0x8d4] ss:$28 sps:$4 sm:$0xff]   ;;  %v9126_v59 = vld [vmem:[#allocation7 + $0xde0] ss:$28 sps:$4 sm:$0xff]  }
 0x3d7   :  { %8412 = vmatprep.subr.bf16.mxu1 %v9061_v62  ;;  %v9123_v62 = vld [vmem:[#allocation7 + $0x8d0] ss:$28 sps:$4 sm:$0xff]  }
 0x3d9   :  { %7120 = vmatpush1.bf16.msra.mxu0 %v9058_v0  ;;  %v9127_v0 = vld [vmem:[#allocation7 + $0xc20] ss:$28 sps:$4 sm:$0xff]  }
 0x3da   :  { %8413 = vmatpush3.bf16.msra.mxu1 %v9062_v63  ;;  %7121 = vmatprep.subr.bf16.mxu0 %v9065_v2  ;;  %v9130_v63 = vld [vmem:[#allocation7 + $0x90c] ss:$28 sps:$4 sm:$0xff]  }
 0x3db   :  { %8414 = vmatprep.subr.bf16.mxu1 %v9066_v45  ;;  %v9128_v2 = vld [vmem:[#allocation7 + $0x908] ss:$28 sps:$4 sm:$0xff]  }
 0x3dc   :  { %v9133_v45 = vld [vmem:[#allocation7 + $0x944] ss:$28 sps:$4 sm:$0xff]  }
 0x3dd   :  { %7122 = vmatpush1.bf16.msra.mxu0 %v9063_v3  ;;  %v9131_v3 = vld [vmem:[#allocation7 + $0x940] ss:$28 sps:$4 sm:$0xff]  }
 0x3de   :  { %8415 = vmatpush3.bf16.msra.mxu1 %v9067_v4  ;;  %7123 = vmatprep.subr.bf16.mxu0 %v9070_v5  ;;  %v9136_v4 = vld [vmem:[#allocation7 + $0x97c] ss:$28 sps:$4 sm:$0xff]  }
 0x3df   :  { %8416 = vmatprep.subr.bf16.mxu1 %v9071_v6  ;;  %v9134_v5 = vld [vmem:[#allocation7 + $0x978] ss:$28 sps:$4 sm:$0xff]  }
 0x3e0   :  { %v9139_v6 = vld [vmem:[#allocation7 + $0x9b4] ss:$28 sps:$4 sm:$0xff]  }
 0x3e1   :  { %7124 = vmatpush1.bf16.msra.mxu0 %v9068_v7  ;;  %v9137_v7 = vld [vmem:[#allocation7 + $0x9b0] ss:$28 sps:$4 sm:$0xff]  }
 0x3e2   :  { %8417 = vmatpush3.bf16.msra.mxu1 %v9072_v16  ;;  %7125 = vmatprep.subr.bf16.mxu0 %v9075_v9  ;;  %v9142_v16 = vld [vmem:[#allocation7 + $0x9ec] ss:$28 sps:$4 sm:$0xff]  }
 0x3e3   :  { %8418 = vmatprep.subr.bf16.mxu1 %v9076_v51  ;;  %v9140_v9 = vld [vmem:[#allocation7 + $0x9e8] ss:$28 sps:$4 sm:$0xff]  }
 0x3e4   :  { %v9145_v51 = vld [vmem:[#allocation7 + $0xa24] ss:$28 sps:$4 sm:$0xff]  }
 0x3e5   :  { %7126 = vmatpush1.bf16.msra.mxu0 %v9073_v11  ;;  %v9143_v11 = vld [vmem:[#allocation7 + $0xa20] ss:$28 sps:$4 sm:$0xff]  }
 0x3e6   :  { %8419 = vmatpush3.bf16.msra.mxu1 %v9077_v12  ;;  %7127 = vmatprep.subr.bf16.mxu0 %v9080_v53  ;;  %v9148_v12 = vld [vmem:[#allocation7 + $0xa5c] ss:$28 sps:$4 sm:$0xff]  }
 0x3e7   :  { %8420 = vmatprep.subr.bf16.mxu1 %v9081_v13  ;;  %v9146_v53 = vld [vmem:[#allocation7 + $0xa58] ss:$28 sps:$4 sm:$0xff]  }
 0x3e8   :  { %v9151_v13 = vld [vmem:[#allocation7 + $0xa94] ss:$28 sps:$4 sm:$0xff]  }
 0x3e9   :  { %7128 = vmatpush1.bf16.msra.mxu0 %v9078_v14  ;;  %v9149_v14 = vld [vmem:[#allocation7 + $0xa90] ss:$28 sps:$4 sm:$0xff]  }
 0x3ea   :  { %8421 = vmatpush3.bf16.msra.mxu1 %v9082_v15  ;;  %7138 = vmatprep.subr.bf16.mxu0 %v9085_v61  ;;  %v9154_v15 = vld [vmem:[#allocation7 + $0xacc] ss:$28 sps:$4 sm:$0xff]  }
 0x3eb   :  { %8422 = vmatprep.subr.bf16.mxu1 %v9086_v35  ;;  %v9152_v61 = vld [vmem:[#allocation7 + $0xac8] ss:$28 sps:$4 sm:$0xff]  }
 0x3ec   :  { %7130 = vmatmul.mubr.bf16.vlgmr.msra.gmra.mrb[12].mxu0 %v9525_v1  ;;  %v9101_v1 = vld [vmem:[#allocation7 + $0xcc8] ss:$28 sps:$4 sm:$0xff]  }
 0x3ed   :  { %7139 = vmatpush1.bf16.msra.mxu0 %v9083_v22  ;;  %7170 = vmatprep.mubr.bf16.mxu0 %v9542_v40  ;;  %v9098_v40 = vld [vmem:[#allocation7 + $0x7b8] ss:$28 sps:$4 sm:$0xff]   ;;  %v9157_v35 = vld [vmem:[#allocation7 + $0xb04] ss:$28 sps:$4 sm:$0xff]  }
 0x3ee   :  { %8423 = vmatpush3.bf16.msra.mxu1 %v9087_v23  ;;  %7140 = vmatprep.subr.bf16.mxu0 %v9090_v26  ;;  %v9155_v22 = vld [vmem:[#allocation7 + $0xb00] ss:$28 sps:$4 sm:$0xff]   ;;  %v9158_v26 = vld [vmem:[#allocation7 + $0xb38] ss:$28 sps:$4 sm:$0xff]  }
 0x3ef   :  { %8430 = vmatprep.subr.bf16.mxu1 %v9091_v29  ;;  %v9160_v23 = vld [vmem:[#allocation7 + $0xb3c] ss:$28 sps:$4 sm:$0xff]   ;;  %v9163_v29 = vld [vmem:[#allocation7 + $0xb74] ss:$28 sps:$4 sm:$0xff]  }
 0x3f1   :  { %7141 = vmatpush1.bf16.msra.mxu0 %v9088_v8  ;;  %7333 = vmatmul.mubr.bf16.vlgmr.msra.gmra.mrb[24].mxu1 %v9544_v44  ;;  %v9161_v8 = vld [vmem:[#allocation7 + $0xb70] ss:$28 sps:$4 sm:$0xff]  }
 0x3f2   :  { %8431 = vmatpush3.bf16.msra.mxu1 %v9092_v56  ;;  %7372 = vmatprep.mubr.bf16.mxu1 %v9557_v50  ;;  %v9580_v56 = vld [vmem:[#allocation8] sm:$0xff] }
 0x3f3   :  { %7142 = vmatprep.subr.bf16.mxu0 %v9095_v57  ;;  %8432 = vmatprep.subr.bf16.mxu1 %v9096_v31  ;;  %v9164_v57 = vld [vmem:[#allocation7 + $0xba8] ss:$28 sps:$4 sm:$0xff]   ;;  %v4396_v31 = vrot.slane %v9580_v56, %v609_v25  ;;  %v9173_v25 = vld [vmem:[#allocation7 + $0xc50] ss:$28 sps:$4 sm:$0xff]  }
 0x3f5   :  { %7143 = vmatpush1.bf16.msra.mxu0 %v9093_v32  ;;  %v9169_v32 = vld [vmem:[#allocation7 + $0xbe4] ss:$28 sps:$4 sm:$0xff]  }
 0x3f6   :  { %8433 = vmatpush3.bf16.msra.mxu1 %v9097_v43  ;;  %7144 = vmatprep.subr.bf16.mxu0 %v9100_v33 }
 0x3f7   :  { %8434 = vmatprep.subr.bf16.mxu1 %v9101_v1 }
 0x3f9   :  { %7145 = vmatpush1.bf16.msra.mxu0 %v9098_v40 }
 0x3fa   :  { %8435 = vmatpush3.bf16.msra.mxu1 %v9102_v36  ;;  %7146 = vmatprep.subr.bf16.mxu0 %v9105_v37  ;;  %v9167_v37 = vld [vmem:[#allocation7 + $0xbe0] ss:$28 sps:$4 sm:$0xff]  }
 0x3fb   :  { %8436 = vmatprep.subr.bf16.mxu1 %v9106_v38 }
 0x3fd   :  { %7147 = vmatpush1.bf16.msra.mxu0 %v9103_v39  ;;  %v9172_v39 = vld [vmem:[#allocation7 + $0xc1c] ss:$28 sps:$4 sm:$0xff]  }
 0x3fe   :  { %8437 = vmatpush3.bf16.msra.mxu1 %v9107_v41  ;;  %7148 = vmatprep.subr.bf16.mxu0 %v9110_v42  ;;  %v9175_v41 = vld [vmem:[#allocation7 + $0xc54] ss:$28 sps:$4 sm:$0xff]   ;;  %v9178_v42 = vld [vmem:[#allocation7 + $0xc8c] ss:$28 sps:$4 sm:$0xff]  }
 0x3ff   :  { %8438 = vmatprep.subr.bf16.mxu1 %v9111_v46  ;;  %v9176_v46 = vld [vmem:[#allocation7 + $0xc88] ss:$28 sps:$4 sm:$0xff]  }
 0x401   :  { %7149 = vmatpush1.bf16.msra.mxu0 %v9108_v47  ;;  %v9181_v47 = vld [vmem:[#allocation7 + $0xcc4] ss:$28 sps:$4 sm:$0xff]  }
 0x402   :  { %8439 = vmatpush3.bf16.msra.mxu1 %v9112_v27  ;;  %7150 = vmatprep.subr.bf16.mxu0 %v9115_v48  ;;  %v9179_v27 = vld [vmem:[#allocation7 + $0xcc0] ss:$28 sps:$4 sm:$0xff]  }
 0x403   :  { %8440 = vmatprep.subr.bf16.mxu1 %v9116_v49  ;;  %v9184_v48 = vld [vmem:[#allocation7 + $0xcfc] ss:$28 sps:$4 sm:$0xff]  }
 0x404   :  { %v9182_v49 = vld [vmem:[#allocation7 + $0xcf8] ss:$28 sps:$4 sm:$0xff]  }
 0x405   :  { %7151 = vmatpush1.bf16.msra.mxu0 %v9113_v52  ;;  %v9187_v52 = vld [vmem:[#allocation7 + $0xd34] ss:$28 sps:$4 sm:$0xff]  }
 0x406   :  { %8441 = vmatpush3.bf16.msra.mxu1 %v9117_v20  ;;  %7152 = vmatprep.subr.bf16.mxu0 %v9120_v55  ;;  %v9185_v20 = vld [vmem:[#allocation7 + $0xd30] ss:$28 sps:$4 sm:$0xff]  }
 0x407   :  { %8442 = vmatprep.subr.bf16.mxu1 %v9121_v30  ;;  %v9190_v55 = vld [vmem:[#allocation7 + $0xd6c] ss:$28 sps:$4 sm:$0xff]  }
 0x408   :  { %v9188_v30 = vld [vmem:[#allocation7 + $0xd68] ss:$28 sps:$4 sm:$0xff]  }
 0x409   :  { %7153 = vmatpush1.bf16.msra.mxu0 %v9118_v58  ;;  %v9193_v58 = vld [vmem:[#allocation7 + $0xda4] ss:$28 sps:$4 sm:$0xff]  }
 0x40a   :  { %8443 = vmatpush3.bf16.msra.mxu1 %v9122_v60  ;;  %7154 = vmatprep.subr.bf16.mxu0 %v9125_v24  ;;  %v4400_v60 = vrot.slane %v9580_v56, %v613_v21  ;;  %v9191_v24 = vld [vmem:[#allocation7 + $0xda0] ss:$28 sps:$4 sm:$0xff]  }
 0x40b   :  { %8444 = vmatprep.subr.bf16.mxu1 %v9126_v59  ;;  %v4404_v59 = vrot.slane %v9580_v56, %v617_v34 }
 0x40d   :  { %7155 = vmatpush1.bf16.msra.mxu0 %v9123_v62  ;;  %v9196_v62 = vld [vmem:[#allocation7 + $0xddc] ss:$28 sps:$4 sm:$0xff]  }
 0x40e   :  { %8445 = vmatpush3.bf16.msra.mxu1 %v9127_v0  ;;  %7156 = vmatprep.subr.bf16.mxu0 %v9130_v63 }
 0x411   :  { %7157 = vmatpush1.bf16.msra.mxu0 %v9128_v2  ;;  %7373 = vmatmul.mubr.bf16.vlgmr.msra.gmra.mrb[28].mxu1 %v9559_v54 }
 0x412   :  { %7158 = vmatprep.subr.bf16.mxu0 %v9133_v45 }
 0x415   :  { %7159 = vmatpush1.bf16.msra.mxu0 %v9131_v3 }
 0x416   :  { %7160 = vmatprep.subr.bf16.mxu0 %v9136_v4  ;;  %v9194_v4 = vld [vmem:[#allocation7 + $0xdd8] ss:$28 sps:$4 sm:$0xff]  }
 0x419   :  { %7161 = vmatpush1.bf16.msra.mxu0 %v9134_v5 }
 0x41a   :  { %7162 = vmatprep.subr.bf16.mxu0 %v9139_v6 }
 0x41d   :  { %7163 = vmatpush1.bf16.msra.mxu0 %v9137_v7 }
 0x41e   :  { %7164 = vmatprep.subr.bf16.mxu0 %v9142_v16 }
 0x421   :  { %7165 = vmatpush1.bf16.msra.mxu0 %v9140_v9  ;;  %v4416_v9 = vrot.slane %v9580_v56, %v629_v28  ;;  %v4408_v28 = vrot.slane %v9580_v56, %v621_v17 }
 0x422   :  { %7166 = vmatprep.subr.bf16.mxu0 %v9145_v51 }
 0x425   :  { %7167 = vmatpush1.bf16.msra.mxu0 %v9143_v11 }
 0x426   :  { %7168 = vmatprep.subr.bf16.mxu0 %v9148_v12 }
 0x429   :  { %7169 = vmatpush1.bf16.msra.mxu0 %v9146_v53 }
 0x42a   :  { %7179 = vmatprep.subr.bf16.mxu0 %v9151_v13 }
 0x42c   :  { %7171 = vmatmul.mubr.bf16.vlgmr.msra.gmra.mrb[12].mxu0 %v9544_v44  ;;  %v9166_v44 = vld [vmem:[#allocation7 + $0xbac] ss:$28 sps:$4 sm:$0xff]  }
 0x42d   :  { %7180 = vmatpush1.bf16.msra.mxu0 %v9149_v14  ;;  %7211 = vmatprep.mubr.bf16.mxu0 %v9557_v50  ;;  %v4392_v50 = vrot.slane %v9580_v56, %v605_v19  ;;  %v9170_v19 = vld [vmem:[#allocation7 + $0xc18] ss:$28 sps:$4 sm:$0xff]  }
 0x42e   :  { %7181 = vmatprep.subr.bf16.mxu0 %v9154_v15 }
 0x431   :  { %7182 = vmatpush1.bf16.msra.mxu0 %v9152_v61 }
 0x432   :  { %7183 = vmatprep.subr.bf16.mxu0 %v9157_v35 }
 0x435   :  { %7184 = vmatpush1.bf16.msra.mxu0 %v9155_v22 }
 0x436   :  { %7185 = vmatprep.subr.bf16.mxu0 %v9160_v23 }
 0x439   :  { %7186 = vmatpush1.bf16.msra.mxu0 %v9158_v26 }
 0x43a   :  { %7187 = vmatprep.subr.bf16.mxu0 %v9163_v29 }
 0x43d   :  { %7188 = vmatpush1.bf16.msra.mxu0 %v9161_v8 }
 0x43e   :  { %7189 = vmatprep.subr.bf16.mxu0 %v9166_v44 }
 0x43f   :  { %v6885_v43 = vpop.f32.mrb[8].mxu0 }
 0x440   :  { %v8462_v33 = vadd.f32 %v6885_v43, %v4392_v50  ;;  %v6887_v1 = vpop.f32.mrb[9].mxu0 }
 0x441   :  { %v8463_v40 = vadd.f32 %v6887_v1, %v4396_v31  ;;  %7190 = vmatpush1.bf16.msra.mxu0 %v9164_v57  ;;  %v6889_v36 = vpop.f32.mrb[10].mxu0 }
 0x442   :  { %7380 = vst [vmem:[#allocation10] sm:$0xff] %v8462_v33  ;;  %v6890_v38 = vpop.f32.mrb[11].mxu0  ;;  %7191 = vmatprep.subr.bf16.mxu0 %v9169_v32  ;;  %v4412_v32 = vrot.slane %v9580_v56, %v625_v18 }
 0x443   :  { %7381 = vst [vmem:[#allocation10 + $0x8] sm:$0xff] %v8463_v40 }
 0x445   :  { %7192 = vmatpush1.bf16.msra.mxu0 %v9167_v37 }
 0x446   :  { %7193 = vmatprep.subr.bf16.mxu0 %v9172_v39 }
 0x449   :  { %7194 = vmatpush1.bf16.msra.mxu0 %v9170_v19 }
 0x44a   :  { %7195 = vmatprep.subr.bf16.mxu0 %v9175_v41 }
 0x44d   :  { %7196 = vmatpush1.bf16.msra.mxu0 %v9173_v25 }
 0x44e   :  { %7197 = vmatprep.subr.bf16.mxu0 %v9178_v42 }
 0x451   :  { %7198 = vmatpush1.bf16.msra.mxu0 %v9176_v46 }
 0x452   :  { %7199 = vmatprep.subr.bf16.mxu0 %v9181_v47 }
 0x455   :  { %7200 = vmatpush1.bf16.msra.mxu0 %v9179_v27 }
 0x456   :  { %7201 = vmatprep.subr.bf16.mxu0 %v9184_v48 }
 0x459   :  { %7202 = vmatpush1.bf16.msra.mxu0 %v9182_v49 }
 0x45a   :  { %7203 = vmatprep.subr.bf16.mxu0 %v9187_v52 }
 0x45d   :  { %7204 = vmatpush1.bf16.msra.mxu0 %v9185_v20 }
 0x45e   :  { %7205 = vmatprep.subr.bf16.mxu0 %v9190_v55 }
 0x461   :  { %7206 = vmatpush1.bf16.msra.mxu0 %v9188_v30 }
 0x462   :  { %7207 = vmatprep.subr.bf16.mxu0 %v9193_v58 }
 0x463   :  { %v7049_v0 = vpop.f32.mrb[12].mxu1 }
 0x464   :  { %v8464_v63 = vadd.f32 %v7049_v0, %v4400_v60  ;;  %v7051_v2 = vpop.f32.mrb[13].mxu1 }
 0x465   :  { %v8465_v45 = vadd.f32 %v7051_v2, %v4404_v59  ;;  %7208 = vmatpush1.bf16.msra.mxu0 %v9191_v24  ;;  %v7053_v3 = vpop.f32.mrb[14].mxu1 }
 0x466   :  { %7382 = vst [vmem:[#allocation10 + $0x10] sm:$0xff] %v8464_v63  ;;  %v7054_v5 = vpop.f32.mrb[15].mxu1  ;;  %7209 = vmatprep.subr.bf16.mxu0 %v9196_v62 }
 0x467   :  { %7383 = vst [vmem:[#allocation10 + $0x18] sm:$0xff] %v8465_v45 }
 0x469   :  { %7210 = vmatpush1.bf16.msra.mxu0 %v9194_v4 }
 0x46c   :  { %7212 = vmatmul.mubr.bf16.vlgmr.msra.gmra.mrb[12].mxu0 %v9559_v54 }
 0x484   :  { %v8380_v21 = vpop.f32.mrb[16].mxu1 }
 0x485   :  { %v8381_v6 = vpop.f32.mrb[17].mxu1 }
 0x486   :  { %v8382_v7 = vadd.f32 %v8381_v6, %v8380_v21  ;;  %v8383_v34 = vpop.f32.mrb[18].mxu1 }
 0x487   :  { %v8384_v16 = vpop.f32.mrb[19].mxu1 }
 0x488   :  { %v7255_v12 = vadd.f32 %v8382_v7, %v4416_v9 }
 0x4a4   :  { %v8402_v51 = vpop.f32.mrb[20].mxu1 }
 0x4a5   :  { %v8403_v11 = vpop.f32.mrb[21].mxu1 }
 0x4a6   :  { %v8404_v53 = vadd.f32 %v8403_v11, %v8402_v51  ;;  %v8405_v13 = vpop.f32.mrb[22].mxu1 }
 0x4a7   :  { %v8406_v14 = vpop.f32.mrb[23].mxu1 }
 0x4a8   :  { %v7295_v15 = vadd.f32 %v8404_v53, %v7255_v12 }
 0x4c4   :  { %v8424_v61 = vpop.f32.mrb[24].mxu1 }
 0x4c5   :  { %v8425_v35 = vpop.f32.mrb[25].mxu1 }
 0x4c6   :  { %v8426_v22 = vadd.f32 %v8425_v35, %v8424_v61  ;;  %v8427_v54 = vpop.f32.mrb[26].mxu1 }
 0x4c7   :  { %v8428_v23 = vpop.f32.mrb[27].mxu1 }
 0x4c8   :  { %v7335_v26 = vadd.f32 %v8426_v22, %v7295_v15 }
 0x4e4   :  { %v8446_v29 = vpop.f32.mrb[28].mxu1 }
 0x4e5   :  { %v8447_v8 = vpop.f32.mrb[29].mxu1 }
 0x4e6   :  { %v8448_v44 = vadd.f32 %v8447_v8, %v8446_v29  ;;  %v8449_v50 = vpop.f32.mrb[30].mxu1 }
 0x4e7   :  { %v8450_v57 = vpop.f32.mrb[31].mxu1 }
 0x4e8   :  { %v7375_v31 = vadd.f32 %v8448_v44, %v7335_v26 }
 0x4ea   :  { %7386 = vst [vmem:[#allocation10 + $0x30] sm:$0xff] %v7375_v31 }
 0x53f   :  { %v7213_v43 = vpop.f32.mrb[12].mxu0 }
 0x540   :  { %v8466_v33 = vadd.f32 %v7213_v43, %v4408_v28  ;;  %v7215_v1 = vpop.f32.mrb[13].mxu0 }
 0x541   :  { %v8467_v40 = vadd.f32 %v7215_v1, %v4412_v32  ;;  %v7217_v36 = vpop.f32.mrb[14].mxu0 }
 0x542   :  { %7384 = vst [vmem:[#allocation10 + $0x20] sm:$0xff] %v8466_v33  ;;  %v7218_v37 = vpop.f32.mrb[15].mxu0 }
 0x543   :  { %7385 = vst [vmem:[#allocation10 + $0x28] sm:$0xff] %v8467_v40 }
 0x544   :  { %9297 = shalt.err (!%p9294_p8)
}
 0x545   :  { %s9298_s10 = scalar_lea.hbm %s9621_s5, 896 }
 0x546   :  { %p9299_p9 = scmp.ne.s32.totalorder %s9621_s5, %s9298_s10  ;;  %p9302_p10 = scmp.lt.u32.totalorder %s9298_s10, %s9621_s5 }
 0x548   :  { %p9304_p11 = pnand %p9302_p10, %p9299_p9 }
 0x54a   :  { %9307 = shalt.err (!%p9304_p11)
}
 0x54b   :  { %7396 = dma.vmem_to_hbm [thread:$0]  %s7394_s6, 896, %s9621_s5, [#allocation4]  }
 0x54c   :  { %9314 = dma.done.wait [#allocation4], 896  }
 0x54d   :  { %9315 = vsyncadd [#allocation4], 4294966400 }
 0x54e   :  { %7400 = vsyncpa [#allocation3], 1 }
 0x54f   :  { %7401 = vsyncpa [#allocation6], 1 }
 0x550   :  { %7402 = vsyncpa [#allocation9], 1 }
 0x551   :  { %7403 = vsyncpa [#allocation4], 1 }

</bundles_post_ra>
